<compile_context>
chip_gen: v6e
topology: v6e:2x2x1
jax: 0.10.0
libtpu: 0.0.40
codegen_flags: <defaults>
</compile_context>

<pallas_src>
import functools

import jax
import jax.numpy as jnp
from jax.experimental import pallas as pl
from jax.experimental.pallas import tpu as pltpu


# -----------------------------------------------------------------------------
# Kernel 1: static-input drive  xz = Wx^T @ patches + (bx + bh)
#   grid = (G,) with F frames batched along the lane axis.  Runs once per
#   frame-block, OUTSIDE the recurrence.
# -----------------------------------------------------------------------------
def _drive_kernel(patch_ref, wx_ref, bxh_ref, xz_ref):
    xz_ref[0] = (
        jnp.dot(wx_ref[...], patch_ref[0], preferred_element_type=jnp.float32)
        + bxh_ref[...])


# -----------------------------------------------------------------------------
# Kernel 2: the whole T-step recurrence for one block of F frames.
#   grid = (G,) ["parallel"].  Nothing touches HBM inside the time loop; the
#   only output write is one lane-dense (C, T*F*HW) store at the very end.
# -----------------------------------------------------------------------------
def _rnn_kernel(xz_ref, mask_ref, wh_ref, wo_ref, bo_ref, y_ref,
                nbr_ref, hh_ref, *, T, hidden, W, FHW):
    # Iteration 1: h_0 == 0, so the hidden conv contributes nothing.
    h = jnp.tanh(xz_ref[0])                               # (hidden, FHW) f32
    hh_ref[:, 0:FHW] = h.astype(jnp.bfloat16)

    shifts = [dh * W + dw for dh in (-1, 0, 1) for dw in (-1, 0, 1)]

    # T is static -> fully unrolled (equivalent of lax.fori_loop(unroll=True));
    # h lives in vregs, xz / weights / scratch stay resident in VMEM.
    for t in range(1, T):
        # Stage the 9 shifted + border-masked neighbour copies into ONE
        # (9*hidden, FHW) bf16 VMEM buffer so the 3x3 hidden conv becomes a
        # single K=9*hidden MXU matmul instead of 9 tiny K=hidden matmuls.
        # (Rolls stay f32 -- validated lowering; cast happens at the store.)
        for tap, s in enumerate(shifts):
            nbr = h if s == 0 else pltpu.roll(h, (-s) % FHW, axis=1)
            nbr_ref[tap * hidden:(tap + 1) * hidden, :] = (
                nbr.astype(jnp.bfloat16) * mask_ref[tap])
        conv = jnp.dot(wh_ref[...], nbr_ref[...],
                       preferred_element_type=jnp.float32)
        h = jnp.tanh(xz_ref[0] + conv)        # f32 tanh: safe on v5e as well
        hh_ref[:, t * FHW:(t + 1) * FHW] = h.astype(jnp.bfloat16)

    # Deferred 1x1 readout: one wide matmul over all T iterations at once,
    # then a single lane-dense (C, T*F*HW) store.
    y_ref[0] = (jnp.dot(wo_ref[...], hh_ref[...],
                        preferred_element_type=jnp.float32)
                + bo_ref[...])


# -----------------------------------------------------------------------------
# Host-side one-time prep (outside the recurrence)
# -----------------------------------------------------------------------------
def _im2col_taps_nchw(x):
    """x: (N, C, H, W) -> (N, 9*C, H*W) zero-padded 3x3 patches, tap-major."""
    N, C, H, W = x.shape
    xp = jnp.pad(x, ((0, 0), (0, 0), (1, 1), (1, 1)))
    taps = [xp[:, :, dh:dh + H, dw:dw + W]
            for dh in range(3) for dw in range(3)]
    return jnp.stack(taps, axis=1).reshape(N, 9 * C, H * W)


def _border_masks(H, W):
    """(9, 1, H*W) {0,1} masks: tap (dh,dw) valid where the neighbor is in-bounds."""
    masks = []
    for dh in (-1, 0, 1):
        for dw in (-1, 0, 1):
            r = jnp.arange(H) + dh
            c = jnp.arange(W) + dw
            m = (((r >= 0) & (r < H))[:, None] &
                 ((c >= 0) & (c < W))[None, :])
            masks.append(m.reshape(1, H * W))
    return jnp.stack(masks, axis=0)


# -----------------------------------------------------------------------------
# Parameters (deterministic synthetic init; output-major layouts)
# -----------------------------------------------------------------------------
def init_params(key, imgch, hidden):
    k1, k2, k3, k4, k5 = jax.random.split(key, 5)
    s = 0.1
    return {
        "wx_t": (s * jax.random.normal(k1, (hidden, 9 * imgch))).astype(jnp.float32),
        "wh_t": (s * jax.random.normal(k2, (9, hidden, hidden))).astype(jnp.float32),
        "wo_t": (s * jax.random.normal(k3, (imgch, hidden))).astype(jnp.bfloat16),
        # bx + bh folded into one per-channel drive bias.
        "bxh": (0.01 * jax.random.normal(k4, (hidden, 1))).astype(jnp.float32),
        "bo": (0.01 * jax.random.normal(k5, (imgch, 1))).astype(jnp.float32),
    }


# -----------------------------------------------------------------------------
# Forward pass (mirrors Network_combinedStaticSemantic.forward)
# -----------------------------------------------------------------------------
def network_combined_static_semantic_forward(seq_tensor, numiterations, params,
                                             frames_per_block=2):
    batch, seqlen, imght, imgwd, imgch = seq_tensor.shape
    N, C, H, W = batch * seqlen, imgch, imght, imgwd
    HW = H * W
    T = int(numiterations)
    hidden = params["wh_t"].shape[1]

    # Frames batched along the lane axis.  Keep >= 2 grid blocks so the
    # "parallel" axis can feed both TensorCores on v7x.
    F = max(1, min(frames_per_block, N))
    while N % F != 0:
        F -= 1
    G = N // F
    FHW = F * HW

    # Exact reproduction of the PyTorch `.contiguous().view(...)`: a raw
    # row-major reshape (NOT a permute), giving an NCHW-interpreted tensor.
    x_nchw = seq_tensor.reshape(N, C, H, W).astype(jnp.float32)

    # --- one-time host prep ---------------------------------------------
    patches = _im2col_taps_nchw(x_nchw)                    # (N, 9C, HW)
    K = 9 * C
    Kp = ((K + 15) // 16) * 16                             # pad K for bf16 packing
    patches = jnp.pad(patches, ((0, 0), (0, Kp - K), (0, 0)))
    patches_g = (patches.reshape(G, F, Kp, HW)             # frames -> lane axis
                 .transpose(0, 2, 1, 3)
                 .reshape(G, Kp, FHW)
                 .astype(jnp.bfloat16))
    wx = jnp.pad(params["wx_t"], ((0, 0), (0, Kp - K))).astype(jnp.bfloat16)
    # Wh taps stacked along K: (9, hid, hid) -> (hid, 9*hid).
    wh = (params["wh_t"].transpose(1, 0, 2)
          .reshape(hidden, 9 * hidden).astype(jnp.bfloat16))
    masks = jnp.tile(_border_masks(H, W), (1, 1, F)).astype(jnp.bfloat16)

    cparams = pltpu.CompilerParams(
        dimension_semantics=("parallel",),
        vmem_limit_bytes=32 * 1024 * 1024)

    # --- kernel 1: static drive xz (once per frame block) ----------------
    xz = pl.pallas_call(
        _drive_kernel,
        out_shape=jax.ShapeDtypeStruct((G, hidden, FHW), jnp.float32),
        grid=(G,),
        in_specs=[
            pl.BlockSpec((1, Kp, FHW), lambda g: (g, 0, 0)),   # patches (bf16)
            pl.BlockSpec((hidden, Kp), lambda g: (0, 0)),      # Wx^T
            pl.BlockSpec((hidden, 1), lambda g: (0, 0)),       # bx + bh
        ],
        out_specs=pl.BlockSpec((1, hidden, FHW), lambda g: (g, 0, 0)),
        compiler_params=cparams,
    )(patches_g, wx, params["bxh"])

    # --- kernel 2: whole recurrence, T iterations inside one grid step ---
    rnn = functools.partial(_rnn_kernel, T=T, hidden=hidden, W=W, FHW=FHW)
    y = pl.pallas_call(
        rnn,
        out_shape=jax.ShapeDtypeStruct((G, C, T * FHW), jnp.float32),
        grid=(G,),
        in_specs=[
            pl.BlockSpec((1, hidden, FHW), lambda g: (g, 0, 0)),   # xz drive
            pl.BlockSpec((9, 1, FHW), lambda g: (0, 0, 0)),        # border masks
            pl.BlockSpec((hidden, 9 * hidden), lambda g: (0, 0)),  # Wh stacked
            pl.BlockSpec((C, hidden), lambda g: (0, 0)),           # Wo^T
            pl.BlockSpec((C, 1), lambda g: (0, 0)),                # bo
        ],
        out_specs=pl.BlockSpec((1, C, T * FHW), lambda g: (g, 0, 0)),
        scratch_shapes=[
            pltpu.VMEM((9 * hidden, FHW), jnp.bfloat16),   # neighbour stack
            pltpu.VMEM((hidden, T * FHW), jnp.bfloat16),   # h history (readout)
        ],
        compiler_params=cparams,
    )(xz, masks, wh, params["wo_t"], params["bo"])

    # (G, C, T*F*HW) -> (batch*seqlen, numiterations, imgch, imght, imgwd);
    # single untangle at the end, no per-iteration transposes.
    y = (y.reshape(G, C, T, F, H, W)
         .transpose(0, 3, 2, 1, 4, 5)
         .reshape(N, T, C, H, W))
    return y


if __name__ == "__main__":
    key = jax.random.PRNGKey(0)
    k_in, k_par = jax.random.split(key)

    batch, seqlen, imght, imgwd, imgch = 2, 2, 16, 16, 4
    hidden = 32
    numiterations = 3

    seq_tensor = jax.random.normal(
        k_in, (batch, seqlen, imght, imgwd, imgch), jnp.float32)
    params = init_params(k_par, imgch, hidden)

    fwd = jax.jit(network_combined_static_semantic_forward, static_argnums=1)
    next_frames = jax.block_until_ready(fwd(seq_tensor, numiterations, params))

    expected = (batch * seqlen, numiterations, imgch, imght, imgwd)
    assert next_frames.shape == expected, (next_frames.shape, expected)
    assert jnp.all(jnp.isfinite(next_frames))
    print("KERNEL_OK")
</pallas_src>

<mosaic_0001>
module attributes {stable_mosaic.version = 11 : i64} {
  func.func @_drive_kernel(%arg0: i32, %arg1: memref<1x48x512xbf16, #tpu.memory_space<vmem>>, %arg2: memref<32x48xbf16, #tpu.memory_space<vmem>>, %arg3: memref<32x1xf32, #tpu.memory_space<vmem>>, %arg4: memref<1x32x512xf32, #tpu.memory_space<vmem>>) attributes {dimension_semantics = [#tpu.dimension_semantics<parallel>], iteration_bounds = array<i64: 2>, scalar_prefetch = 0 : i64, scratch_operands = 0 : i64, tpu.core_type = #tpu.core_type<tc>, window_params = [{transform_indices = @transform_0, window_bounds = array<i64: 1, 48, 512>}, {pipeline_mode = #tpu.pipeline_mode<synchronous>, transform_indices = @transform_1, window_bounds = array<i64: 32, 48>}, {pipeline_mode = #tpu.pipeline_mode<synchronous>, transform_indices = @transform_2, window_bounds = array<i64: 32, 1>}, {transform_indices = @transform_3, window_bounds = array<i64: 1, 32, 512>}]} {
    %c0 = arith.constant 0 : index
    %c0_0 = arith.constant 0 : index
    %0 = vector.load %arg2[%c0, %c0_0] : memref<32x48xbf16, #tpu.memory_space<vmem>>, vector<32x48xbf16>
    %c0_1 = arith.constant 0 : index
    %c0_2 = arith.constant 0 : index
    %c0_3 = arith.constant 0 : index
    %1 = vector.load %arg1[%c0_1, %c0_2, %c0_3] : memref<1x48x512xbf16, #tpu.memory_space<vmem>>, vector<1x48x512xbf16>
    %2 = vector.shape_cast %1 : vector<1x48x512xbf16> to vector<48x512xbf16>
    %cst = arith.constant dense<0.000000e+00> : vector<32x512xf32>
    %3 = tpu.matmul %0, %2, %cst {dimension_numbers = #tpu.dot_dimension_numbers<[1], [0], [0], [1], [0, 0, 1, 1], [], []>} : vector<32x48xbf16>, vector<48x512xbf16>, vector<32x512xf32> -> vector<32x512xf32>
    %c0_4 = arith.constant 0 : index
    %c0_5 = arith.constant 0 : index
    %4 = vector.load %arg3[%c0_4, %c0_5] : memref<32x1xf32, #tpu.memory_space<vmem>>, vector<32x1xf32>
    %5 = vector.broadcast %4 : vector<32x1xf32> to vector<32x512xf32>
    %6 = arith.addf %3, %5 : vector<32x512xf32>
    %c0_6 = arith.constant 0 : index
    %c0_7 = arith.constant 0 : index
    %c0_8 = arith.constant 0 : index
    %7 = vector.load %arg4[%c0_6, %c0_7, %c0_8] : memref<1x32x512xf32, #tpu.memory_space<vmem>>, vector<1x32x512xf32>
    %8 = vector.shape_cast %7 : vector<1x32x512xf32> to vector<32x512xf32>
    %9 = vector.shape_cast %6 : vector<32x512xf32> to vector<1x32x512xf32>
    tpu.vector_store %arg4[%c0_6, %c0_7, %c0_8], %9 {strides = array<i32>} : memref<1x32x512xf32, #tpu.memory_space<vmem>>, vector<1x32x512xf32>,
    return
  }
  func.func @transform_0(%arg0: i32) -> (i32, i32, i32) {
    %c0_i32 = arith.constant 0 : i32
    %c0_i32_0 = arith.constant 0 : i32
    %c0_i32_1 = arith.constant 0 : i32
    return %arg0, %c0_i32, %c0_i32_0 : i32, i32, i32
  }
  func.func @transform_1(%arg0: i32) -> (i32, i32) {
    %c0_i32 = arith.constant 0 : i32
    %c0_i32_0 = arith.constant 0 : i32
    %c0_i32_1 = arith.constant 0 : i32
    return %c0_i32, %c0_i32_0 : i32, i32
  }
  func.func @transform_2(%arg0: i32) -> (i32, i32) {
    %c0_i32 = arith.constant 0 : i32
    %c0_i32_0 = arith.constant 0 : i32
    %c0_i32_1 = arith.constant 0 : i32
    return %c0_i32, %c0_i32_0 : i32, i32
  }
  func.func @transform_3(%arg0: i32) -> (i32, i32, i32) {
    %c0_i32 = arith.constant 0 : i32
    %c0_i32_0 = arith.constant 0 : i32
    %c0_i32_1 = arith.constant 0 : i32
    return %arg0, %c0_i32, %c0_i32_0 : i32, i32, i32
  }
}

module attributes {stable_mosaic.version = 11 : i64} {
  func.func @_rnn_kernel(%arg0: i32, %arg1: memref<1x32x512xf32, #tpu.memory_space<vmem>>, %arg2: memref<9x1x512xbf16, #tpu.memory_space<vmem>>, %arg3: memref<32x288xbf16, #tpu.memory_space<vmem>>, %arg4: memref<4x32xbf16, #tpu.memory_space<vmem>>, %arg5: memref<4x1xf32, #tpu.memory_space<vmem>>, %arg6: memref<1x4x1536xf32, #tpu.memory_space<vmem>>, %arg7: memref<288x512xbf16, #tpu.memory_space<vmem>>, %arg8: memref<32x1536xbf16, #tpu.memory_space<vmem>>) attributes {dimension_semantics = [#tpu.dimension_semantics<parallel>], iteration_bounds = array<i64: 2>, scalar_prefetch = 0 : i64, scratch_operands = 2 : i64, tpu.core_type = #tpu.core_type<tc>, window_params = [{transform_indices = @transform_0, window_bounds = array<i64: 1, 32, 512>}, {pipeline_mode = #tpu.pipeline_mode<synchronous>, transform_indices = @transform_1, window_bounds = array<i64: 9, 1, 512>}, {pipeline_mode = #tpu.pipeline_mode<synchronous>, transform_indices = @transform_2, window_bounds = array<i64: 32, 288>}, {pipeline_mode = #tpu.pipeline_mode<synchronous>, transform_indices = @transform_3, window_bounds = array<i64: 4, 32>}, {pipeline_mode = #tpu.pipeline_mode<synchronous>, transform_indices = @transform_4, window_bounds = array<i64: 4, 1>}, {transform_indices = @transform_5, window_bounds = array<i64: 1, 4, 1536>}]} {
    %c0 = arith.constant 0 : index
    %c0_0 = arith.constant 0 : index
    %c0_1 = arith.constant 0 : index
    %0 = vector.load %arg1[%c0, %c0_0, %c0_1] : memref<1x32x512xf32, #tpu.memory_space<vmem>>, vector<1x32x512xf32>
    %1 = vector.shape_cast %0 : vector<1x32x512xf32> to vector<32x512xf32>
    %2 = math.tanh %1 : vector<32x512xf32>
    %3 = arith.truncf %2 : vector<32x512xf32> to vector<32x512xbf16>
    %c0_2 = arith.constant 0 : index
    %c0_3 = arith.constant 0 : index
    %4 = vector.load %arg8[%c0_2, %c0_3] : memref<32x1536xbf16, #tpu.memory_space<vmem>>, vector<32x512xbf16>
    tpu.vector_store %arg8[%c0_2, %c0_3], %3 {strides = array<i32>} : memref<32x1536xbf16, #tpu.memory_space<vmem>>, vector<32x512xbf16>,
    %c17_i32 = arith.constant 17 : i32
    %5 = tpu.dynamic_rotate %2 by %c17_i32 dim 1 : vector<32x512xf32>, i32 -> vector<32x512xf32>
    %6 = arith.truncf %5 : vector<32x512xf32> to vector<32x512xbf16>
    %c0_4 = arith.constant 0 : index
    %c0_5 = arith.constant 0 : index
    %c0_6 = arith.constant 0 : index
    %7 = vector.load %arg2[%c0_4, %c0_5, %c0_6] : memref<9x1x512xbf16, #tpu.memory_space<vmem>>, vector<1x1x512xbf16>
    %8 = vector.shape_cast %7 : vector<1x1x512xbf16> to vector<1x512xbf16>
    %9 = vector.broadcast %8 : vector<1x512xbf16> to vector<32x512xbf16>
    %10 = arith.mulf %6, %9 : vector<32x512xbf16>
    %c0_7 = arith.constant 0 : index
    %c0_8 = arith.constant 0 : index
    %11 = vector.load %arg7[%c0_7, %c0_8] : memref<288x512xbf16, #tpu.memory_space<vmem>>, vector<32x512xbf16>
    tpu.vector_store %arg7[%c0_7, %c0_8], %10 {strides = array<i32>} : memref<288x512xbf16, #tpu.memory_space<vmem>>, vector<32x512xbf16>,
    %c16_i32 = arith.constant 16 : i32
    %12 = tpu.dynamic_rotate %2 by %c16_i32 dim 1 : vector<32x512xf32>, i32 -> vector<32x512xf32>
    %13 = arith.truncf %12 : vector<32x512xf32> to vector<32x512xbf16>
    %c1 = arith.constant 1 : index
    %c0_9 = arith.constant 0 : index
    %c0_10 = arith.constant 0 : index
    %14 = vector.load %arg2[%c1, %c0_9, %c0_10] : memref<9x1x512xbf16, #tpu.memory_space<vmem>>, vector<1x1x512xbf16>
    %15 = vector.shape_cast %14 : vector<1x1x512xbf16> to vector<1x512xbf16>
    %16 = vector.broadcast %15 : vector<1x512xbf16> to vector<32x512xbf16>
    %17 = arith.mulf %13, %16 : vector<32x512xbf16>
    %c32 = arith.constant 32 : index
    %c0_11 = arith.constant 0 : index
    %18 = vector.load %arg7[%c32, %c0_11] : memref<288x512xbf16, #tpu.memory_space<vmem>>, vector<32x512xbf16>
    tpu.vector_store %arg7[%c32, %c0_11], %17 {strides = array<i32>} : memref<288x512xbf16, #tpu.memory_space<vmem>>, vector<32x512xbf16>,
    %c15_i32 = arith.constant 15 : i32
    %19 = tpu.dynamic_rotate %2 by %c15_i32 dim 1 : vector<32x512xf32>, i32 -> vector<32x512xf32>
    %20 = arith.truncf %19 : vector<32x512xf32> to vector<32x512xbf16>
    %c2 = arith.constant 2 : index
    %c0_12 = arith.constant 0 : index
    %c0_13 = arith.constant 0 : index
    %21 = vector.load %arg2[%c2, %c0_12, %c0_13] : memref<9x1x512xbf16, #tpu.memory_space<vmem>>, vector<1x1x512xbf16>
    %22 = vector.shape_cast %21 : vector<1x1x512xbf16> to vector<1x512xbf16>
    %23 = vector.broadcast %22 : vector<1x512xbf16> to vector<32x512xbf16>
    %24 = arith.mulf %20, %23 : vector<32x512xbf16>
    %c64 = arith.constant 64 : index
    %c0_14 = arith.constant 0 : index
    %25 = vector.load %arg7[%c64, %c0_14] : memref<288x512xbf16, #tpu.memory_space<vmem>>, vector<32x512xbf16>
    tpu.vector_store %arg7[%c64, %c0_14], %24 {strides = array<i32>} : memref<288x512xbf16, #tpu.memory_space<vmem>>, vector<32x512xbf16>,
    %c1_i32 = arith.constant 1 : i32
    %26 = tpu.dynamic_rotate %2 by %c1_i32 dim 1 : vector<32x512xf32>, i32 -> vector<32x512xf32>
    %27 = arith.truncf %26 : vector<32x512xf32> to vector<32x512xbf16>
    %c3 = arith.constant 3 : index
    %c0_15 = arith.constant 0 : index
    %c0_16 = arith.constant 0 : index
    %28 = vector.load %arg2[%c3, %c0_15, %c0_16] : memref<9x1x512xbf16, #tpu.memory_space<vmem>>, vector<1x1x512xbf16>
    %29 = vector.shape_cast %28 : vector<1x1x512xbf16> to vector<1x512xbf16>
    %30 = vector.broadcast %29 : vector<1x512xbf16> to vector<32x512xbf16>
    %31 = arith.mulf %27, %30 : vector<32x512xbf16>
    %c96 = arith.constant 96 : index
    %c0_17 = arith.constant 0 : index
    %32 = vector.load %arg7[%c96, %c0_17] : memref<288x512xbf16, #tpu.memory_space<vmem>>, vector<32x512xbf16>
    tpu.vector_store %arg7[%c96, %c0_17], %31 {strides = array<i32>} : memref<288x512xbf16, #tpu.memory_space<vmem>>, vector<32x512xbf16>,
    %33 = arith.truncf %2 : vector<32x512xf32> to vector<32x512xbf16>
    %c4 = arith.constant 4 : index
    %c0_18 = arith.constant 0 : index
    %c0_19 = arith.constant 0 : index
    %34 = vector.load %arg2[%c4, %c0_18, %c0_19] : memref<9x1x512xbf16, #tpu.memory_space<vmem>>, vector<1x1x512xbf16>
    %35 = vector.shape_cast %34 : vector<1x1x512xbf16> to vector<1x512xbf16>
    %36 = vector.broadcast %35 : vector<1x512xbf16> to vector<32x512xbf16>
    %37 = arith.mulf %33, %36 : vector<32x512xbf16>
    %c128 = arith.constant 128 : index
    %c0_20 = arith.constant 0 : index
    %38 = vector.load %arg7[%c128, %c0_20] : memref<288x512xbf16, #tpu.memory_space<vmem>>, vector<32x512xbf16>
    tpu.vector_store %arg7[%c128, %c0_20], %37 {strides = array<i32>} : memref<288x512xbf16, #tpu.memory_space<vmem>>, vector<32x512xbf16>,
    %c511_i32 = arith.constant 511 : i32
    %39 = tpu.dynamic_rotate %2 by %c511_i32 dim 1 : vector<32x512xf32>, i32 -> vector<32x512xf32>
    %40 = arith.truncf %39 : vector<32x512xf32> to vector<32x512xbf16>
    %c5 = arith.constant 5 : index
    %c0_21 = arith.constant 0 : index
    %c0_22 = arith.constant 0 : index
    %41 = vector.load %arg2[%c5, %c0_21, %c0_22] : memref<9x1x512xbf16, #tpu.memory_space<vmem>>, vector<1x1x512xbf16>
    %42 = vector.shape_cast %41 : vector<1x1x512xbf16> to vector<1x512xbf16>
    %43 = vector.broadcast %42 : vector<1x512xbf16> to vector<32x512xbf16>
    %44 = arith.mulf %40, %43 : vector<32x512xbf16>
    %c160 = arith.constant 160 : index
    %c0_23 = arith.constant 0 : index
    %45 = vector.load %arg7[%c160, %c0_23] : memref<288x512xbf16, #tpu.memory_space<vmem>>, vector<32x512xbf16>
    tpu.vector_store %arg7[%c160, %c0_23], %44 {strides = array<i32>} : memref<288x512xbf16, #tpu.memory_space<vmem>>, vector<32x512xbf16>,
    %c497_i32 = arith.constant 497 : i32
    %46 = tpu.dynamic_rotate %2 by %c497_i32 dim 1 : vector<32x512xf32>, i32 -> vector<32x512xf32>
    %47 = arith.truncf %46 : vector<32x512xf32> to vector<32x512xbf16>
    %c6 = arith.constant 6 : index
    %c0_24 = arith.constant 0 : index
    %c0_25 = arith.constant 0 : index
    %48 = vector.load %arg2[%c6, %c0_24, %c0_25] : memref<9x1x512xbf16, #tpu.memory_space<vmem>>, vector<1x1x512xbf16>
    %49 = vector.shape_cast %48 : vector<1x1x512xbf16> to vector<1x512xbf16>
    %50 = vector.broadcast %49 : vector<1x512xbf16> to vector<32x512xbf16>
    %51 = arith.mulf %47, %50 : vector<32x512xbf16>
    %c192 = arith.constant 192 : index
    %c0_26 = arith.constant 0 : index
    %52 = vector.load %arg7[%c192, %c0_26] : memref<288x512xbf16, #tpu.memory_space<vmem>>, vector<32x512xbf16>
    tpu.vector_store %arg7[%c192, %c0_26], %51 {strides = array<i32>} : memref<288x512xbf16, #tpu.memory_space<vmem>>, vector<32x512xbf16>,
    %c496_i32 = arith.constant 496 : i32
    %53 = tpu.dynamic_rotate %2 by %c496_i32 dim 1 : vector<32x512xf32>, i32 -> vector<32x512xf32>
    %54 = arith.truncf %53 : vector<32x512xf32> to vector<32x512xbf16>
    %c7 = arith.constant 7 : index
    %c0_27 = arith.constant 0 : index
    %c0_28 = arith.constant 0 : index
    %55 = vector.load %arg2[%c7, %c0_27, %c0_28] : memref<9x1x512xbf16, #tpu.memory_space<vmem>>, vector<1x1x512xbf16>
    %56 = vector.shape_cast %55 : vector<1x1x512xbf16> to vector<1x512xbf16>
    %57 = vector.broadcast %56 : vector<1x512xbf16> to vector<32x512xbf16>
    %58 = arith.mulf %54, %57 : vector<32x512xbf16>
    %c224 = arith.constant 224 : index
    %c0_29 = arith.constant 0 : index
    %59 = vector.load %arg7[%c224, %c0_29] : memref<288x512xbf16, #tpu.memory_space<vmem>>, vector<32x512xbf16>
    tpu.vector_store %arg7[%c224, %c0_29], %58 {strides = array<i32>} : memref<288x512xbf16, #tpu.memory_space<vmem>>, vector<32x512xbf16>,
    %c495_i32 = arith.constant 495 : i32
    %60 = tpu.dynamic_rotate %2 by %c495_i32 dim 1 : vector<32x512xf32>, i32 -> vector<32x512xf32>
    %61 = arith.truncf %60 : vector<32x512xf32> to vector<32x512xbf16>
    %c8 = arith.constant 8 : index
    %c0_30 = arith.constant 0 : index
    %c0_31 = arith.constant 0 : index
    %62 = vector.load %arg2[%c8, %c0_30, %c0_31] : memref<9x1x512xbf16, #tpu.memory_space<vmem>>, vector<1x1x512xbf16>
    %63 = vector.shape_cast %62 : vector<1x1x512xbf16> to vector<1x512xbf16>
    %64 = vector.broadcast %63 : vector<1x512xbf16> to vector<32x512xbf16>
    %65 = arith.mulf %61, %64 : vector<32x512xbf16>
    %c256 = arith.constant 256 : index
    %c0_32 = arith.constant 0 : index
    %66 = vector.load %arg7[%c256, %c0_32] : memref<288x512xbf16, #tpu.memory_space<vmem>>, vector<32x512xbf16>
    tpu.vector_store %arg7[%c256, %c0_32], %65 {strides = array<i32>} : memref<288x512xbf16, #tpu.memory_space<vmem>>, vector<32x512xbf16>,
    %c0_33 = arith.constant 0 : index
    %c0_34 = arith.constant 0 : index
    %67 = vector.load %arg3[%c0_33, %c0_34] : memref<32x288xbf16, #tpu.memory_space<vmem>>, vector<32x288xbf16>
    %c0_35 = arith.constant 0 : index
    %c0_36 = arith.constant 0 : index
    %68 = vector.load %arg7[%c0_35, %c0_36] : memref<288x512xbf16, #tpu.memory_space<vmem>>, vector<288x512xbf16>
    %cst = arith.constant dense<0.000000e+00> : vector<32x512xf32>
    %69 = tpu.matmul %67, %68, %cst {dimension_numbers = #tpu.dot_dimension_numbers<[1], [0], [0], [1], [0, 0, 1, 1], [], []>} : vector<32x288xbf16>, vector<288x512xbf16>, vector<32x512xf32> -> vector<32x512xf32>
    %c0_37 = arith.constant 0 : index
    %c0_38 = arith.constant 0 : index
    %c0_39 = arith.constant 0 : index
    %70 = vector.load %arg1[%c0_37, %c0_38, %c0_39] : memref<1x32x512xf32, #tpu.memory_space<vmem>>, vector<1x32x512xf32>
    %71 = vector.shape_cast %70 : vector<1x32x512xf32> to vector<32x512xf32>
    %72 = arith.addf %71, %69 : vector<32x512xf32>
    %73 = math.tanh %72 : vector<32x512xf32>
    %74 = arith.truncf %73 : vector<32x512xf32> to vector<32x512xbf16>
    %c0_40 = arith.constant 0 : index
    %c512 = arith.constant 512 : index
    %75 = vector.load %arg8[%c0_40, %c512] : memref<32x1536xbf16, #tpu.memory_space<vmem>>, vector<32x512xbf16>
    tpu.vector_store %arg8[%c0_40, %c512], %74 {strides = array<i32>} : memref<32x1536xbf16, #tpu.memory_space<vmem>>, vector<32x512xbf16>,
    %c17_i32_41 = arith.constant 17 : i32
    %76 = tpu.dynamic_rotate %73 by %c17_i32_41 dim 1 : vector<32x512xf32>, i32 -> vector<32x512xf32>
    %77 = arith.truncf %76 : vector<32x512xf32> to vector<32x512xbf16>
    %c0_42 = arith.constant 0 : index
    %c0_43 = arith.constant 0 : index
    %c0_44 = arith.constant 0 : index
    %78 = vector.load %arg2[%c0_42, %c0_43, %c0_44] : memref<9x1x512xbf16, #tpu.memory_space<vmem>>, vector<1x1x512xbf16>
    %79 = vector.shape_cast %78 : vector<1x1x512xbf16> to vector<1x512xbf16>
    %80 = vector.broadcast %79 : vector<1x512xbf16> to vector<32x512xbf16>
    %81 = arith.mulf %77, %80 : vector<32x512xbf16>
    %c0_45 = arith.constant 0 : index
    %c0_46 = arith.constant 0 : index
    %82 = vector.load %arg7[%c0_45, %c0_46] : memref<288x512xbf16, #tpu.memory_space<vmem>>, vector<32x512xbf16>
    tpu.vector_store %arg7[%c0_45, %c0_46], %81 {strides = array<i32>} : memref<288x512xbf16, #tpu.memory_space<vmem>>, vector<32x512xbf16>,
    %c16_i32_47 = arith.constant 16 : i32
    %83 = tpu.dynamic_rotate %73 by %c16_i32_47 dim 1 : vector<32x512xf32>, i32 -> vector<32x512xf32>
    %84 = arith.truncf %83 : vector<32x512xf32> to vector<32x512xbf16>
    %c1_48 = arith.constant 1 : index
    %c0_49 = arith.constant 0 : index
    %c0_50 = arith.constant 0 : index
    %85 = vector.load %arg2[%c1_48, %c0_49, %c0_50] : memref<9x1x512xbf16, #tpu.memory_space<vmem>>, vector<1x1x512xbf16>
    %86 = vector.shape_cast %85 : vector<1x1x512xbf16> to vector<1x512xbf16>
    %87 = vector.broadcast %86 : vector<1x512xbf16> to vector<32x512xbf16>
    %88 = arith.mulf %84, %87 : vector<32x512xbf16>
    %c32_51 = arith.constant 32 : index
    %c0_52 = arith.constant 0 : index
    %89 = vector.load %arg7[%c32_51, %c0_52] : memref<288x512xbf16, #tpu.memory_space<vmem>>, vector<32x512xbf16>
    tpu.vector_store %arg7[%c32_51, %c0_52], %88 {strides = array<i32>} : memref<288x512xbf16, #tpu.memory_space<vmem>>, vector<32x512xbf16>,
    %c15_i32_53 = arith.constant 15 : i32
    %90 = tpu.dynamic_rotate %73 by %c15_i32_53 dim 1 : vector<32x512xf32>, i32 -> vector<32x512xf32>
    %91 = arith.truncf %90 : vector<32x512xf32> to vector<32x512xbf16>
    %c2_54 = arith.constant 2 : index
    %c0_55 = arith.constant 0 : index
    %c0_56 = arith.constant 0 : index
    %92 = vector.load %arg2[%c2_54, %c0_55, %c0_56] : memref<9x1x512xbf16, #tpu.memory_space<vmem>>, vector<1x1x512xbf16>
    %93 = vector.shape_cast %92 : vector<1x1x512xbf16> to vector<1x512xbf16>
    %94 = vector.broadcast %93 : vector<1x512xbf16> to vector<32x512xbf16>
    %95 = arith.mulf %91, %94 : vector<32x512xbf16>
    %c64_57 = arith.constant 64 : index
    %c0_58 = arith.constant 0 : index
    %96 = vector.load %arg7[%c64_57, %c0_58] : memref<288x512xbf16, #tpu.memory_space<vmem>>, vector<32x512xbf16>
    tpu.vector_store %arg7[%c64_57, %c0_58], %95 {strides = array<i32>} : memref<288x512xbf16, #tpu.memory_space<vmem>>, vector<32x512xbf16>,
    %c1_i32_59 = arith.constant 1 : i32
    %97 = tpu.dynamic_rotate %73 by %c1_i32_59 dim 1 : vector<32x512xf32>, i32 -> vector<32x512xf32>
    %98 = arith.truncf %97 : vector<32x512xf32> to vector<32x512xbf16>
    %c3_60 = arith.constant 3 : index
    %c0_61 = arith.constant 0 : index
    %c0_62 = arith.constant 0 : index
    %99 = vector.load %arg2[%c3_60, %c0_61, %c0_62] : memref<9x1x512xbf16, #tpu.memory_space<vmem>>, vector<1x1x512xbf16>
    %100 = vector.shape_cast %99 : vector<1x1x512xbf16> to vector<1x512xbf16>
    %101 = vector.broadcast %100 : vector<1x512xbf16> to vector<32x512xbf16>
    %102 = arith.mulf %98, %101 : vector<32x512xbf16>
    %c96_63 = arith.constant 96 : index
    %c0_64 = arith.constant 0 : index
    %103 = vector.load %arg7[%c96_63, %c0_64] : memref<288x512xbf16, #tpu.memory_space<vmem>>, vector<32x512xbf16>
    tpu.vector_store %arg7[%c96_63, %c0_64], %102 {strides = array<i32>} : memref<288x512xbf16, #tpu.memory_space<vmem>>, vector<32x512xbf16>,
    %104 = arith.truncf %73 : vector<32x512xf32> to vector<32x512xbf16>
    %c4_65 = arith.constant 4 : index
    %c0_66 = arith.constant 0 : index
    %c0_67 = arith.constant 0 : index
    %105 = vector.load %arg2[%c4_65, %c0_66, %c0_67] : memref<9x1x512xbf16, #tpu.memory_space<vmem>>, vector<1x1x512xbf16>
    %106 = vector.shape_cast %105 : vector<1x1x512xbf16> to vector<1x512xbf16>
    %107 = vector.broadcast %106 : vector<1x512xbf16> to vector<32x512xbf16>
    %108 = arith.mulf %104, %107 : vector<32x512xbf16>
    %c128_68 = arith.constant 128 : index
    %c0_69 = arith.constant 0 : index
    %109 = vector.load %arg7[%c128_68, %c0_69] : memref<288x512xbf16, #tpu.memory_space<vmem>>, vector<32x512xbf16>
    tpu.vector_store %arg7[%c128_68, %c0_69], %108 {strides = array<i32>} : memref<288x512xbf16, #tpu.memory_space<vmem>>, vector<32x512xbf16>,
    %c511_i32_70 = arith.constant 511 : i32
    %110 = tpu.dynamic_rotate %73 by %c511_i32_70 dim 1 : vector<32x512xf32>, i32 -> vector<32x512xf32>
    %111 = arith.truncf %110 : vector<32x512xf32> to vector<32x512xbf16>
    %c5_71 = arith.constant 5 : index
    %c0_72 = arith.constant 0 : index
    %c0_73 = arith.constant 0 : index
    %112 = vector.load %arg2[%c5_71, %c0_72, %c0_73] : memref<9x1x512xbf16, #tpu.memory_space<vmem>>, vector<1x1x512xbf16>
    %113 = vector.shape_cast %112 : vector<1x1x512xbf16> to vector<1x512xbf16>
    %114 = vector.broadcast %113 : vector<1x512xbf16> to vector<32x512xbf16>
    %115 = arith.mulf %111, %114 : vector<32x512xbf16>
    %c160_74 = arith.constant 160 : index
    %c0_75 = arith.constant 0 : index
    %116 = vector.load %arg7[%c160_74, %c0_75] : memref<288x512xbf16, #tpu.memory_space<vmem>>, vector<32x512xbf16>
    tpu.vector_store %arg7[%c160_74, %c0_75], %115 {strides = array<i32>} : memref<288x512xbf16, #tpu.memory_space<vmem>>, vector<32x512xbf16>,
    %c497_i32_76 = arith.constant 497 : i32
    %117 = tpu.dynamic_rotate %73 by %c497_i32_76 dim 1 : vector<32x512xf32>, i32 -> vector<32x512xf32>
    %118 = arith.truncf %117 : vector<32x512xf32> to vector<32x512xbf16>
    %c6_77 = arith.constant 6 : index
    %c0_78 = arith.constant 0 : index
    %c0_79 = arith.constant 0 : index
    %119 = vector.load %arg2[%c6_77, %c0_78, %c0_79] : memref<9x1x512xbf16, #tpu.memory_space<vmem>>, vector<1x1x512xbf16>
    %120 = vector.shape_cast %119 : vector<1x1x512xbf16> to vector<1x512xbf16>
    %121 = vector.broadcast %120 : vector<1x512xbf16> to vector<32x512xbf16>
    %122 = arith.mulf %118, %121 : vector<32x512xbf16>
    %c192_80 = arith.constant 192 : index
    %c0_81 = arith.constant 0 : index
    %123 = vector.load %arg7[%c192_80, %c0_81] : memref<288x512xbf16, #tpu.memory_space<vmem>>, vector<32x512xbf16>
    tpu.vector_store %arg7[%c192_80, %c0_81], %122 {strides = array<i32>} : memref<288x512xbf16, #tpu.memory_space<vmem>>, vector<32x512xbf16>,
    %c496_i32_82 = arith.constant 496 : i32
    %124 = tpu.dynamic_rotate %73 by %c496_i32_82 dim 1 : vector<32x512xf32>, i32 -> vector<32x512xf32>
    %125 = arith.truncf %124 : vector<32x512xf32> to vector<32x512xbf16>
    %c7_83 = arith.constant 7 : index
    %c0_84 = arith.constant 0 : index
    %c0_85 = arith.constant 0 : index
    %126 = vector.load %arg2[%c7_83, %c0_84, %c0_85] : memref<9x1x512xbf16, #tpu.memory_space<vmem>>, vector<1x1x512xbf16>
    %127 = vector.shape_cast %126 : vector<1x1x512xbf16> to vector<1x512xbf16>
    %128 = vector.broadcast %127 : vector<1x512xbf16> to vector<32x512xbf16>
    %129 = arith.mulf %125, %128 : vector<32x512xbf16>
    %c224_86 = arith.constant 224 : index
    %c0_87 = arith.constant 0 : index
    %130 = vector.load %arg7[%c224_86, %c0_87] : memref<288x512xbf16, #tpu.memory_space<vmem>>, vector<32x512xbf16>
    tpu.vector_store %arg7[%c224_86, %c0_87], %129 {strides = array<i32>} : memref<288x512xbf16, #tpu.memory_space<vmem>>, vector<32x512xbf16>,
    %c495_i32_88 = arith.constant 495 : i32
    %131 = tpu.dynamic_rotate %73 by %c495_i32_88 dim 1 : vector<32x512xf32>, i32 -> vector<32x512xf32>
    %132 = arith.truncf %131 : vector<32x512xf32> to vector<32x512xbf16>
    %c8_89 = arith.constant 8 : index
    %c0_90 = arith.constant 0 : index
    %c0_91 = arith.constant 0 : index
    %133 = vector.load %arg2[%c8_89, %c0_90, %c0_91] : memref<9x1x512xbf16, #tpu.memory_space<vmem>>, vector<1x1x512xbf16>
    %134 = vector.shape_cast %133 : vector<1x1x512xbf16> to vector<1x512xbf16>
    %135 = vector.broadcast %134 : vector<1x512xbf16> to vector<32x512xbf16>
    %136 = arith.mulf %132, %135 : vector<32x512xbf16>
    %c256_92 = arith.constant 256 : index
    %c0_93 = arith.constant 0 : index
    %137 = vector.load %arg7[%c256_92, %c0_93] : memref<288x512xbf16, #tpu.memory_space<vmem>>, vector<32x512xbf16>
    tpu.vector_store %arg7[%c256_92, %c0_93], %136 {strides = array<i32>} : memref<288x512xbf16, #tpu.memory_space<vmem>>, vector<32x512xbf16>,
    %c0_94 = arith.constant 0 : index
    %c0_95 = arith.constant 0 : index
    %138 = vector.load %arg3[%c0_94, %c0_95] : memref<32x288xbf16, #tpu.memory_space<vmem>>, vector<32x288xbf16>
    %c0_96 = arith.constant 0 : index
    %c0_97 = arith.constant 0 : index
    %139 = vector.load %arg7[%c0_96, %c0_97] : memref<288x512xbf16, #tpu.memory_space<vmem>>, vector<288x512xbf16>
    %cst_98 = arith.constant dense<0.000000e+00> : vector<32x512xf32>
    %140 = tpu.matmul %138, %139, %cst_98 {dimension_numbers = #tpu.dot_dimension_numbers<[1], [0], [0], [1], [0, 0, 1, 1], [], []>} : vector<32x288xbf16>, vector<288x512xbf16>, vector<32x512xf32> -> vector<32x512xf32>
    %c0_99 = arith.constant 0 : index
    %c0_100 = arith.constant 0 : index
    %c0_101 = arith.constant 0 : index
    %141 = vector.load %arg1[%c0_99, %c0_100, %c0_101] : memref<1x32x512xf32, #tpu.memory_space<vmem>>, vector<1x32x512xf32>
    %142 = vector.shape_cast %141 : vector<1x32x512xf32> to vector<32x512xf32>
    %143 = arith.addf %142, %140 : vector<32x512xf32>
    %144 = math.tanh %143 : vector<32x512xf32>
    %145 = arith.truncf %144 : vector<32x512xf32> to vector<32x512xbf16>
    %c0_102 = arith.constant 0 : index
    %c1024 = arith.constant 1024 : index
    %146 = vector.load %arg8[%c0_102, %c1024] : memref<32x1536xbf16, #tpu.memory_space<vmem>>, vector<32x512xbf16>
    tpu.vector_store %arg8[%c0_102, %c1024], %145 {strides = array<i32>} : memref<32x1536xbf16, #tpu.memory_space<vmem>>, vector<32x512xbf16>,
    %c0_103 = arith.constant 0 : index
    %c0_104 = arith.constant 0 : index
    %147 = vector.load %arg4[%c0_103, %c0_104] : memref<4x32xbf16, #tpu.memory_space<vmem>>, vector<4x32xbf16>
    %c0_105 = arith.constant 0 : index
    %c0_106 = arith.constant 0 : index
    %148 = vector.load %arg8[%c0_105, %c0_106] : memref<32x1536xbf16, #tpu.memory_space<vmem>>, vector<32x1536xbf16>
    %cst_107 = arith.constant dense<0.000000e+00> : vector<4x1536xf32>
    %149 = tpu.matmul %147, %148, %cst_107 {dimension_numbers = #tpu.dot_dimension_numbers<[1], [0], [0], [1], [0, 0, 1, 1], [], []>} : vector<4x32xbf16>, vector<32x1536xbf16>, vector<4x1536xf32> -> vector<4x1536xf32>
    %c0_108 = arith.constant 0 : index
    %c0_109 = arith.constant 0 : index
    %150 = vector.load %arg5[%c0_108, %c0_109] : memref<4x1xf32, #tpu.memory_space<vmem>>, vector<4x1xf32>
    %151 = vector.broadcast %150 : vector<4x1xf32> to vector<4x1536xf32>
    %152 = arith.addf %149, %151 : vector<4x1536xf32>
    %c0_110 = arith.constant 0 : index
    %c0_111 = arith.constant 0 : index
    %c0_112 = arith.constant 0 : index
    %153 = vector.load %arg6[%c0_110, %c0_111, %c0_112] : memref<1x4x1536xf32, #tpu.memory_space<vmem>>, vector<1x4x1536xf32>
    %154 = vector.shape_cast %153 : vector<1x4x1536xf32> to vector<4x1536xf32>
    %155 = vector.shape_cast %152 : vector<4x1536xf32> to vector<1x4x1536xf32>
    tpu.vector_store %arg6[%c0_110, %c0_111, %c0_112], %155 {strides = array<i32>} : memref<1x4x1536xf32, #tpu.memory_space<vmem>>, vector<1x4x1536xf32>,
    return
  }
  func.func @transform_0(%arg0: i32) -> (i32, i32, i32) {
    %c0_i32 = arith.constant 0 : i32
    %c0_i32_0 = arith.constant 0 : i32
    %c0_i32_1 = arith.constant 0 : i32
    return %arg0, %c0_i32, %c0_i32_0 : i32, i32, i32
  }
  func.func @transform_1(%arg0: i32) -> (i32, i32, i32) {
    %c0_i32 = arith.constant 0 : i32
    %c0_i32_0 = arith.constant 0 : i32
    %c0_i32_1 = arith.constant 0 : i32
    %c0_i32_2 = arith.constant 0 : i32
    return %c0_i32, %c0_i32_0, %c0_i32_1 : i32, i32, i32
  }
  func.func @transform_2(%arg0: i32) -> (i32, i32) {
    %c0_i32 = arith.constant 0 : i32
    %c0_i32_0 = arith.constant 0 : i32
    %c0_i32_1 = arith.constant 0 : i32
    return %c0_i32, %c0_i32_0 : i32, i32
  }
  func.func @transform_3(%arg0: i32) -> (i32, i32) {
    %c0_i32 = arith.constant 0 : i32
    %c0_i32_0 = arith.constant 0 : i32
    %c0_i32_1 = arith.constant 0 : i32
    return %c0_i32, %c0_i32_0 : i32, i32
  }
  func.func @transform_4(%arg0: i32) -> (i32, i32) {
    %c0_i32 = arith.constant 0 : i32
    %c0_i32_0 = arith.constant 0 : i32
    %c0_i32_1 = arith.constant 0 : i32
    return %c0_i32, %c0_i32_0 : i32, i32
  }
  func.func @transform_5(%arg0: i32) -> (i32, i32, i32) {
    %c0_i32 = arith.constant 0 : i32
    %c0_i32_0 = arith.constant 0 : i32
    %c0_i32_1 = arith.constant 0 : i32
    return %arg0, %c0_i32, %c0_i32_0 : i32, i32, i32
  }
}

</mosaic_0001>

<bundles_post_ra>
// kernel: network_combined_static_semantic_forward.2
= control target key start
LH: loop header
LB: loop body
LE: loop exit
PB: predicated region body
PF: predicated region fallthrough
CT: control target
= control target key end

     0   :  { %s556_s12 = smov 0   ;;  %s613_s0 = inlined_call_operand.vmem [shape: bf16[2,48,512], index: 0, kind: input, shape index: {}]   ;;  %s614_s1 = inlined_call_operand.vmem [shape: bf16[32,48], index: 1, kind: input, shape index: {}]   ;;  %s615_s2 = inlined_call_operand.vmem [shape: f32[32,1], index: 2, kind: input, shape index: {}]   ;;  %s616_s3 = inlined_call_operand.vmem [shape: f32[2,32,512], index: 3, kind: output, shape index: {}]  }
   0x1 LB: > { %s466_s13 = sadd.s32 4294967295, %s533_s12   ;;  %p470_p0 = scmp.ge.s32.totalorder %s533_s12, 1  ;;  %s533_s12 = sphi %s556_s12, %s13_s12  }
   0x2   : > { %p137_p1 = scmp.lt.s32.totalorder %s533_s12, 3 }
   0x4   : > { %p138_p2 = pnand %p470_p0, %p137_p1 }
   0x5   : > { %p161_p3 = scmp.lt.s32.totalorder (!%p138_p2), %s466_s13, 1 }
   0x6   : > { %141 = sbr.rel (%p138_p2) target bundleno = 238 (0xee), region = 32 }
   0xb   : > { %v535_v0 = vmov 0   ;;  %s618_s13 = smov (!%p161_p3, %s466_s13), 1  ;;  %v188_v1 = vld [vmem:[%s615_s2] sm:$0xff]  ;;  %v190_v2 = vld [vmem:[%s615_s2 + $0x10] sm:$0xff]  ;;  %v189_v3 = vld [vmem:[%s615_s2 + $0x8] sm:$0xff]  ;;  %vm282_vm0 = vcmask 392192  }
   0xc   : > { %321 = vmatprep.mubr.bf16.mxu0 %v535_v0  ;;  %374 = vmatprep.mubr.bf16.mxu1 %v535_v0  ;;  %s495_s18 = smul.u32 96, %s618_s13  ;;  %v191_v4 = vld [vmem:[%s615_s2 + $0x18] sm:$0xff]  ;;  %v525_v17 = vld [vmem:[%s614_s1] sm:$0xff]   ;;  %v526_v18 = vld [vmem:[%s614_s1 + $0x8] sm:$0xff]   ;;  %s494_s30 = sshll.u32 %s618_s13, 7 }
   0xd   : > { %505 = vset.pattern.permute.xlu0 %v535_v0  ;;  %506 = vset.pattern.permute.xlu1 %v535_v0  ;;  %s592_s6 = scalar_lea.vmem %s616_s3, %s494_s30 }
   0xe   : > { %194 = vperm.xlu0 %505, %v188_v1   ;;  %204 = vperm.xlu1 %506, %v190_v2   ;;  %s165_s25 = scalar_lea.vmem %s613_s0, %s495_s18 }
   0xf   : > { %v507_v5 = vld [vmem:[%s165_s25 + $0x44] ss:$16 sps:$4 sm:$0xff]   ;;  %v509_v6 = vld [vmem:[%s165_s25 + $0x4c] ss:$16 sps:$4 sm:$0xff]   ;;  %v511_v7 = vld [vmem:[%s165_s25 + $0x40] ss:$16 sps:$4 sm:$0xff]  }
  0x10   : > { %299 = vmatprep.subr.bf16.mxu0 %v507_v5  ;;  %v512_v8 = vld [vmem:[%s165_s25 + $0x48] ss:$16 sps:$4 sm:$0xff]   ;;  %352 = vmatprep.subr.bf16.mxu1 %v509_v6  ;;  %v513_v9 = vld [vmem:[%s165_s25 + $0x24] ss:$16 sps:$4 sm:$0xff]   ;;  %v515_v10 = vld [vmem:[%s165_s25 + $0x2c] ss:$16 sps:$4 sm:$0xff]  }
  0x11   : > { %300 = vmatpush1.bf16.msra.mxu0 %v511_v7  ;;  %353 = vmatpush1.bf16.msra.mxu1 %v512_v8  ;;  %v517_v11 = vld [vmem:[%s165_s25 + $0x20] ss:$16 sps:$4 sm:$0xff]   ;;  %v518_v12 = vld [vmem:[%s165_s25 + $0x28] ss:$16 sps:$4 sm:$0xff]   ;;  %v519_v13 = vld [vmem:[%s165_s25 + $0x4] ss:$16 sps:$4 sm:$0xff]  }
  0x12   : > { %199 = vperm.xlu0 %505, %v189_v3   ;;  %209 = vperm.xlu1 %506, %v191_v4   ;;  %v521_v14 = vld [vmem:[%s165_s25 + $0xc] ss:$16 sps:$4 sm:$0xff]   ;;  %v523_v15 = vld [vmem:[%s165_s25] ss:$16 sps:$4 sm:$0xff]   ;;  %v524_v16 = vld [vmem:[%s165_s25 + $0x8] ss:$16 sps:$4 sm:$0xff]  }
  0x13   : > { %301 = vmatprep.subr.bf16.mxu0 %v513_v9  ;;  %354 = vmatprep.subr.bf16.mxu1 %v515_v10 }
  0x15   : > { %302 = vmatpush1.bf16.msra.mxu0 %v517_v11  ;;  %355 = vmatpush1.bf16.msra.mxu1 %v518_v12 }
  0x16   : > { %303 = vmatprep.subr.bf16.mxu0 %v519_v13  ;;  %356 = vmatprep.subr.bf16.mxu1 %v521_v14 }
  0x19   : > { %304 = vmatpush1.bf16.msra.mxu0 %v523_v15  ;;  %357 = vmatpush1.bf16.msra.mxu1 %v524_v16 }
  0x1c   : > { %488 = vmatmul.mubr.msk.bf16.vlgmr.msra.gmra.mxu0 %vm282_vm0, %v525_v17  ;;  %490 = vmatmul.mubr.msk.bf16.vlgmr.msra.gmra.mxu1 %vm282_vm0, %v525_v17 }
  0x1d   : > { %331 = vmatprep.mubr.bf16.mxu0 %v535_v0  ;;  %384 = vmatprep.mubr.bf16.mxu1 %v535_v0 }
  0x24   : > { %489 = vmatmul.mubr.msk.bf16.gmra.mxu0 %vm282_vm0, %v526_v18  ;;  %491 = vmatmul.mubr.msk.bf16.gmra.mxu1 %vm282_vm0, %v526_v18 }
  0x89   : > { %v195_v19 = vpop.permute.xlu0 %194  ;;  %v205_v33 = vpop.permute.xlu1 %204 }
  0x8d   : > { %v200_v24 = vpop.permute.xlu0 %199  ;;  %v210_v44 = vpop.permute.xlu1 %209 }
  0xdc   : > { %v323_v20 = vpop.f32.mrf.mxu0  ;;  %v376_v21 = vpop.f32.mrf.mxu1 }
  0xdd   : > { %v324_v22 = vadd.f32 %v323_v20, %v195_v19  ;;  %v377_v23 = vadd.f32 %v376_v21, %v195_v19 }
  0xde   : > { %v325_v25 = vpop.f32.mrf.mxu0  ;;  %v378_v26 = vpop.f32.mrf.mxu1 }
  0xdf   : > { %395 = vst [vmem:[%s592_s6] sm:$0xff] %v324_v22  ;;  %397 = vst [vmem:[%s592_s6 + $0x10] sm:$0xff] %v377_v23  ;;  %v326_v27 = vadd.f32 %v325_v25, %v195_v19  ;;  %v379_v28 = vadd.f32 %v378_v26, %v195_v19 }
  0xe0   : > { %v327_v29 = vpop.f32.mrf.mxu0  ;;  %v380_v30 = vpop.f32.mrf.mxu1 }
  0xe1   : > { %396 = vst [vmem:[%s592_s6 + $0x8] sm:$0xff] %v326_v27  ;;  %398 = vst [vmem:[%s592_s6 + $0x18] sm:$0xff] %v379_v28  ;;  %v328_v31 = vadd.f32 %v327_v29, %v200_v24  ;;  %v381_v32 = vadd.f32 %v380_v30, %v200_v24 }
  0xe2   : > { %v329_v34 = vpop.f32.mrf.mxu0  ;;  %v382_v35 = vpop.f32.mrf.mxu1 }
  0xe3   : > { %399 = vst [vmem:[%s592_s6 + $0x20] sm:$0xff] %v328_v31  ;;  %401 = vst [vmem:[%s592_s6 + $0x30] sm:$0xff] %v381_v32  ;;  %v330_v36 = vadd.f32 %v329_v34, %v200_v24  ;;  %v383_v37 = vadd.f32 %v382_v35, %v200_v24 }
  0xe4   : > { %v333_v38 = vpop.f32.mrf.mxu0  ;;  %v386_v39 = vpop.f32.mrf.mxu1 }
  0xe5   : > { %400 = vst [vmem:[%s592_s6 + $0x28] sm:$0xff] %v330_v36  ;;  %402 = vst [vmem:[%s592_s6 + $0x38] sm:$0xff] %v383_v37  ;;  %v334_v40 = vadd.f32 %v333_v38, %v205_v33  ;;  %v387_v41 = vadd.f32 %v386_v39, %v205_v33 }
  0xe6   : > { %v335_v42 = vpop.f32.mrf.mxu0  ;;  %v388_v43 = vpop.f32.mrf.mxu1 }
  0xe7   : > { %403 = vst [vmem:[%s592_s6 + $0x40] sm:$0xff] %v334_v40  ;;  %405 = vst [vmem:[%s592_s6 + $0x50] sm:$0xff] %v387_v41  ;;  %v336_v45 = vadd.f32 %v335_v42, %v205_v33  ;;  %v389_v46 = vadd.f32 %v388_v43, %v205_v33 }
  0xe8   : > { %v337_v47 = vpop.f32.mrf.mxu0  ;;  %v390_v48 = vpop.f32.mrf.mxu1 }
  0xe9   : > { %404 = vst [vmem:[%s592_s6 + $0x48] sm:$0xff] %v336_v45  ;;  %406 = vst [vmem:[%s592_s6 + $0x58] sm:$0xff] %v389_v46  ;;  %v338_v49 = vadd.f32 %v337_v47, %v210_v44  ;;  %v391_v50 = vadd.f32 %v390_v48, %v210_v44 }
  0xea   : > { %v339_v51 = vpop.f32.mrf.mxu0  ;;  %v392_v52 = vpop.f32.mrf.mxu1 }
  0xeb   : > { %407 = vst [vmem:[%s592_s6 + $0x60] sm:$0xff] %v338_v49  ;;  %409 = vst [vmem:[%s592_s6 + $0x70] sm:$0xff] %v391_v50  ;;  %v340_v53 = vadd.f32 %v339_v51, %v210_v44  ;;  %v393_v54 = vadd.f32 %v392_v52, %v210_v44 }
  0xed   : > { %408 = vst [vmem:[%s592_s6 + $0x68] sm:$0xff] %v340_v53  ;;  %410 = vst [vmem:[%s592_s6 + $0x78] sm:$0xff] %v393_v54 }
  0xee PF: > { %s13_s12 = sadd.s32 1, %s533_s12  }
  0xef   : > { %p10_p4 = scmp.ge.s32.totalorder %s13_s12, 4  }
  0xf1   :  { %12 = sbr.rel (!%p10_p4) target bundleno = 1 (0x1), region = 62 }

// kernel: network_combined_static_semantic_forward.3
= control target key start
LH: loop header
LB: loop body
LE: loop exit
PB: predicated region body
PF: predicated region fallthrough
CT: control target
= control target key end

     0   :  { %s6554_s18 = smov 0   ;;  %s9346_s0 = inlined_call_operand.vmem [shape: f32[2,32,512], index: 0, kind: input, shape index: {}]   ;;  %s9347_s1 = inlined_call_operand.vmem [shape: bf16[9,1,512], index: 1, kind: input, shape index: {}]   ;;  %s9348_s2 = inlined_call_operand.vmem [shape: bf16[32,288], index: 2, kind: input, shape index: {}]   ;;  %s9349_s3 = inlined_call_operand.vmem [shape: bf16[4,32], index: 3, kind: input, shape index: {}]   ;;  %s9350_s4 = inlined_call_operand.vmem [shape: f32[4,1], index: 4, kind: input, shape index: {}]   ;;  %s9351_s5 = inlined_call_operand.vmem [shape: f32[2,4,1536], index: 5, kind: output, shape index: {}]  }
   0x1 LB: > { %s5278_s19 = sadd.s32 4294967295, %s6512_s18   ;;  %p5282_p0 = scmp.ge.s32.totalorder %s6512_s18, 1  ;;  %s6512_s18 = sphi %s6554_s18, %s15_s18  }
   0x2   : > { %p187_p1 = scmp.lt.s32.totalorder %s6512_s18, 3 }
   0x4   : > { %p188_p2 = pnand %p5282_p0, %p187_p1 }
   0x6   : > { %191 = sbr.rel (%p188_p2) target bundleno = 1226 (0x4ca), region = 40 }
   0xb   : > { %p215_p3 = scmp.lt.s32.totalorder %s5278_s19, 1  ;;  %s6514_s24 = smov 1   ;;  %v9368_v40 = vmov 0   ;;  %v346_v41 = vlaneseq  ;;  %v6522_v42 = vmov 1966171168   ;;  %vm2240_vm4 = vcmask 261120  }
   0xc   : > { %s6515_s25 = smov 15   ;;  %s6516_s26 = smov 111   ;;  %2332 = vmatprep.mubr.bf16.mxu1 %v9368_v40  ;;  %6392 = vset.pattern.permute.xlu0 %v9368_v40  ;;  %v384_v43 = vunpack.c.l.s4 %v6522_v42  ;;  %v5324_v47 = vld.sshfl [vmem:[%s9347_s1 + $0xc] sm:$0x33 pattern:$0x75316420] }
   0xd   : > { %s9744_s19 = smov (!%p215_p3, %s5278_s19), 1  ;;  %s6518_s27 = smov 16   ;;  %v387_v45 = vshrl.u32 %v346_v41, 7  ;;  %v886_v48 = vcombine.high %v5324_v47, %v5324_v47  ;;  %v6749_v49 = vand.u32 127, %v346_v41 }
   0xe   : > { %s5684_s20 = sshll.u32 %s9744_s19, 7  ;;  %s6519_s28 = smov 17   ;;  %v385_v44 = vunpack.c.0.s8 %v384_v43  ;;  %v5314_v55 = vld.sshfl [vmem:[%s9347_s1 + $0x8] sm:$0x33 pattern:$0x75316420] }
   0xf   : > { %s6568_s23 = scalar_lea.vmem %s9346_s0, %s5684_s20  ;;  %s6520_s29 = smov 112   ;;  %v6768_v57 = vsub.s32 0, %v387_v45  ;;  %vm851_vm0 = vcmp.lt.s32.totalorder %v6749_v49, 1  ;;  %v718_v63 = vcombine.high %v5314_v55, %v5314_v55  ;;  %vm683_vm1 = vcmp.lt.s32.totalorder %v6749_v49, 15 }
  0x10   : > { %v237_v0 = vld [vmem:[%s6568_s23 + $0x58] sm:$0xff]  ;;  %v234_v2 = vld [vmem:[%s6568_s23 + $0x40] sm:$0xff]  ;;  %v235_v4 = vld [vmem:[%s6568_s23 + $0x48] sm:$0xff]  ;;  %s6521_s30 = smov 113   ;;  %s6523_s6 = smov 127   ;;  %v6741_v46 = vsub.s32 %v385_v44, %v387_v45  ;;  %vm1634_vm2 = vcmp.lt.s32.totalorder %v6749_v49, 111 }
  0x11   : > { %v241_v1 = vld [vmem:[%s6568_s23 + $0x78] sm:$0xff]  ;;  %6409 = vtanh.f32 %v237_v0  ;;  %v238_v3 = vld [vmem:[%s6568_s23 + $0x60] sm:$0xff]  ;;  %v239_v5 = vld [vmem:[%s6568_s23 + $0x68] sm:$0xff]  ;;  %9498 = vst [vmem:[#allocation6_spill] sm:$0xff] %v6768_v57  ;;  %vm515_vm3 = vcmp.lt.s32.totalorder %v6749_v49, 16  ;;  %vm348_vm5 = vcmp.lt.s32.totalorder %v6749_v49, 17 }
  0x12   : > { %6411 = vtanh.f32 %v241_v1  ;;  %v226_v6 = vld [vmem:[%s6568_s23] sm:$0xff]  ;;  %v227_v8 = vld [vmem:[%s6568_s23 + $0x8] sm:$0xff]  ;;  %v229_v10 = vld [vmem:[%s6568_s23 + $0x18] sm:$0xff]  ;;  %v6752_v50 = vrot.slane %v5324_v47, %v6741_v46  ;;  %v6755_v51 = vrot.slane %v886_v48, %v6741_v46  ;;  %vm1466_vm6 = vcmp.lt.s32.totalorder %v6749_v49, 112 }
  0x13   : > { %6413 = vtanh.f32 %v234_v2  ;;  %v230_v7 = vld [vmem:[%s6568_s23 + $0x20] sm:$0xff]  ;;  %v231_v9 = vld [vmem:[%s6568_s23 + $0x28] sm:$0xff]  ;;  %v233_v11 = vld [vmem:[%s6568_s23 + $0x38] sm:$0xff]  ;;  %vm1298_vm7 = vcmp.lt.s32.totalorder %v6749_v49, 113  ;;  %vm1130_vm8 = vcmp.lt.s32.totalorder %v6749_v49, 127 }
  0x14   : > { %6415 = vtanh.f32 %v238_v3  ;;  %v236_v12 = vld [vmem:[%s6568_s23 + $0x50] sm:$0xff]  ;;  %v904_v58 = vpack.i.b16 %v6752_v50, %v6752_v50  ;;  %v911_v61 = vpack.i.b16 %v6755_v51, %v6755_v51  ;;  %v5374_v62 = vld.sshfl [vmem:[%s9347_s1 + $0x20] sm:$0x33 pattern:$0x75316420] }
  0x15   : > { %6417 = vtanh.f32 %v235_v4  ;;  %v240_v13 = vld [vmem:[%s6568_s23 + $0x70] sm:$0xff] }
  0x16   : > { %6419 = vtanh.f32 %v239_v5  ;;  %v228_v30 = vld [vmem:[%s6568_s23 + $0x10] sm:$0xff]  ;;  %v909_v4 = vrot.slane %v904_v58, %v6768_v57  ;;  %v1669_v5 = vcombine.high %v5374_v62, %v5374_v62 }
  0x17   : > { %6421 = vtanh.f32 %v226_v6  ;;  %v232_v32 = vld [vmem:[%s6568_s23 + $0x30] sm:$0xff] }
  0x18   : > { %6423 = vtanh.f32 %v230_v7 }
  0x19   : > { %6425 = vtanh.f32 %v227_v8  ;;  %v916_v8 = vrot.slane %v911_v61, %v6768_v57  ;;  %v6854_v61 = vrot.slane %v5314_v55, %v6741_v46 }
  0x1a   : > { %6427 = vtanh.f32 %v231_v9 }
  0x1b   : > { %6429 = vtanh.f32 %v229_v10  ;;  %v6801_v10 = vrot.slane %v718_v63, %v6741_v46  ;;  %v6857_v63 = vrot.slane %v5374_v62, %v6741_v46 }
  0x1c   : > { %6431 = vtanh.f32 %v233_v11  ;;  %v6806_v11 = vld [vmem:[%s9348_s2 + $0x4] ss:$12 sps:$4 sm:$0xff]  }
  0x1d   : > { %6433 = vtanh.f32 %v236_v12  ;;  %2279 = vmatprep.mubr.bf16.mxu0 %v6806_v11  ;;  %v743_v45 = vpack.i.b16 %v6801_v10, %v6801_v10 }
  0x1e   : > { %v6584_v14 = vpop.eup %6409  ;;  %6435 = vtanh.f32 %v240_v13 }
  0x1f   : > { %v6586_v15 = vpop.eup %6411  ;;  %6437 = vtanh.f32 %v228_v30 }
  0x20   : > { %v6588_v16 = vpop.eup %6413  ;;  %v6592_v17 = vpack.i.bf16 %v6586_v15, %v6584_v14  ;;  %6439 = vtanh.f32 %v232_v32  ;;  %v6821_v32 = vrot.slane %v1669_v5, %v6741_v46 }
  0x21   : > { %v6594_v18 = vpop.eup %6415 }
  0x22   : > { %v6596_v19 = vpop.eup %6417  ;;  %5763 = vrot.lane.b32.xlu1 %v6592_v17, %s6514_s24  ;;  %v6602_v20 = vpack.i.bf16 %v6594_v18, %v6588_v16 }
  0x23   : > { %v6604_v21 = vpop.eup %6419 }
  0x24   : > { %v6606_v22 = vpop.eup %6421  ;;  %5753 = vrot.lane.b32.xlu0 %v6602_v20, %s6514_s24  ;;  %v6612_v23 = vpack.i.bf16 %v6604_v21, %v6596_v19 }
  0x25   : > { %v6614_v24 = vpop.eup %6423 }
  0x26   : > { %v6616_v25 = vpop.eup %6425  ;;  %v6620_v26 = vpack.i.bf16 %v6614_v24, %v6606_v22 }
  0x27   : > { %v6622_v27 = vpop.eup %6427 }
  0x28   : > { %v6624_v28 = vpop.eup %6429  ;;  %5758 = vrot.lane.b32.xlu0 %v6612_v23, %s6514_s24  ;;  %5768 = vrot.lane.b32.xlu1 %v6620_v26, %s6514_s24  ;;  %v6632_v29 = vpack.i.bf16 %v6622_v27, %v6616_v25 }
  0x29   : > { %v6635_v31 = vpop.eup %6431 }
  0x2a   : > { %v6640_v33 = vpack.i.bf16 %v6635_v31, %v6624_v28  ;;  %v6642_v34 = vpop.eup %6433 }
  0x2b   : > { %v6648_v35 = vpop.eup %6435 }
  0x2c   : > { %5773 = vrot.lane.b32.xlu0 %v6632_v29, %s6514_s24  ;;  %5778 = vrot.lane.b32.xlu1 %v6640_v33, %s6514_s24  ;;  %v5797_v36 = vpack.i.bf16 %v6648_v35, %v6642_v34  ;;  %v6659_v37 = vpop.eup %6437 }
  0x2d   : > { %9496 = vst [vmem:[#allocation4_spill] sm:$0xff] %v6659_v37  ;;  %v6665_v38 = vpop.eup %6439 }
  0x2e   : > { %9497 = vst [vmem:[#allocation5_spill] sm:$0xff] %v6665_v38  ;;  %v5827_v39 = vpack.i.bf16 %v6665_v38, %v6659_v37 }
  0x30   : > { %5783 = vrot.lane.b32.xlu0 %v6602_v20, %s6515_s25  ;;  %5788 = vrot.lane.b32.xlu1 %v6612_v23, %s6515_s25 }
  0x34   : > { %5793 = vrot.lane.b32.xlu0 %v6612_v23, %s6516_s26  ;;  %5798 = vrot.lane.b32.xlu1 %v5797_v36, %s6516_s26 }
  0x38   : > { %5803 = vrot.lane.b32.xlu0 %v6592_v17, %s6515_s25  ;;  %5808 = vrot.lane.b32.xlu1 %v6602_v20, %s6516_s26 }
  0x3c   : > { %5813 = vrot.lane.b32.xlu0 %v6620_v26, %s6515_s25  ;;  %5818 = vrot.lane.b32.xlu1 %v6632_v29, %s6515_s25 }
  0x40   : > { %5823 = vrot.lane.b32.xlu0 %v6632_v29, %s6516_s26  ;;  %5828 = vrot.lane.b32.xlu1 %v5827_v39, %s6516_s26 }
  0x44   : > { %5833 = vrot.lane.b32.xlu0 %v6640_v33, %s6515_s25  ;;  %5838 = vrot.lane.b32.xlu1 %v6620_v26, %s6516_s26 }
  0x48   : > { %5843 = vrot.lane.b32.xlu0 %v6602_v20, %s6518_s27  ;;  %5848 = vrot.lane.b32.xlu1 %v6612_v23, %s6518_s27 }
  0x4c   : > { %5853 = vrot.lane.b32.xlu0 %v5797_v36, %s6514_s24  ;;  %5858 = vrot.lane.b32.xlu1 %v6592_v17, %s6518_s27 }
  0x50   : > { %5863 = vrot.lane.b32.xlu0 %v6620_v26, %s6518_s27  ;;  %5868 = vrot.lane.b32.xlu1 %v6632_v29, %s6518_s27 }
  0x54   : > { %5873 = vrot.lane.b32.xlu0 %v5827_v39, %s6514_s24  ;;  %5878 = vrot.lane.b32.xlu1 %v6640_v33, %s6518_s27 }
  0x58   : > { %5883 = vrot.lane.b32.xlu0 %v6602_v20, %s6519_s28  ;;  %5888 = vrot.lane.b32.xlu1 %v6612_v23, %s6519_s28 }
  0x5c   : > { %5893 = vrot.lane.b32.xlu0 %v5797_v36, %s6515_s25  ;;  %5898 = vrot.lane.b32.xlu1 %v6592_v17, %s6519_s28 }
  0x60   : > { %5903 = vrot.lane.b32.xlu0 %v6620_v26, %s6519_s28  ;;  %5908 = vrot.lane.b32.xlu1 %v6632_v29, %s6519_s28 }
  0x64   : > { %5913 = vrot.lane.b32.xlu0 %v5827_v39, %s6515_s25  ;;  %5918 = vrot.lane.b32.xlu1 %v6640_v33, %s6519_s28 }
  0x68   : > { %5923 = vrot.lane.b32.xlu0 %v5797_v36, %s6518_s27  ;;  %5928 = vrot.lane.b32.xlu1 %v6612_v23, %s6520_s29 }
  0x6c   : > { %5933 = vrot.lane.b32.xlu0 %v5797_v36, %s6520_s29  ;;  %5938 = vrot.lane.b32.xlu1 %v6602_v20, %s6520_s29 }
  0x70   : > { %5943 = vrot.lane.b32.xlu0 %v5827_v39, %s6518_s27  ;;  %5948 = vrot.lane.b32.xlu1 %v6632_v29, %s6520_s29 }
  0x74   : > { %5953 = vrot.lane.b32.xlu0 %v5827_v39, %s6520_s29  ;;  %5958 = vrot.lane.b32.xlu1 %v6620_v26, %s6520_s29 }
  0x78   : > { %5963 = vrot.lane.b32.xlu0 %v5797_v36, %s6519_s28  ;;  %5968 = vrot.lane.b32.xlu1 %v6612_v23, %s6521_s30 }
  0x7c   : > { %5973 = vrot.lane.b32.xlu0 %v5797_v36, %s6521_s30  ;;  %5978 = vrot.lane.b32.xlu1 %v6602_v20, %s6521_s30 }
  0x80   : > { %5983 = vrot.lane.b32.xlu0 %v5827_v39, %s6519_s28  ;;  %5988 = vrot.lane.b32.xlu1 %v6632_v29, %s6521_s30 }
  0x84   : > { %5993 = vrot.lane.b32.xlu0 %v5827_v39, %s6521_s30  ;;  %5998 = vrot.lane.b32.xlu1 %v6620_v26, %s6521_s30 }
  0x88   : > { %6003 = vrot.lane.b32.xlu0 %v6612_v23, %s6523_s6  ;;  %6008 = vrot.lane.b32.xlu1 %v5797_v36, %s6523_s6 }
  0x8c   : > { %6013 = vrot.lane.b32.xlu0 %v6592_v17, %s6520_s29  ;;  %6018 = vrot.lane.b32.xlu1 %v6602_v20, %s6523_s6 }
  0x90   : > { %6023 = vrot.lane.b32.xlu0 %v6632_v29, %s6523_s6  ;;  %6028 = vrot.lane.b32.xlu1 %v5827_v39, %s6523_s6 }
  0x94   : > { %6033 = vrot.lane.b32.xlu0 %v6640_v33, %s6520_s29  ;;  %6038 = vrot.lane.b32.xlu1 %v6620_v26, %s6523_s6  ;;  %v6761_v52 = vpop.permute.xlu1 %5763 }
  0x95   : > { %v9370_v53 = vunpack.i.h.bf16 %v6761_v52  ;;  %v9373_v54 = vunpack.i.l.bf16 %v6761_v52 }
  0x96   : > { %v5754_v56 = vpop.permute.xlu0 %5753 }
  0x97   : > { %v5756_v59 = vunpack.i.h.bf16 %v5754_v56  ;;  %v5755_v60 = vunpack.i.l.bf16 %v5754_v56 }
  0x98   : > { %6043 = vrot.lane.b32.xlu0 %v6592_v17, %s6521_s30  ;;  %6048 = vrot.lane.b32.xlu1 %v6640_v33, %s6521_s30 }
  0x99   : > { %v866_v0 = vsel %vm851_vm0, %v9373_v54, %v5755_v60  ;;  %v867_v1 = vsel %vm851_vm0, %v9370_v53, %v5756_v59 }
  0x9a   : > { %v6790_v2 = vpop.permute.xlu0 %5758  ;;  %v5769_v3 = vpop.permute.xlu1 %5768  ;;  %v872_v9 = vpack.c.bf16 %v867_v1, %v866_v0 }
  0x9b   : > { %v5761_v6 = vunpack.i.h.bf16 %v6790_v2  ;;  %v9378_v7 = vunpack.i.l.bf16 %v6790_v2  ;;  %v5771_v20 = vunpack.i.h.bf16 %v5769_v3  ;;  %v5770_v23 = vunpack.i.l.bf16 %v5769_v3 }
  0x9c   : > { %6053 = vrot.lane.b32.xlu0 %v6592_v17, %s6523_s6  ;;  %6058 = vrot.lane.b32.xlu1 %v6640_v33, %s6523_s6  ;;  %v935_v44 = vmul.bf16 %v909_v4, %v872_v9 }
  0x9d   : > { %v862_v12 = vsel %vm851_vm0, %v5755_v60, %v9378_v7  ;;  %v863_v13 = vsel %vm851_vm0, %v5756_v59, %v5761_v6 }
  0x9e   : > { %v6816_v26 = vpop.permute.xlu0 %5773  ;;  %v6818_v29 = vpop.permute.xlu1 %5778  ;;  %v873_v30 = vpack.c.bf16 %v863_v13, %v862_v12  ;;  %v748_v13 = vrot.slane %v743_v45, %v6768_v57 }
  0x9f   : > { %v9367_v36 = vunpack.i.h.bf16 %v6816_v26  ;;  %v9364_v39 = vunpack.i.l.bf16 %v6816_v26  ;;  %v9360_v41 = vunpack.i.h.bf16 %v6818_v29  ;;  %v9363_v42 = vunpack.i.l.bf16 %v6818_v29 }
  0xa0   : > { %6063 = vrot.lane.b32.xlu0 %v6592_v17, %s6516_s26  ;;  %6068 = vrot.lane.b32.xlu1 %v6640_v33, %s6516_s26  ;;  %v936_v43 = vmul.bf16 %v916_v8, %v873_v30 }
  0xa1   : > { %v860_v47 = vsel %vm851_vm0, %v5770_v23, %v9364_v39  ;;  %v861_v17 = vsel %vm851_vm0, %v5771_v20, %v9367_v36  ;;  %v864_v33 = vsel %vm851_vm0, %v9363_v42, %v5770_v23  ;;  %v865_v48 = vsel %vm851_vm0, %v9360_v41, %v5771_v20 }
  0xa2   : > { %2247 = vmatprep.subr.bf16.mxu0 %v936_v43  ;;  %v5784_v56 = vpop.permute.xlu0 %5783  ;;  %v6851_v58 = vpop.permute.xlu1 %5788  ;;  %v869_v59 = vpack.c.bf16 %v861_v17, %v860_v47  ;;  %v868_v60 = vpack.c.bf16 %v865_v48, %v864_v33  ;;  %v1694_v20 = vpack.i.b16 %v6821_v32, %v6821_v32  ;;  %v736_v33 = vpack.i.b16 %v6854_v61, %v6854_v61 }
  0xa3   : > { %v5786_v0 = vunpack.i.h.bf16 %v5784_v56  ;;  %v5785_v1 = vunpack.i.l.bf16 %v5784_v56  ;;  %v9356_v3 = vunpack.i.h.bf16 %v6851_v58  ;;  %v9357_v5 = vunpack.i.l.bf16 %v6851_v58  ;;  %2248 = vmatpush1.bf16.msra.mxu0 %v935_v44 }
  0xa4   : > { %v932_v9 = vmul.bf16 %v916_v8, %v869_v59  ;;  %v931_v12 = vmul.bf16 %v909_v4, %v868_v60  ;;  %v6878_v17 = vrot.slane %v1694_v20, %v6768_v57  ;;  %v1687_v48 = vpack.i.b16 %v6857_v63, %v6857_v63 }
  0xa5   : > { %v694_v55 = vsel %vm683_vm1, %v5785_v1, %v9357_v5  ;;  %v695_v62 = vsel %vm683_vm1, %v5786_v0, %v9356_v3 }
  0xa6   : > { %v5794_v23 = vpop.permute.xlu0 %5793  ;;  %v6872_v30 = vpop.permute.xlu1 %5798  ;;  %2249 = vmatprep.subr.bf16.mxu0 %v932_v9  ;;  %v705_v4 = vpack.c.bf16 %v695_v62, %v694_v55 }
  0xa7   : > { %v5796_v8 = vunpack.i.h.bf16 %v5794_v23  ;;  %v5795_v43 = vunpack.i.l.bf16 %v5794_v23  ;;  %v9353_v44 = vunpack.i.h.bf16 %v6872_v30  ;;  %v9352_v45 = vunpack.i.l.bf16 %v6872_v30  ;;  %2250 = vmatpush1.bf16.msra.mxu0 %v931_v12 }
  0xa8   : > { %v768_v47 = vmul.bf16 %v748_v13, %v705_v4 }
  0xa9   : > { %v1641_v56 = vsel %vm1634_vm2, %v5795_v43, %v9352_v45  ;;  %v1642_v59 = vsel %vm1634_vm2, %v5796_v8, %v9353_v44  ;;  %v6902_v45 = vrot.slane %v736_v33, %v6768_v57  ;;  %v6905_v44 = vrot.slane %v1687_v48, %v6768_v57  ;;  %v5304_v48 = vld.sshfl [vmem:[%s9347_s1 + $0x4] sm:$0x33 pattern:$0x75316420] }
  0xaa   : > { %v6892_v60 = vpop.permute.xlu0 %5803  ;;  %v6894_v9 = vpop.permute.xlu1 %5808  ;;  %2251 = vmatprep.subr.bf16.mxu0 %v768_v47  ;;  %v1656_v12 = vpack.c.bf16 %v1642_v59, %v1641_v56 }
  0xab   : > { %v9355_v20 = vunpack.i.h.bf16 %v6892_v60  ;;  %v9354_v55 = vunpack.i.l.bf16 %v6892_v60  ;;  %v9359_v62 = vunpack.i.h.bf16 %v6894_v9  ;;  %v9358_v23 = vunpack.i.l.bf16 %v6894_v9 }
  0xac   : > { %v1719_v4 = vmul.bf16 %v6878_v17, %v1656_v12 }
  0xad   : > { %v698_v47 = vsel %vm683_vm1, %v9354_v55, %v5785_v1  ;;  %v699_v56 = vsel %vm683_vm1, %v9355_v20, %v5786_v0  ;;  %v1645_v59 = vsel %vm1634_vm2, %v9358_v23, %v5795_v43  ;;  %v1646_v33 = vsel %vm1634_vm2, %v9359_v62, %v5796_v8 }
  0xae   : > { %v5814_v1 = vpop.permute.xlu0 %5813  ;;  %v6926_v12 = vpop.permute.xlu1 %5818  ;;  %2312 = vmatprep.subr.bf16.mxu1 %v1719_v4  ;;  %v704_v55 = vpack.c.bf16 %v699_v56, %v698_v47  ;;  %v1655_v0 = vpack.c.bf16 %v1646_v33, %v1645_v59  ;;  %v550_v62 = vcombine.high %v5304_v48, %v5304_v48  ;;  %v6942_v47 = vcombine.high %v6752_v50, %v6752_v50 }
  0xaf   : > { %v5816_v20 = vunpack.i.h.bf16 %v5814_v1  ;;  %v5815_v3 = vunpack.i.l.bf16 %v5814_v1  ;;  %v9362_v5 = vunpack.i.h.bf16 %v6926_v12  ;;  %v9361_v43 = vunpack.i.l.bf16 %v6926_v12 }
  0xb0   : > { %v767_v23 = vmul.bf16 %v6902_v45, %v704_v55  ;;  %v1718_v8 = vmul.bf16 %v6905_v44, %v1655_v0  ;;  %v902_v50 = vcombine.high %v6755_v51, %v6755_v51  ;;  %v6954_v39 = vrot.slane %v550_v62, %v6741_v46 }
  0xb1   : > { %v692_v41 = vsel %vm683_vm1, %v5815_v3, %v9361_v43  ;;  %v693_v4 = vsel %vm683_vm1, %v5816_v20, %v9362_v5  ;;  %v5294_v5 = vld.sshfl [vmem:[%s9347_s1] sm:$0x33 pattern:$0x75316420]  ;;  %v918_v51 = vpack.i.b16 %v6942_v47, %v6942_v47 }
  0xb2   : > { %v5824_v56 = vpop.permute.xlu0 %5823  ;;  %v6944_v59 = vpop.permute.xlu1 %5828  ;;  %2252 = vmatpush1.bf16.msra.mxu0 %v767_v23  ;;  %2313 = vmatpush1.bf16.msra.mxu1 %v1718_v8  ;;  %v701_v55 = vpack.c.bf16 %v693_v4, %v692_v41  ;;  %v6957_v23 = vrot.slane %v5304_v48, %v6741_v46  ;;  %v925_v53 = vpack.i.b16 %v902_v50, %v902_v50 }
  0xb3   : > { %v5826_v33 = vunpack.i.h.bf16 %v5824_v56  ;;  %v5825_v1 = vunpack.i.l.bf16 %v5824_v56  ;;  %v9366_v0 = vunpack.i.h.bf16 %v6944_v59  ;;  %v9365_v43 = vunpack.i.l.bf16 %v6944_v59 }
  0xb4   : > { %v764_v42 = vmul.bf16 %v748_v13, %v701_v55  ;;  %v6971_v13 = vcombine.high %v6857_v63, %v6857_v63  ;;  %v382_v56 = vcombine.high %v5294_v5, %v5294_v5  ;;  %v575_v63 = vpack.i.b16 %v6954_v39, %v6954_v39 }
  0xb5   : > { %v1639_v41 = vsel %vm1634_vm2, %v5825_v1, %v9365_v43  ;;  %v1640_v8 = vsel %vm1634_vm2, %v5826_v33, %v9366_v0  ;;  %v568_v40 = vpack.i.b16 %v6957_v23, %v6957_v23  ;;  %v7044_v7 = vrot.slane %v5294_v5, %v6741_v46 }
  0xb6   : > { %v6973_v62 = vpop.permute.xlu0 %5833  ;;  %v6975_v48 = vpop.permute.xlu1 %5838  ;;  %2253 = vmatprep.subr.bf16.mxu0 %v764_v42  ;;  %v1652_v4 = vpack.c.bf16 %v1640_v8, %v1639_v41 }
  0xb7   : > { %v9372_v55 = vunpack.i.h.bf16 %v6973_v62  ;;  %v9371_v43 = vunpack.i.l.bf16 %v6973_v62  ;;  %v9375_v0 = vunpack.i.h.bf16 %v6975_v48  ;;  %v9374_v36 = vunpack.i.l.bf16 %v6975_v48 }
  0xb8   : > { %v1715_v47 = vmul.bf16 %v6878_v17, %v1652_v4 }
  0xb9   : > { %v696_v42 = vsel %vm683_vm1, %v9371_v43, %v5815_v3  ;;  %v697_v41 = vsel %vm683_vm1, %v9372_v55, %v5816_v20  ;;  %v1643_v17 = vsel %vm1634_vm2, %v9374_v36, %v5825_v1  ;;  %v1644_v50 = vsel %vm1634_vm2, %v9375_v0, %v5826_v33 }
  0xba   : > { %v5844_v8 = vpop.permute.xlu0 %5843  ;;  %v7002_v4 = vpop.permute.xlu1 %5848  ;;  %2314 = vmatprep.subr.bf16.mxu1 %v1715_v47  ;;  %v700_v3 = vpack.c.bf16 %v697_v41, %v696_v42  ;;  %v1651_v43 = vpack.c.bf16 %v1644_v50, %v1643_v17  ;;  %v7006_v20 = vrot.slane %v382_v56, %v6741_v46  ;;  %v7012_v33 = vcombine.high %v6821_v32, %v6821_v32 }
  0xbb   : > { %v5846_v55 = vunpack.i.h.bf16 %v5844_v8  ;;  %v5845_v54 = vunpack.i.l.bf16 %v5844_v8  ;;  %v9376_v1 = vunpack.i.h.bf16 %v7002_v4  ;;  %v9377_v36 = vunpack.i.l.bf16 %v7002_v4 }
  0xbc   : > { %v763_v0 = vmul.bf16 %v6902_v45, %v700_v3  ;;  %v1714_v47 = vmul.bf16 %v6905_v44, %v1651_v43  ;;  %v580_v42 = vrot.slane %v575_v63, %v6768_v57  ;;  %v7026_v17 = vrot.slane %v568_v40, %v6768_v57  ;;  %v6393_v44 = vld [vmem:[%s9348_s2 + $0x8] ss:$12 sps:$4 sm:$0xff]  }
  0xbd   : > { %v526_v56 = vsel %vm515_vm3, %v5845_v54, %v9377_v36  ;;  %v527_v41 = vsel %vm515_vm3, %v5846_v55, %v9376_v1  ;;  %v7029_v32 = vrot.slane %v925_v53, %v6768_v57  ;;  %v7037_v50 = vrot.slane %v918_v51, %v6768_v57 }
  0xbe   : > { %v5854_v45 = vpop.permute.xlu0 %5853  ;;  %v7034_v43 = vpop.permute.xlu1 %5858  ;;  %2254 = vmatpush1.bf16.msra.mxu0 %v763_v0  ;;  %2315 = vmatpush1.bf16.msra.mxu1 %v1714_v47  ;;  %v537_v63 = vpack.c.bf16 %v527_v41, %v526_v56  ;;  %v407_v40 = vpack.i.b16 %v7006_v20, %v7006_v20  ;;  %v7048_v0 = vcombine.high %v6801_v10, %v6801_v10  ;;  %v9499_v56 = vunpack.i.l.bf16 %v6790_v2 }
  0xbf   : > { %v5856_v8 = vunpack.i.h.bf16 %v5854_v45  ;;  %v5855_v53 = vunpack.i.l.bf16 %v5854_v45  ;;  %v9382_v3 = vunpack.i.h.bf16 %v7034_v43  ;;  %v9379_v1 = vunpack.i.l.bf16 %v7034_v43 }
  0xc0   : > { %v600_v36 = vmul.bf16 %v580_v42, %v537_v63  ;;  %v7052_v51 = vcombine.high %v6854_v61, %v6854_v61  ;;  %v9500_v63 = vunpack.i.l.bf16 %v6761_v52 }
  0xc1   : > { %v859_v47 = vsel %vm851_vm0, %v5761_v6, %v5856_v8  ;;  %v858_v41 = vsel %vm851_vm0, %v9499_v56, %v5855_v53  ;;  %v530_v10 = vsel %vm515_vm3, %v9379_v1, %v5845_v54  ;;  %v531_v61 = vsel %vm515_vm3, %v9382_v3, %v5846_v55  ;;  %5461 = vmatmul.mubr.msk.bf16.vlgmr.msra.gmra.mxu1 %vm2240_vm4, %v6393_v44 }
  0xc2   : > { %v874_v5 = vpack.c.bf16 %v859_v47, %v858_v41  ;;  %v5864_v45 = vpop.permute.xlu0 %5863  ;;  %v7071_v6 = vpop.permute.xlu1 %5868  ;;  %2255 = vmatprep.subr.bf16.mxu0 %v600_v36  ;;  %v536_v2 = vpack.c.bf16 %v531_v61, %v530_v10  ;;  %v854_v56 = vsel %vm851_vm0, %v5855_v53, %v9500_v63  ;;  %v9501_v54 = vunpack.i.h.bf16 %v6761_v52 }
  0xc3   : > { %v5866_v38 = vunpack.i.h.bf16 %v5864_v45  ;;  %v5865_v55 = vunpack.i.l.bf16 %v5864_v45  ;;  %v9383_v44 = vunpack.i.h.bf16 %v7071_v6  ;;  %v9381_v47 = vunpack.i.l.bf16 %v7071_v6 }
  0xc4   : > { %v855_v1 = vsel %vm851_vm0, %v5856_v8, %v9501_v54  ;;  %v9502_v41 = vmov 0   ;;  %v599_v36 = vmul.bf16 %v7026_v17, %v536_v2  ;;  %v400_v53 = vpack.i.b16 %v7044_v7, %v7044_v7 }
  0xc5   : > { %2342 = vmatprep.mubr.bf16.mxu1 %v9502_v41  ;;  %v875_v10 = vpack.c.bf16 %v855_v1, %v854_v56  ;;  %v937_v52 = vmul.bf16 %v7037_v50, %v874_v5  ;;  %v524_v8 = vsel %vm515_vm3, %v5865_v55, %v9381_v47  ;;  %v525_v61 = vsel %vm515_vm3, %v5866_v38, %v9383_v44  ;;  %v7112_v41 = vld [vmem:[%s9348_s2 + $0x20] ss:$12 sps:$4 sm:$0xff]  }
  0xc6   : > { %v7098_v45 = vrot.slane %v407_v40, %v6768_v57  ;;  %v5874_v1 = vpop.permute.xlu0 %5873  ;;  %v7100_v2 = vpop.permute.xlu1 %5878  ;;  %2256 = vmatpush1.bf16.msra.mxu0 %v599_v36  ;;  %v533_v5 = vpack.c.bf16 %v525_v61, %v524_v8  ;;  %v757_v56 = vpack.i.b16 %v7048_v0, %v7048_v0  ;;  %v750_v54 = vpack.i.b16 %v7052_v51, %v7052_v51 }
  0xc7   : > { %v938_v63 = vmul.bf16 %v7029_v32, %v875_v10  ;;  %v5876_v47 = vunpack.i.h.bf16 %v5874_v1  ;;  %v5875_v3 = vunpack.i.l.bf16 %v5874_v1  ;;  %v9384_v44 = vunpack.i.h.bf16 %v7100_v2  ;;  %9503 = vst [vmem:[#allocation7_spill] sm:$0xff] %v7112_v41 }
  0xc8   : > { %v9385_v40 = vunpack.i.l.bf16 %v7100_v2  ;;  %v596_v36 = vmul.bf16 %v580_v42, %v533_v5  ;;  %v7115_v10 = vrot.slane %v400_v53, %v6768_v57  ;;  %v566_v0 = vcombine.high %v6954_v39, %v6954_v39  ;;  %v5364_v53 = vld.sshfl [vmem:[%s9347_s1 + $0x1c] sm:$0x33 pattern:$0x75316420] }
  0xc9   : > { %2353 = vmatprep.subr.bf16.mxu1 %v938_v63  ;;  %v7121_v51 = vcombine.high %v6957_v23, %v6957_v23  ;;  %v9504_v8 = vunpack.i.h.bf16 %v6816_v26  ;;  %v9505_v1 = vunpack.i.l.bf16 %v6816_v26  ;;  %v529_v23 = vsel %vm515_vm3, %v9384_v44, %v5866_v38  ;;  %5462 = vmatmul.mubr.msk.bf16.gmra.mxu1 %vm2240_vm4, %v7112_v41 }
  0xca   : > { %2354 = vmatpush1.bf16.msra.mxu1 %v937_v52  ;;  %v528_v39 = vsel %vm515_vm3, %v9385_v40, %v5865_v55  ;;  %v5884_v26 = vpop.permute.xlu0 %5883  ;;  %v7142_v5 = vpop.permute.xlu1 %5888  ;;  %2257 = vmatprep.subr.bf16.mxu0 %v596_v36 }
  0xcb   : > { %v857_v61 = vsel %vm851_vm0, %v9504_v8, %v5876_v47  ;;  %v856_v42 = vsel %vm851_vm0, %v9505_v1, %v5875_v3  ;;  %v532_v52 = vpack.c.bf16 %v529_v23, %v528_v39  ;;  %v9506_v8 = vunpack.i.l.bf16 %v6818_v29  ;;  %2385 = vmatprep.mubr.bf16.mxu1 %v6806_v11 }
  0xcc   : > { %v870_v63 = vpack.c.bf16 %v857_v61, %v856_v42  ;;  %v9507_v1 = vunpack.i.h.bf16 %v6818_v29  ;;  %v5886_v44 = vunpack.i.h.bf16 %v5884_v26  ;;  %v5885_v40 = vunpack.i.l.bf16 %v5884_v26 }
  0xcd   : > { %v852_v55 = vsel %vm851_vm0, %v5875_v3, %v9506_v8  ;;  %v9387_v37 = vunpack.i.h.bf16 %v7142_v5  ;;  %v9390_v61 = vunpack.i.l.bf16 %v7142_v5  ;;  %v595_v36 = vmul.bf16 %v7026_v17, %v532_v52 }
  0xce   : > { %v853_v38 = vsel %vm851_vm0, %v5876_v47, %v9507_v1  ;;  %v589_v39 = vpack.i.b16 %v566_v0, %v566_v0  ;;  %v1501_v23 = vcombine.high %v5364_v53, %v5364_v53  ;;  %v933_v29 = vmul.bf16 %v7037_v50, %v870_v63  ;;  %v5894_v17 = vpop.permute.xlu0 %5893  ;;  %v7170_v0 = vpop.permute.xlu1 %5898 }
  0xcf   : > { %v871_v42 = vpack.c.bf16 %v853_v38, %v852_v55  ;;  %v359_v3 = vsel %vm348_vm5, %v5885_v40, %v9390_v61  ;;  %v360_v47 = vsel %vm348_vm5, %v5886_v44, %v9387_v37  ;;  %v7168_v26 = vrot.slane %v757_v56, %v6768_v57  ;;  %2258 = vmatpush1.bf16.msra.mxu0 %v595_v36 }
  0xd0   : > { %v370_v50 = vpack.c.bf16 %v360_v47, %v359_v3  ;;  %v7174_v63 = vrot.slane %v750_v54, %v6768_v57  ;;  %v582_v52 = vpack.i.b16 %v7121_v51, %v7121_v51  ;;  %v5896_v8 = vunpack.i.h.bf16 %v5894_v17 }
  0xd1   : > { %v934_v11 = vmul.bf16 %v7029_v32, %v871_v42  ;;  %v5895_v55 = vunpack.i.l.bf16 %v5894_v17  ;;  %v9391_v1 = vunpack.i.h.bf16 %v7170_v0  ;;  %v9392_v56 = vunpack.i.l.bf16 %v7170_v0 }
  0xd2   : > { %v432_v38 = vmul.bf16 %v7098_v45, %v370_v50  ;;  %v7182_v36 = vrot.slane %v589_v39, %v6768_v57  ;;  %v7185_v32 = vrot.slane %v1501_v23, %v6741_v46  ;;  %v7188_v54 = vrot.slane %v5364_v53, %v6741_v46  ;;  %v5904_v17 = vpop.permute.xlu0 %5903 }
  0xd3   : > { %2355 = vmatprep.subr.bf16.mxu1 %v934_v11  ;;  %v9508_v51 = vunpack.i.l.bf16 %v6851_v58  ;;  %v9509_v3 = vunpack.i.h.bf16 %v6851_v58  ;;  %v363_v39 = vsel %vm348_vm5, %v9392_v56, %v5885_v40  ;;  %v364_v53 = vsel %vm348_vm5, %v9391_v1, %v5886_v44  ;;  %v7206_v11 = vpop.permute.xlu1 %5908 }
  0xd4   : > { %2356 = vmatpush1.bf16.msra.mxu1 %v933_v29  ;;  %2259 = vmatprep.subr.bf16.mxu0 %v432_v38  ;;  %v369_v58 = vpack.c.bf16 %v364_v53, %v363_v39  ;;  %v9510_v50 = vunpack.i.l.bf16 %v6892_v60  ;;  %v5905_v37 = vunpack.i.l.bf16 %v5904_v17  ;;  %v9388_v44 = vunpack.i.h.bf16 %v7206_v11  ;;  %v7221_v38 = vld.sshfl [vmem:[%s9347_s1 + $0x18] sm:$0x33 pattern:$0x75316420] }
  0xd5   : > { %v690_v42 = vsel %vm683_vm1, %v9508_v51, %v5895_v55  ;;  %v691_v47 = vsel %vm683_vm1, %v9509_v3, %v5896_v8  ;;  %v9511_v51 = vunpack.i.h.bf16 %v6892_v60  ;;  %v5906_v3 = vunpack.i.h.bf16 %v5904_v17 }
  0xd6   : > { %v706_v23 = vpack.c.bf16 %v691_v47, %v690_v42  ;;  %v686_v29 = vsel %vm683_vm1, %v5895_v55, %v9510_v50  ;;  %v9389_v42 = vunpack.i.l.bf16 %v7206_v11  ;;  %v431_v47 = vmul.bf16 %v7115_v10, %v369_v58  ;;  %v5914_v50 = vpop.permute.xlu0 %5913 }
  0xd7   : > { %v687_v40 = vsel %vm683_vm1, %v5896_v8, %v9511_v51  ;;  %v1526_v60 = vpack.i.b16 %v7185_v32, %v7185_v32  ;;  %v1519_v8 = vpack.i.b16 %v7188_v54, %v7188_v54  ;;  %v358_v55 = vsel %vm348_vm5, %v5906_v3, %v9388_v44 }
  0xd8   : > { %v707_v39 = vpack.c.bf16 %v687_v40, %v686_v29  ;;  %v357_v53 = vsel %vm348_vm5, %v5905_v37, %v9389_v42  ;;  %v769_v17 = vmul.bf16 %v7174_v63, %v706_v23  ;;  %v7238_v58 = vrot.slane %v582_v52, %v6768_v57  ;;  %v7240_v29 = vpop.permute.xlu1 %5918  ;;  %2260 = vmatpush1.bf16.msra.mxu0 %v431_v47 }
  0xd9   : > { %v366_v40 = vpack.c.bf16 %v358_v55, %v357_v53  ;;  %v7246_v44 = vcombine.high %v7006_v20, %v7006_v20  ;;  %v1333_v42 = vcombine.high %v7221_v38, %v7221_v38  ;;  %v5916_v23 = vunpack.i.h.bf16 %v5914_v50 }
  0xda   : > { %v770_v51 = vmul.bf16 %v7168_v26, %v707_v39  ;;  %v5915_v61 = vunpack.i.l.bf16 %v5914_v50  ;;  %v5921_v52 = vunpack.i.h.bf16 %v7240_v29  ;;  %v5920_v1 = vunpack.i.l.bf16 %v7240_v29 }
  0xdb   : > { %v428_v47 = vmul.bf16 %v7098_v45, %v366_v40  ;;  %v7254_v39 = vrot.slane %v1526_v60, %v6768_v57  ;;  %v7257_v55 = vrot.slane %v1519_v8, %v6768_v57  ;;  %v7261_v20 = vcombine.high %v7044_v7, %v7044_v7 }
  0xdc   : > { %2357 = vmatprep.subr.bf16.mxu1 %v770_v51  ;;  %v9512_v53 = vunpack.i.l.bf16 %v6973_v62  ;;  %v9513_v56 = vunpack.i.h.bf16 %v6973_v62  ;;  %v9514_v60 = vunpack.i.l.bf16 %v6926_v12  ;;  %v9515_v51 = vunpack.i.h.bf16 %v6926_v12  ;;  %v5929_v41 = vpop.permute.xlu1 %5928 }
  0xdd   : > { %2358 = vmatpush1.bf16.msra.mxu1 %v769_v17  ;;  %v362_v62 = vsel %vm348_vm5, %v5921_v52, %v5906_v3  ;;  %2261 = vmatprep.subr.bf16.mxu0 %v428_v47  ;;  %v421_v17 = vpack.i.b16 %v7246_v44, %v7246_v44  ;;  %v9518_v44 = vunpack.i.l.bf16 %v7002_v4 }
  0xde   : > { %v684_v50 = vsel %vm683_vm1, %v5915_v61, %v9512_v53  ;;  %v685_v45 = vsel %vm683_vm1, %v5916_v23, %v9513_v56  ;;  %v688_v8 = vsel %vm683_vm1, %v9514_v60, %v5915_v61  ;;  %v689_v7 = vsel %vm683_vm1, %v9515_v51, %v5916_v23  ;;  %v5924_v53 = vpop.permute.xlu0 %5923 }
  0xdf   : > { %v702_v40 = vpack.c.bf16 %v689_v7, %v688_v8  ;;  %v361_v56 = vsel %vm348_vm5, %v5920_v1, %v5905_v37  ;;  %v703_v61 = vpack.c.bf16 %v685_v45, %v684_v50  ;;  %v5926_v12 = vunpack.i.h.bf16 %v5924_v53 }
  0xe0   : > { %v5925_v60 = vunpack.i.l.bf16 %v5924_v53  ;;  %v7290_v23 = vrot.slane %v1333_v42, %v6741_v46  ;;  %v5931_v8 = vunpack.i.h.bf16 %v5929_v41  ;;  %v365_v51 = vpack.c.bf16 %v362_v62, %v361_v56  ;;  %v7315_v53 = vpop.permute.xlu1 %5938 }
  0xe1   : > { %v766_v3 = vmul.bf16 %v7168_v26, %v703_v61  ;;  %v765_v7 = vmul.bf16 %v7174_v63, %v702_v40  ;;  %v9516_v37 = vunpack.i.l.bf16 %v7034_v43  ;;  %v9517_v50 = vunpack.i.h.bf16 %v7034_v43  ;;  %v5344_v63 = vld.sshfl [vmem:[%s9347_s1 + $0x14] sm:$0x33 pattern:$0x75316420] }
  0xe2   : > { %v522_v42 = vsel %vm515_vm3, %v9518_v44, %v5925_v60  ;;  %v9519_v62 = vunpack.i.h.bf16 %v7002_v4  ;;  %v5930_v56 = vunpack.i.l.bf16 %v5929_v41  ;;  %v7313_v43 = vpop.permute.xlu0 %5933  ;;  %v427_v61 = vmul.bf16 %v7115_v10, %v365_v51 }
  0xe3   : > { %v518_v47 = vsel %vm515_vm3, %v5925_v60, %v9516_v37  ;;  %v519_v45 = vsel %vm515_vm3, %v5926_v12, %v9517_v50  ;;  %2359 = vmatprep.subr.bf16.mxu1 %v766_v3  ;;  %v9394_v60 = vunpack.i.h.bf16 %v7313_v43  ;;  %v9397_v4 = vunpack.i.l.bf16 %v7313_v43 }
  0xe4   : > { %v523_v26 = vsel %vm515_vm3, %v9519_v62, %v5926_v12  ;;  %v539_v37 = vpack.c.bf16 %v519_v45, %v518_v47  ;;  %v9395_v12 = vunpack.i.h.bf16 %v7315_v53  ;;  %v9396_v50 = vunpack.i.l.bf16 %v7315_v53  ;;  %2360 = vmatpush1.bf16.msra.mxu1 %v765_v7  ;;  %2262 = vmatpush1.bf16.msra.mxu0 %v427_v61  ;;  %v5949_v62 = vpop.permute.xlu1 %5948 }
  0xe5   : > { %v538_v40 = vpack.c.bf16 %v523_v26, %v522_v42  ;;  %v7326_v42 = vrot.slane %v7221_v38, %v6741_v46  ;;  %v1165_v10 = vcombine.high %v5344_v63, %v5344_v63  ;;  %v1473_v51 = vsel %vm1466_vm6, %v5930_v56, %v9397_v4 }
  0xe6   : > { %v602_v41 = vmul.bf16 %v7182_v36, %v539_v37  ;;  %v1474_v3 = vsel %vm1466_vm6, %v5931_v8, %v9394_v60  ;;  %v1477_v7 = vsel %vm1466_vm6, %v9396_v50, %v5930_v56  ;;  %v1478_v38 = vsel %vm1466_vm6, %v9395_v12, %v5931_v8  ;;  %v5944_v45 = vpop.permute.xlu0 %5943 }
  0xe7   : > { %v601_v44 = vmul.bf16 %v7238_v58, %v538_v40  ;;  %v1488_v26 = vpack.c.bf16 %v1474_v3, %v1473_v51  ;;  %v1487_v40 = vpack.c.bf16 %v1478_v38, %v1477_v7  ;;  %v414_v61 = vpack.i.b16 %v7261_v20, %v7261_v20 }
  0xe8   : > { %2361 = vmatprep.subr.bf16.mxu1 %v602_v41  ;;  %v5946_v37 = vunpack.i.h.bf16 %v5944_v45  ;;  %v5945_v60 = vunpack.i.l.bf16 %v5944_v45  ;;  %v7349_v56 = vrot.slane %v421_v17, %v6768_v57  ;;  %v1358_v8 = vpack.i.b16 %v7290_v23, %v7290_v23 }
  0xe9   : > { %2362 = vmatpush1.bf16.msra.mxu1 %v601_v44  ;;  %v1551_v12 = vmul.bf16 %v7254_v39, %v1488_v26  ;;  %v1550_v47 = vmul.bf16 %v7257_v55, %v1487_v40  ;;  %v1351_v41 = vpack.i.b16 %v7326_v42, %v7326_v42  ;;  %v7358_v51 = vrot.slane %v1165_v10, %v6741_v46 }
  0xea   : > { %v9520_v20 = vunpack.i.l.bf16 %v7100_v2  ;;  %v9521_v17 = vunpack.i.h.bf16 %v7100_v2  ;;  %v9522_v7 = vunpack.i.l.bf16 %v7071_v6  ;;  %v9523_v45 = vunpack.i.h.bf16 %v7071_v6  ;;  %v7376_v4 = vpop.permute.xlu0 %5953 }
  0xeb   : > { %v5951_v40 = vunpack.i.h.bf16 %v5949_v62  ;;  %v5950_v50 = vunpack.i.l.bf16 %v5949_v62  ;;  %2263 = vmatprep.subr.bf16.mxu0 %v1551_v12  ;;  %v7391_v12 = vrot.slane %v5344_v63, %v6741_v46 }
  0xec   : > { %v516_v44 = vsel %vm515_vm3, %v5945_v60, %v9520_v20  ;;  %v517_v3 = vsel %vm515_vm3, %v5946_v37, %v9521_v17  ;;  %v520_v38 = vsel %vm515_vm3, %v9522_v7, %v5945_v60  ;;  %v521_v10 = vsel %vm515_vm3, %v9523_v45, %v5946_v37  ;;  %v7378_v20 = vpop.permute.xlu1 %5958  ;;  %2264 = vmatpush2.bf16.msra.mxu0 %v1550_v47 }
  0xed   : > { %v534_v26 = vpack.c.bf16 %v521_v10, %v520_v38  ;;  %v535_v2 = vpack.c.bf16 %v517_v3, %v516_v44  ;;  %v9398_v17 = vunpack.i.h.bf16 %v7376_v4  ;;  %v9403_v60 = vunpack.i.l.bf16 %v7376_v4 }
  0xee   : > { %v9399_v6 = vunpack.i.h.bf16 %v7378_v20  ;;  %v9401_v7 = vunpack.i.l.bf16 %v7378_v20  ;;  %v7388_v38 = vrot.slane %v414_v61, %v6768_v57  ;;  %v5964_v63 = vpop.permute.xlu0 %5963  ;;  %v7410_v10 = vrot.slane %v1358_v8, %v6768_v57 }
  0xef   : > { %v598_v37 = vmul.bf16 %v7182_v36, %v535_v2  ;;  %v597_v62 = vmul.bf16 %v7238_v58, %v534_v26  ;;  %v1471_v44 = vsel %vm1466_vm6, %v5950_v50, %v9403_v60  ;;  %v1472_v47 = vsel %vm1466_vm6, %v5951_v40, %v9398_v17 }
  0xf0   : > { %v1475_v36 = vsel %vm1466_vm6, %v9401_v7, %v5950_v50  ;;  %v1476_v58 = vsel %vm1466_vm6, %v9399_v6, %v5951_v40  ;;  %v5969_v61 = vpop.permute.xlu1 %5968  ;;  %v1484_v3 = vpack.c.bf16 %v1472_v47, %v1471_v44  ;;  %v7413_v26 = vrot.slane %v1351_v41, %v6768_v57 }
  0xf1   : > { %2363 = vmatprep.subr.bf16.mxu1 %v598_v37  ;;  %v1483_v45 = vpack.c.bf16 %v1476_v58, %v1475_v36  ;;  %v5966_v2 = vunpack.i.h.bf16 %v5964_v63  ;;  %v5965_v17 = vunpack.i.l.bf16 %v5964_v63  ;;  %v1190_v50 = vpack.i.b16 %v7358_v51, %v7358_v51  ;;  %v5334_v58 = vld.sshfl [vmem:[%s9347_s1 + $0x10] sm:$0x33 pattern:$0x75316420] }
  0xf2   : > { %2364 = vmatpush1.bf16.msra.mxu1 %v597_v62  ;;  %v1517_v40 = vcombine.high %v7185_v32, %v7185_v32  ;;  %v1547_v6 = vmul.bf16 %v7254_v39, %v1484_v3  ;;  %v1183_v8 = vpack.i.b16 %v7391_v12, %v7391_v12  ;;  %v7425_v41 = vcombine.high %v7188_v54, %v7188_v54 }
  0xf3   : > { %v1546_v37 = vmul.bf16 %v7257_v55, %v1483_v45  ;;  %v9524_v44 = vunpack.i.l.bf16 %v7170_v0  ;;  %v9525_v47 = vunpack.i.h.bf16 %v7170_v0  ;;  %v9526_v39 = vunpack.i.l.bf16 %v7142_v5  ;;  %v7446_v45 = vpop.permute.xlu0 %5973 }
  0xf4   : > { %v9527_v36 = vunpack.i.h.bf16 %v7142_v5  ;;  %v5971_v3 = vunpack.i.h.bf16 %v5969_v61  ;;  %v5970_v0 = vunpack.i.l.bf16 %v5969_v61  ;;  %2265 = vmatprep.subr.bf16.mxu0 %v1547_v6  ;;  %v9400_v5 = vunpack.i.l.bf16 %v7446_v45 }
  0xf5   : > { %v351_v62 = vsel %vm348_vm5, %v5965_v17, %v9524_v44  ;;  %v352_v32 = vsel %vm348_vm5, %v5966_v2, %v9525_v47  ;;  %v355_v55 = vsel %vm348_vm5, %v9526_v39, %v5965_v17  ;;  %v7448_v44 = vpop.permute.xlu1 %5978  ;;  %v9402_v17 = vunpack.i.h.bf16 %v7446_v45  ;;  %2266 = vmatpush2.bf16.msra.mxu0 %v1546_v37 }
  0xf6   : > { %v356_v54 = vsel %vm348_vm5, %v9527_v36, %v5966_v2  ;;  %v372_v47 = vpack.c.bf16 %v352_v32, %v351_v62  ;;  %v5981_v39 = vunpack.i.h.bf16 %v7448_v44  ;;  %v9404_v2 = vunpack.i.l.bf16 %v7448_v44 }
  0xf7   : > { %v371_v63 = vpack.c.bf16 %v356_v54, %v355_v55  ;;  %v1540_v61 = vpack.i.b16 %v1517_v40, %v1517_v40  ;;  %v997_v54 = vcombine.high %v5334_v58, %v5334_v58  ;;  %v1305_v6 = vsel %vm1298_vm7, %v5970_v0, %v9400_v5  ;;  %v5984_v32 = vpop.permute.xlu0 %5983 }
  0xf8   : > { %v434_v36 = vmul.bf16 %v7349_v56, %v372_v47  ;;  %v1306_v62 = vsel %vm1298_vm7, %v5971_v3, %v9402_v17  ;;  %v1309_v37 = vsel %vm1298_vm7, %v9404_v2, %v5970_v0  ;;  %v1310_v40 = vsel %vm1298_vm7, %v5981_v39, %v5971_v3 }
  0xf9   : > { %v433_v55 = vmul.bf16 %v7388_v38, %v371_v63  ;;  %v5989_v63 = vpop.permute.xlu1 %5988  ;;  %v1320_v47 = vpack.c.bf16 %v1306_v62, %v1305_v6  ;;  %v1319_v5 = vpack.c.bf16 %v1310_v40, %v1309_v37  ;;  %v7474_v7 = vrot.slane %v1190_v50, %v6768_v57 }
  0xfa   : > { %2365 = vmatprep.subr.bf16.mxu1 %v434_v36  ;;  %v5986_v17 = vunpack.i.h.bf16 %v5984_v32  ;;  %v5985_v60 = vunpack.i.l.bf16 %v5984_v32  ;;  %v7477_v0 = vrot.slane %v1183_v8, %v6768_v57  ;;  %v1533_v2 = vpack.i.b16 %v7425_v41, %v7425_v41 }
  0xfb   : > { %2366 = vmatpush1.bf16.msra.mxu1 %v433_v55  ;;  %v1383_v3 = vmul.bf16 %v7410_v10, %v1320_v47  ;;  %v1382_v36 = vmul.bf16 %v7413_v26, %v1319_v5  ;;  %v7484_v6 = vrot.slane %v1540_v61, %v6768_v57  ;;  %v7487_v62 = vrot.slane %v997_v54, %v6741_v46  ;;  %v7505_v32 = vpop.permute.xlu0 %5993 }
  0xfc   : > { %v349_v50 = vsel %vm348_vm5, %v5985_v60, %v5920_v1  ;;  %v350_v8 = vsel %vm348_vm5, %v5986_v17, %v5921_v52  ;;  %v9528_v41 = vunpack.i.l.bf16 %v7206_v11  ;;  %v9529_v55 = vunpack.i.h.bf16 %v7206_v11 }
  0xfd   : > { %v5991_v37 = vunpack.i.h.bf16 %v5989_v63  ;;  %v5990_v40 = vunpack.i.l.bf16 %v5989_v63  ;;  %v7507_v1 = vpop.permute.xlu1 %5998  ;;  %2267 = vmatprep.subr.bf16.mxu0 %v1383_v3  ;;  %v368_v29 = vpack.c.bf16 %v350_v8, %v349_v50  ;;  %v5996_v52 = vunpack.i.h.bf16 %v7505_v32 }
  0xfe   : > { %v353_v5 = vsel %vm348_vm5, %v9528_v41, %v5985_v60  ;;  %v354_v61 = vsel %vm348_vm5, %v9529_v55, %v5986_v17  ;;  %v5995_v47 = vunpack.i.l.bf16 %v7505_v32  ;;  %v9406_v60 = vunpack.i.h.bf16 %v7507_v1  ;;  %2268 = vmatpush2.bf16.msra.mxu0 %v1382_v36 }
  0xff   : > { %v367_v54 = vpack.c.bf16 %v354_v61, %v353_v5  ;;  %v9405_v11 = vunpack.i.l.bf16 %v7507_v1  ;;  %v430_v17 = vmul.bf16 %v7349_v56, %v368_v29  ;;  %v7516_v63 = vrot.slane %v5334_v58, %v6741_v46 }
 0x100   : > { %v1349_v3 = vcombine.high %v7290_v23, %v7290_v23  ;;  %v1303_v50 = vsel %vm1298_vm7, %v5990_v40, %v5995_v47  ;;  %v1304_v36 = vsel %vm1298_vm7, %v5991_v37, %v5996_v52  ;;  %v1308_v23 = vsel %vm1298_vm7, %v9406_v60, %v5991_v37 }
 0x101   : > { %v429_v41 = vmul.bf16 %v7388_v38, %v367_v54  ;;  %v1307_v56 = vsel %vm1298_vm7, %v9405_v11, %v5990_v40  ;;  %v6004_v38 = vpop.permute.xlu0 %6003  ;;  %v7536_v58 = vpop.permute.xlu1 %6008  ;;  %2367 = vmatprep.subr.bf16.mxu1 %v430_v17  ;;  %v1316_v8 = vpack.c.bf16 %v1304_v36, %v1303_v50  ;;  %v1022_v55 = vpack.i.b16 %v7487_v62, %v7487_v62 }
 0x102   : > { %v1315_v5 = vpack.c.bf16 %v1308_v23, %v1307_v56  ;;  %v1348_v61 = vcombine.high %v7326_v42, %v7326_v42  ;;  %v6006_v54 = vunpack.i.h.bf16 %v6004_v38  ;;  %v6005_v29 = vunpack.i.l.bf16 %v6004_v38 }
 0x103   : > { %v9407_v40 = vunpack.i.h.bf16 %v7536_v58  ;;  %v9408_v11 = vunpack.i.l.bf16 %v7536_v58  ;;  %2368 = vmatpush1.bf16.msra.mxu1 %v429_v41  ;;  %v1379_v37 = vmul.bf16 %v7410_v10, %v1316_v8  ;;  %v7547_v17 = vrot.slane %v1533_v2, %v6768_v57 }
 0x104   : > { %v1378_v60 = vmul.bf16 %v7413_v26, %v1315_v5  ;;  %v1015_v50 = vpack.i.b16 %v7516_v63, %v7516_v63  ;;  %v7561_v10 = vpack.c.bf16 %v6604_v21, %v6596_v19  ;;  %v1372_v26 = vpack.i.b16 %v1349_v3, %v1349_v3 }
 0x105   : > { %v1138_v42 = vsel %vm1130_vm8, %v6006_v54, %v9407_v40  ;;  %v1137_v41 = vsel %vm1130_vm8, %v6005_v29, %v9408_v11  ;;  %v6014_v2 = vpop.permute.xlu0 %6013  ;;  %v7563_v36 = vpop.permute.xlu1 %6018  ;;  %2269 = vmatprep.subr.bf16.mxu0 %v1379_v37  ;;  %v7566_v23 = vrot.slane %v1022_v55, %v6768_v57  ;;  %v7570_v38 = vpack.c.bf16 %v6594_v18, %v6588_v16 }
 0x106   : > { %9530 = vst [vmem:[#allocation8_spill] sm:$0xff] %v7561_v10  ;;  %v1152_v56 = vpack.c.bf16 %v1138_v42, %v1137_v41  ;;  %v1365_v8 = vpack.i.b16 %v1348_v61, %v1348_v61  ;;  %v6016_v5 = vunpack.i.h.bf16 %v6014_v2  ;;  %v6015_v40 = vunpack.i.l.bf16 %v6014_v2  ;;  %2270 = vmatpush2.bf16.msra.mxu0 %v1378_v60 }
 0x107   : > { %9531 = vst [vmem:[#allocation9_spill] sm:$0xff] %v7570_v38  ;;  %v9411_v11 = vunpack.i.h.bf16 %v7563_v36  ;;  %v6020_v19 = vunpack.i.l.bf16 %v7563_v36  ;;  %v7576_v3 = vrot.slane %v1015_v50, %v6768_v57  ;;  %v7580_v55 = vcombine.high %v7358_v51, %v7358_v51 }
 0x108   : > { %v1215_v21 = vmul.bf16 %v7474_v7, %v1152_v56  ;;  %v7584_v16 = vcombine.high %v7391_v12, %v7391_v12  ;;  %v9532_v18 = vunpack.i.l.bf16 %v7313_v43  ;;  %v9533_v60 = vunpack.i.h.bf16 %v7313_v43 }
 0x109   : > { %v9534_v50 = vunpack.i.l.bf16 %v7315_v53  ;;  %v9535_v42 = vunpack.i.h.bf16 %v7315_v53  ;;  %v1142_v2 = vsel %vm1130_vm8, %v9411_v11, %v6006_v54  ;;  %v1141_v43 = vsel %vm1130_vm8, %v6020_v19, %v6005_v29  ;;  %v6024_v56 = vpop.permute.xlu0 %6023 }
 0x10a   : > { %v1469_v61 = vsel %vm1466_vm6, %v9532_v18, %v6015_v40  ;;  %v1470_v37 = vsel %vm1466_vm6, %v9533_v60, %v6016_v5  ;;  %v7610_v18 = vpop.permute.xlu1 %6028  ;;  %2271 = vmatprep.subr.bf16.mxu0 %v1215_v21  ;;  %v6026_v53 = vunpack.i.h.bf16 %v6024_v56  ;;  %v6025_v60 = vunpack.i.l.bf16 %v6024_v56 }
 0x10b   : > { %v1481_v51 = vsel %vm1466_vm6, %v6015_v40, %v9534_v50  ;;  %v1482_v12 = vsel %vm1466_vm6, %v6016_v5, %v9535_v42  ;;  %v1489_v41 = vpack.c.bf16 %v1470_v37, %v1469_v61  ;;  %v9409_v5 = vunpack.i.h.bf16 %v7610_v18 }
 0x10c   : > { %v1490_v40 = vpack.c.bf16 %v1482_v12, %v1481_v51  ;;  %v9410_v61 = vunpack.i.l.bf16 %v7610_v18  ;;  %v1151_v37 = vpack.c.bf16 %v1142_v2, %v1141_v43  ;;  %v7617_v42 = vrot.slane %v1372_v26, %v6768_v57 }
 0x10d   : > { %v1552_v54 = vmul.bf16 %v7547_v17, %v1489_v41  ;;  %v1136_v29 = vsel %vm1130_vm8, %v6026_v53, %v9409_v5  ;;  %v7630_v12 = vrot.slane %v1365_v8, %v6768_v57  ;;  %v6034_v41 = vpop.permute.xlu0 %6033  ;;  %v1204_v56 = vpack.i.b16 %v7580_v55, %v7580_v55 }
 0x10e   : > { %v1553_v50 = vmul.bf16 %v7484_v6, %v1490_v40  ;;  %v1135_v21 = vsel %vm1130_vm8, %v6025_v60, %v9410_v61  ;;  %v7632_v2 = vpop.permute.xlu1 %6038  ;;  %v1214_v26 = vmul.bf16 %v7477_v0, %v1151_v37  ;;  %v1197_v40 = vpack.i.b16 %v7584_v16, %v7584_v16 }
 0x10f   : > { %v1148_v43 = vpack.c.bf16 %v1136_v29, %v1135_v21  ;;  %v6036_v5 = vunpack.i.h.bf16 %v6034_v41  ;;  %v6035_v61 = vunpack.i.l.bf16 %v6034_v41  ;;  %v6041_v51 = vunpack.i.h.bf16 %v7632_v2 }
 0x110   : > { %2369 = vmatprep.subr.bf16.mxu1 %v1553_v50  ;;  %v6040_v8 = vunpack.i.l.bf16 %v7632_v2  ;;  %2272 = vmatpush2.bf16.msra.mxu0 %v1214_v26  ;;  %v7644_v37 = vpack.c.bf16 %v6622_v27, %v6616_v25  ;;  %v7648_v55 = vpack.c.bf16 %v6614_v24, %v6606_v22  ;;  %v1708_v16 = vpack.i.b16 %v7012_v33, %v7012_v33  ;;  %v6394_v2 = vld [vmem:[%s9348_s2] ss:$12 sps:$4 sm:$0xff]  }
 0x111   : > { %2370 = vmatpush2.bf16.msra.mxu1 %v1552_v54  ;;  %v1211_v11 = vmul.bf16 %v7474_v7, %v1148_v43  ;;  %v9538_v50 = vunpack.i.l.bf16 %v7376_v4  ;;  %v9539_v54 = vunpack.i.h.bf16 %v7376_v4  ;;  %v9540_v25 = vunpack.i.l.bf16 %v7378_v20  ;;  %v6044_v41 = vpop.permute.xlu0 %6043 }
 0x112   : > { %9536 = vst [vmem:[#allocation10_spill] sm:$0xff] %v7644_v37  ;;  %9537 = vst [vmem:[#allocation11_spill] sm:$0xff] %v7648_v55  ;;  %v9541_v22 = vunpack.i.h.bf16 %v7378_v20  ;;  %v1140_v21 = vsel %vm1130_vm8, %v6041_v51, %v6026_v53  ;;  %v1139_v4 = vsel %vm1130_vm8, %v6040_v8, %v6025_v60  ;;  %v6049_v26 = vpop.permute.xlu1 %6048  ;;  %v6046_v43 = vunpack.i.h.bf16 %v6044_v41 }
 0x113   : > { %v1467_v29 = vsel %vm1466_vm6, %v9538_v50, %v6035_v61  ;;  %v1468_v7 = vsel %vm1466_vm6, %v9539_v54, %v6036_v5  ;;  %v1479_v27 = vsel %vm1466_vm6, %v6035_v61, %v9540_v25  ;;  %2273 = vmatprep.subr.bf16.mxu0 %v1211_v11  ;;  %v6045_v20 = vunpack.i.l.bf16 %v6044_v41 }
 0x114   : > { %v1480_v24 = vsel %vm1466_vm6, %v6036_v5, %v9541_v22  ;;  %v1485_v33 = vpack.c.bf16 %v1468_v7, %v1467_v29  ;;  %v6051_v50 = vunpack.i.h.bf16 %v6049_v26  ;;  %v7678_v5 = vcombine.high %v7487_v62, %v7487_v62 }
 0x115   : > { %v1486_v61 = vpack.c.bf16 %v1480_v24, %v1479_v27  ;;  %v6050_v29 = vunpack.i.l.bf16 %v6049_v26  ;;  %v1147_v54 = vpack.c.bf16 %v1140_v21, %v1139_v4  ;;  %v9542_v25 = vunpack.i.l.bf16 %v7446_v45 }
 0x116   : > { %v1548_v7 = vmul.bf16 %v7547_v17, %v1485_v33  ;;  %v9543_v11 = vunpack.i.h.bf16 %v7446_v45  ;;  %v9544_v22 = vunpack.i.l.bf16 %v7448_v44  ;;  %v6054_v17 = vpop.permute.xlu0 %6053  ;;  %v7698_v24 = vpop.permute.xlu1 %6058  ;;  %v1046_v45 = vmul.bf16 %v7576_v3, %v7570_v38 }
 0x117   : > { %v1549_v53 = vmul.bf16 %v7484_v6, %v1486_v61  ;;  %v1301_v60 = vsel %vm1298_vm7, %v9542_v25, %v6045_v20  ;;  %v1314_v6 = vsel %vm1298_vm7, %v6046_v43, %v5981_v39  ;;  %v1043_v33 = vmul.bf16 %v7566_v23, %v7644_v37 }
 0x118   : > { %v1302_v27 = vsel %vm1298_vm7, %v9543_v11, %v6046_v43  ;;  %v1313_v62 = vsel %vm1298_vm7, %v6045_v20, %v9544_v22  ;;  %v1042_v21 = vmul.bf16 %v7576_v3, %v7648_v55  ;;  %v7707_v4 = vrot.slane %v1204_v56, %v6768_v57 }
 0x119   : > { %2371 = vmatprep.subr.bf16.mxu1 %v1549_v53  ;;  %v6056_v44 = vunpack.i.h.bf16 %v6054_v17  ;;  %v6055_v41 = vunpack.i.l.bf16 %v6054_v17  ;;  %v7710_v39 = vrot.slane %v1708_v16, %v6768_v57  ;;  %v7713_v26 = vrot.slane %v1197_v40, %v6768_v57 }
 0x11a   : > { %2372 = vmatpush2.bf16.msra.mxu1 %v1548_v7  ;;  %v1321_v61 = vpack.c.bf16 %v1302_v27, %v1301_v60  ;;  %v1210_v43 = vmul.bf16 %v7477_v0, %v1147_v54  ;;  %v1322_v20 = vpack.c.bf16 %v1314_v6, %v1313_v62  ;;  %v9545_v3 = vpack.i.b16 %v6971_v13, %v6971_v13  ;;  %v6069_v25 = vpop.permute.xlu1 %6068 }
 0x11b   : > { %v1300_v56 = vsel %vm1298_vm7, %v5996_v52, %v6051_v50  ;;  %v1299_v40 = vsel %vm1298_vm7, %v5995_v47, %v6050_v29  ;;  %v1036_v0 = vpack.i.b16 %v7678_v5, %v7678_v5  ;;  %v7734_v16 = vcombine.high %v7516_v63, %v7516_v63  ;;  %v6064_v5 = vpop.permute.xlu0 %6063 }
 0x11c   : > { %v7720_v53 = vrot.slane %v9545_v3, %v6768_v57  ;;  %v9546_v13 = vunpack.i.l.bf16 %v7507_v1  ;;  %v9547_v7 = vunpack.i.h.bf16 %v7507_v1  ;;  %v6061_v52 = vunpack.i.h.bf16 %v7698_v24  ;;  %2274 = vmatpush2.bf16.msra.mxu0 %v1210_v43 }
 0x11d   : > { %v6060_v47 = vunpack.i.l.bf16 %v7698_v24  ;;  %v1145_v63 = vsel %vm1130_vm8, %v6055_v41, %v6020_v19  ;;  %v9548_v60 = vunpack.i.h.bf16 %v7563_v36  ;;  %v6065_v11 = vunpack.i.l.bf16 %v6064_v5 }
 0x11e   : > { %v1311_v54 = vsel %vm1298_vm7, %v6050_v29, %v9546_v13  ;;  %v1312_v32 = vsel %vm1298_vm7, %v6051_v50, %v9547_v7  ;;  %v9549_v50 = vmul.bf16 %v7566_v23, %v7561_v10  ;;  %v6066_v29 = vunpack.i.h.bf16 %v6064_v5 }
 0x11f   : > { %v1146_v1 = vsel %vm1130_vm8, %v6056_v44, %v9548_v60  ;;  %v6071_v27 = vunpack.i.h.bf16 %v6069_v25  ;;  %v6070_v22 = vunpack.i.l.bf16 %v6069_v25  ;;  %v1385_v62 = vmul.bf16 %v7617_v42, %v1322_v20 }
 0x120   : > { %2275 = vmatprep.subr.bf16.mxu0 %v9549_v50  ;;  %v1384_v6 = vmul.bf16 %v7630_v12, %v1321_v61  ;;  %v9550_v17 = vunpack.i.l.bf16 %v6872_v30  ;;  %v9551_v19 = vunpack.i.h.bf16 %v6872_v30  ;;  %v9552_v23 = vunpack.i.l.bf16 %v6894_v9 }
 0x121   : > { %v9553_v3 = vunpack.i.h.bf16 %v6894_v9  ;;  %v1317_v20 = vpack.c.bf16 %v1300_v56, %v1299_v40  ;;  %v9554_v13 = vunpack.i.l.bf16 %v7536_v58  ;;  %v9555_v5 = vunpack.i.l.bf16 %v6975_v48  ;;  %2276 = vmatpush2.bf16.msra.mxu0 %v1046_v45  ;;  %2373 = vmatprep.subr.bf16.mxu1 %v1385_v62 }
 0x122   : > { %v1637_v36 = vsel %vm1634_vm2, %v9550_v17, %v6065_v11  ;;  %v1638_v24 = vsel %vm1634_vm2, %v9551_v19, %v6066_v29  ;;  %v1649_v43 = vsel %vm1634_vm2, %v6065_v11, %v9552_v23  ;;  %v9556_v60 = vunpack.i.h.bf16 %v7536_v58  ;;  %2277 = vmatprep.subr.bf16.mxu0 %v1043_v33  ;;  %2374 = vmatpush2.bf16.msra.mxu1 %v1384_v6 }
 0x123   : > { %v1650_v61 = vsel %vm1634_vm2, %v6066_v29, %v9553_v3  ;;  %v1133_v7 = vsel %vm1130_vm8, %v9554_v13, %v6055_v41  ;;  %v1657_v30 = vpack.c.bf16 %v1638_v24, %v1637_v36  ;;  %v1647_v25 = vsel %vm1634_vm2, %v6070_v22, %v9555_v5 }
 0x124   : > { %v1134_v9 = vsel %vm1130_vm8, %v9556_v60, %v6056_v44  ;;  %v9557_v50 = vunpack.i.h.bf16 %v6975_v48  ;;  %v1318_v40 = vpack.c.bf16 %v1312_v32, %v1311_v54  ;;  %v1143_v41 = vsel %vm1130_vm8, %v6060_v47, %v6040_v8 }
 0x125   : > { %v1144_v58 = vsel %vm1130_vm8, %v6061_v52, %v6041_v51  ;;  %v1154_v45 = vpack.c.bf16 %v1146_v1, %v1145_v63  ;;  %v1658_v44 = vpack.c.bf16 %v1650_v61, %v1649_v43  ;;  %v9558_v48 = vunpack.i.l.bf16 %v6944_v59  ;;  %2278 = vmatpush2.bf16.msra.mxu0 %v1042_v21 }
 0x126   : > { %v1648_v56 = vsel %vm1634_vm2, %v6071_v27, %v9557_v50  ;;  %v9559_v33 = vunpack.i.h.bf16 %v6944_v59  ;;  %v1381_v8 = vmul.bf16 %v7617_v42, %v1318_v40  ;;  %v1153_v32 = vpack.c.bf16 %v1134_v9, %v1133_v7  ;;  %v6397_v59 = vld [vmem:[%s9348_s2 + $0x1c] ss:$12 sps:$4 sm:$0xff]   ;;  %v2459_v9 = vld [vmem:[%s6568_s23] sm:$0xff] }
 0x127   : > { %v1635_v29 = vsel %vm1634_vm2, %v9558_v48, %v6070_v22  ;;  %v1654_v51 = vpack.c.bf16 %v1648_v56, %v1647_v25  ;;  %v1380_v63 = vmul.bf16 %v7630_v12, %v1317_v20  ;;  %v1721_v1 = vmul.bf16 %v7710_v39, %v1658_v44  ;;  %v2460_v48 = vld [vmem:[%s6568_s23 + $0x8] sm:$0xff] }
 0x128   : > { %v1636_v54 = vsel %vm1634_vm2, %v9559_v33, %v6071_v27  ;;  %v1720_v11 = vmul.bf16 %v7720_v53, %v1657_v30  ;;  %v9560_v27 = vunpack.i.l.bf16 %v7610_v18  ;;  %v9561_v22 = vunpack.i.h.bf16 %v7610_v18  ;;  %2375 = vmatprep.subr.bf16.mxu1 %v1381_v8  ;;  %2280 = vmatmul.mubr.bf16.vlgmr.msra.gmra.mxu0 %v6394_v2  ;;  %v2464_v33 = vld [vmem:[%s6568_s23 + $0x28] sm:$0xff] }
 0x129   : > { %v1217_v12 = vmul.bf16 %v7707_v4, %v1154_v45  ;;  %v1150_v62 = vpack.c.bf16 %v1144_v58, %v1143_v41  ;;  %v1653_v6 = vpack.c.bf16 %v1636_v54, %v1635_v29  ;;  %2376 = vmatpush2.bf16.msra.mxu1 %v1380_v63  ;;  %2418 = vmatprep.subr.bf16.mxu0 %v1721_v1  ;;  %v9568_v61 = vmov 0   ;;  %v2463_v41 = vld [vmem:[%s6568_s23 + $0x20] sm:$0xff] }
 0x12a   : > { %v1131_v42 = vsel %vm1130_vm8, %v9560_v27, %v6060_v47  ;;  %v1132_v21 = vsel %vm1130_vm8, %v9561_v22, %v6061_v52  ;;  %v1029_v17 = vpack.i.b16 %v7734_v16, %v7734_v16  ;;  %v1717_v36 = vmul.bf16 %v7710_v39, %v1654_v51  ;;  %2419 = vmatpush1.bf16.msra.mxu0 %v1720_v11  ;;  %v2467_v11 = vld [vmem:[%s6568_s23 + $0x40] sm:$0xff] }
 0x12b   : > { %2377 = vmatprep.subr.bf16.mxu1 %v1217_v12  ;;  %v7831_v18 = vpack.c.bf16 %v6586_v15, %v6584_v14  ;;  %v1041_v52 = vrot.slane %v1036_v0, %v6768_v57  ;;  %v1149_v47 = vpack.c.bf16 %v1132_v21, %v1131_v42  ;;  %v1216_v19 = vmul.bf16 %v7713_v26, %v1153_v32  ;;  %v6399_v15 = vld [vmem:[%s9348_s2 + $0x18] ss:$12 sps:$4 sm:$0xff]   ;;  %v2468_v42 = vld [vmem:[%s6568_s23 + $0x48] sm:$0xff] }
 0x12c   : > { %2289 = vmatprep.mubr.bf16.mxu0 %v6397_v59  ;;  %v1213_v24 = vmul.bf16 %v7707_v4, %v1150_v62  ;;  %2420 = vmatprep.subr.bf16.mxu0 %v1717_v36  ;;  %v1716_v16 = vmul.bf16 %v7720_v53, %v1653_v6  ;;  %v7839_v39 = vpack.c.bf16 %v6648_v35, %v6642_v34  ;;  %v9565_v35 = vld [vmem:[#allocation4_spill] sm:$0xff]  ;;  %v9566_v53 = vld [vmem:[#allocation5_spill] sm:$0xff] }
 0x12d   : > { %9562 = vst [vmem:[#allocation12_spill] sm:$0xff] %v7831_v18  ;;  %2378 = vmatpush2.bf16.msra.mxu1 %v1216_v19  ;;  %v1034_v14 = vrot.slane %v1029_v17, %v6768_v57  ;;  %v1049_v0 = vmul.bf16 %v1041_v52, %v7831_v18  ;;  %v7848_v4 = vpack.c.bf16 %v6635_v31, %v6624_v28  ;;  %v6505_v31 = vld [vmem:[%s9348_s2 + $0x8] ss:$12 sps:$4 sm:$0xff]   ;;  %v2471_v6 = vld [vmem:[%s6568_s23 + $0x60] sm:$0xff] }
 0x12e   : > { %9563 = vst [vmem:[#allocation13_spill] sm:$0xff] %v7839_v39  ;;  %2379 = vmatprep.subr.bf16.mxu1 %v1213_v24  ;;  %v1212_v23 = vmul.bf16 %v7713_v26, %v1149_v47  ;;  %2421 = vmatpush1.bf16.msra.mxu0 %v1716_v16  ;;  %v7854_v43 = vpack.c.bf16 %v9566_v53, %v9565_v35  ;;  %v9569_v26 = vld [vmem:[#allocation7_spill] sm:$0xff] }
 0x12f   : > { %9564 = vst [vmem:[#allocation14_spill] sm:$0xff] %v7848_v4  ;;  %v1048_v34 = vmul.bf16 %v1034_v14, %v7839_v39  ;;  %v1045_v3 = vmul.bf16 %v1041_v52, %v7848_v4  ;;  %v2472_v52 = vld [vmem:[%s6568_s23 + $0x68] sm:$0xff] }
 0x130   : > { %9567 = vst [vmem:[#allocation4_spill] sm:$0xff] %v7854_v43  ;;  %2290 = vmatmul.mubr.bf16.gmra.mxu0 %v6399_v15  ;;  %v1044_v28 = vmul.bf16 %v1034_v14, %v7854_v43 }
 0x131   : > { %2380 = vmatpush2.bf16.msra.mxu1 %v1212_v23  ;;  %2438 = vmatprep.mubr.bf16.mxu0 %v9568_v61  ;;  %v2461_v23 = vld [vmem:[%s6568_s23 + $0x10] sm:$0xff] }
 0x132   : > { %2381 = vmatprep.subr.bf16.mxu1 %v1049_v0 }
 0x135   : > { %2382 = vmatpush2.bf16.msra.mxu1 %v1048_v34 }
 0x136   : > { %2383 = vmatprep.subr.bf16.mxu1 %v1045_v3 }
 0x138   : > { %5463 = vmatmul.mubr.msk.bf16.vlgmr.msra.gmra.mxu0 %vm2240_vm4, %v6505_v31  ;;  %v2462_v31 = vld [vmem:[%s6568_s23 + $0x18] sm:$0xff] }
 0x139   : > { %2384 = vmatpush2.bf16.msra.mxu1 %v1044_v28  ;;  %2448 = vmatprep.mubr.bf16.mxu0 %v9568_v61 }
 0x13c   : > { %2386 = vmatmul.mubr.bf16.vlgmr.msra.gmra.mxu1 %v6394_v2 }
 0x13d   : > { %2395 = vmatprep.mubr.bf16.mxu1 %v6397_v59 }
 0x140   : > { %5464 = vmatmul.mubr.msk.bf16.gmra.mxu0 %vm2240_vm4, %v9569_v26 }
 0x141   : > { %4562 = vmatprep.mubr.bf16.mxu0 %v9568_v61 }
 0x144   : > { %2396 = vmatmul.mubr.bf16.gmra.mxu1 %v6399_v15 }
 0x181   : > { %v2334_v20 = vpop.f32.mrf.mxu1 }
 0x183   : > { %v2336_v13 = vpop.f32.mrf.mxu1 }
 0x185   : > { %v2338_v7 = vpop.f32.mrf.mxu1 }
 0x187   : > { %v2340_v30 = vpop.f32.mrf.mxu1 }
 0x189   : > { %v2344_v25 = vpop.f32.mrf.mxu1 }
 0x18b   : > { %v2346_v58 = vpop.f32.mrf.mxu1 }
 0x18d   : > { %v2348_v51 = vpop.f32.mrf.mxu1 }
 0x18f   : > { %v2350_v21 = vpop.f32.mrf.mxu1 }
 0x1e8   : > { %v2281_v5 = vpop.f32.mrf.mxu0 }
 0x1e9   : > { %v2335_v60 = vadd.f32 %v2334_v20, %v2281_v5 }
 0x1ea   : > { %v2283_v50 = vpop.f32.mrf.mxu0 }
 0x1eb   : > { %v2475_v56 = vadd.f32 %v2459_v9, %v2335_v60  ;;  %v2337_v45 = vadd.f32 %v2336_v13, %v2283_v50 }
 0x1ec   : > { %v2285_v40 = vpop.f32.mrf.mxu0 }
 0x1ed   : > { %v2339_v44 = vadd.f32 %v2338_v7, %v2285_v40  ;;  %6441 = vtanh.f32 %v2475_v56  ;;  %v2476_v32 = vadd.f32 %v2460_v48, %v2337_v45  ;;  %v2466_v56 = vld [vmem:[%s6568_s23 + $0x38] sm:$0xff] }
 0x1ee   : > { %v2287_v29 = vpop.f32.mrf.mxu0 }
 0x1ef   : > { %v2479_v54 = vadd.f32 %v2463_v41, %v2339_v44  ;;  %v2341_v8 = vadd.f32 %v2340_v30, %v2287_v29  ;;  %v2465_v30 = vld [vmem:[%s6568_s23 + $0x30] sm:$0xff] }
 0x1f0   : > { %v2291_v2 = vpop.f32.mrf.mxu0 }
 0x1f1   : > { %6443 = vtanh.f32 %v2479_v54  ;;  %v2480_v63 = vadd.f32 %v2464_v33, %v2341_v8  ;;  %v2345_v1 = vadd.f32 %v2344_v25, %v2291_v2  ;;  %v2469_v54 = vld [vmem:[%s6568_s23 + $0x50] sm:$0xff] }
 0x1f2   : > { %v2293_v59 = vpop.f32.mrf.mxu0 }
 0x1f3   : > { %6445 = vtanh.f32 %v2480_v63  ;;  %v2347_v27 = vadd.f32 %v2346_v58, %v2293_v59  ;;  %v2483_v12 = vadd.f32 %v2467_v11, %v2345_v1 }
 0x1f4   : > { %v2295_v22 = vpop.f32.mrf.mxu0  ;;  %6447 = vtanh.f32 %v2476_v32  ;;  %v2470_v32 = vld [vmem:[%s6568_s23 + $0x58] sm:$0xff] }
 0x1f5   : > { %v2349_v62 = vadd.f32 %v2348_v51, %v2295_v22  ;;  %v2484_v17 = vadd.f32 %v2468_v42, %v2347_v27  ;;  %6449 = vtanh.f32 %v2483_v12  ;;  %v2473_v42 = vld [vmem:[%s6568_s23 + $0x70] sm:$0xff] }
 0x1f6   : > { %v2297_v36 = vpop.f32.mrf.mxu0 }
 0x1f7   : > { %v2351_v47 = vadd.f32 %v2350_v21, %v2297_v36  ;;  %v2487_v19 = vadd.f32 %v2471_v6, %v2349_v62  ;;  %6451 = vtanh.f32 %v2484_v17  ;;  %v2474_v6 = vld [vmem:[%s6568_s23 + $0x78] sm:$0xff] }
 0x1f8   : > { %v2440_v24 = vpop.f32.mrf.mxu0 }
 0x1f9   : > { %v2488_v16 = vadd.f32 %v2472_v52, %v2351_v47 }
 0x1fa   : > { %v2442_v15 = vpop.f32.mrf.mxu0  ;;  %v7876_v53 = vpop.eup %6441 }
 0x1fb   : > { %6453 = vtanh.f32 %v2488_v16 }
 0x1fc   : > { %v2387_v14 = vpop.f32.mrf.mxu1  ;;  %6455 = vtanh.f32 %v2487_v19  ;;  %v2444_v35 = vpop.f32.mrf.mxu0 }
 0x1fd   : > { %v2441_v0 = vadd.f32 %v2440_v24, %v2387_v14 }
 0x1fe   : > { %v2389_v34 = vpop.f32.mrf.mxu1  ;;  %v7878_v28 = vpop.eup %6443 }
 0x1ff   : > { %v2443_v3 = vadd.f32 %v2442_v15, %v2389_v34  ;;  %v2446_v20 = vpop.f32.mrf.mxu0  ;;  %v7883_v13 = vpack.i.bf16 %v7878_v28, %v7876_v53  ;;  %v2477_v7 = vadd.f32 %v2461_v23, %v2441_v0 }
 0x200   : > { %v2391_v26 = vpop.f32.mrf.mxu1  ;;  %v6446_v5 = vpop.eup %6445 }
 0x201   : > { %v2445_v25 = vadd.f32 %v2444_v35, %v2391_v26  ;;  %v2450_v9 = vpop.f32.mrf.mxu0  ;;  %6078 = vrot.lane.b32.xlu0 %v7883_v13, %s6515_s25  ;;  %6073 = vrot.lane.b32.xlu1 %v7883_v13, %s6514_s24  ;;  %v2478_v50 = vadd.f32 %v2462_v31, %v2443_v3  ;;  %v6448_v40 = vpop.eup %6447  ;;  %6457 = vtanh.f32 %v2477_v7  ;;  %v7931_v26 = vpack.c.bf16 %v7878_v28, %v7876_v53 }
 0x202   : > { %v2393_v60 = vpop.f32.mrf.mxu1  ;;  %v7891_v29 = vpack.i.bf16 %v6446_v5, %v6448_v40  ;;  %v6450_v63 = vpop.eup %6449  ;;  %v7917_v15 = vpack.c.bf16 %v6446_v5, %v6448_v40 }
 0x203   : > { %v2481_v41 = vadd.f32 %v2465_v30, %v2445_v25  ;;  %v2447_v58 = vadd.f32 %v2446_v20, %v2393_v60  ;;  %v2452_v44 = vpop.f32.mrf.mxu0  ;;  %9573 = vst [vmem:[#allocation16_spill] sm:$0xff] %v7931_v26 }
 0x204   : > { %v2397_v45 = vpop.f32.mrf.mxu1  ;;  %v6452_v59 = vpop.eup %6451  ;;  %9572 = vst [vmem:[#allocation15_spill] sm:$0xff] %v7917_v15 }
 0x205   : > { %v2451_v48 = vadd.f32 %v2450_v9, %v2397_v45  ;;  %6459 = vtanh.f32 %v2481_v41  ;;  %v2482_v33 = vadd.f32 %v2466_v56, %v2447_v58  ;;  %v2454_v2 = vpop.f32.mrf.mxu0  ;;  %6088 = vrot.lane.b32.xlu0 %v7883_v13, %s6518_s27  ;;  %6083 = vrot.lane.b32.xlu1 %v7883_v13, %s6516_s26  ;;  %v5513_v41 = vld.sshfl [vmem:[%s9347_s1 + $0x10] sm:$0x33 pattern:$0x75316420] }
 0x206   : > { %v2399_v8 = vpop.f32.mrf.mxu1  ;;  %6461 = vtanh.f32 %v2478_v50 }
 0x207   : > { %v2453_v51 = vadd.f32 %v2452_v44, %v2399_v8  ;;  %6463 = vtanh.f32 %v2482_v33  ;;  %v2456_v11 = vpop.f32.mrf.mxu0  ;;  %v2485_v27 = vadd.f32 %v2469_v54, %v2451_v48  ;;  %v3236_v44 = vcombine.high %v5513_v41, %v5513_v41  ;;  %v5493_v48 = vld.sshfl [vmem:[%s9347_s1 + $0x8] sm:$0x33 pattern:$0x75316420] }
 0x208   : > { %v2401_v1 = vpop.f32.mrf.mxu1  ;;  %v6454_v22 = vpop.eup %6453  ;;  %v8048_v33 = vrot.slane %v5513_v41, %v6741_v46 }
 0x209   : > { %v2486_v21 = vadd.f32 %v2470_v32, %v2453_v51  ;;  %v2455_v12 = vadd.f32 %v2454_v2, %v2401_v1  ;;  %v6456_v17 = vpop.eup %6455  ;;  %6093 = vrot.lane.b32.xlu0 %v7883_v13, %s6519_s28  ;;  %6103 = vrot.lane.b32.xlu1 %v7891_v29, %s6515_s25  ;;  %6465 = vtanh.f32 %v2485_v27  ;;  %v7905_v19 = vpack.i.bf16 %v6454_v22, %v6452_v59  ;;  %v8057_v51 = vld.sshfl [vmem:[%s9347_s1] sm:$0x33 pattern:$0x75316420] }
 0x20a   : > { %v2403_v62 = vpop.f32.mrf.mxu1  ;;  %v7907_v24 = vpack.i.bf16 %v6456_v17, %v6450_v63  ;;  %v7913_v16 = vpack.c.bf16 %v6454_v22, %v6452_v59  ;;  %v7915_v14 = vpack.c.bf16 %v6456_v17, %v6450_v63  ;;  %9579 = vst [vmem:[#allocation22_spill] sm:$0xff] %v8048_v33  ;;  %v8060_v32 = vrot.slane %v3236_v44, %v6741_v46  ;;  %v8065_v63 = vld [vmem:[%s9348_s2 + $0x4] ss:$12 sps:$4 sm:$0xff]  }
 0x20b   : > { %v2457_v36 = vadd.f32 %v2456_v11, %v2403_v62  ;;  %v2489_v52 = vadd.f32 %v2473_v42, %v2455_v12  ;;  %6467 = vtanh.f32 %v2486_v21  ;;  %9581 = vst [vmem:[#allocation24_spill] sm:$0xff] %v8065_v63  ;;  %v5553_v1 = vld.sshfl [vmem:[%s9347_s1 + $0x20] sm:$0x33 pattern:$0x75316420]  ;;  %v2960_v11 = vcombine.high %v5493_v48, %v5493_v48  ;;  %4509 = vmatprep.mubr.bf16.mxu1 %v8065_v63 }
 0x20c   : > { %9570 = vst [vmem:[#allocation5_spill] sm:$0xff] %v7913_v16  ;;  %9571 = vst [vmem:[#allocation7_spill] sm:$0xff] %v7915_v14  ;;  %v2628_v27 = vcombine.high %v8057_v51, %v8057_v51  ;;  %v3254_v42 = vpack.i.b16 %v8048_v33, %v8048_v33  ;;  %v8085_v62 = vrot.slane %v5553_v1, %v6741_v46 }
 0x20d   : > { %v2490_v47 = vadd.f32 %v2474_v6, %v2457_v36  ;;  %6113 = vrot.lane.b32.xlu1 %v7891_v29, %s6518_s27  ;;  %6098 = vrot.lane.b32.xlu0 %v7891_v29, %s6514_s24  ;;  %9580 = vst [vmem:[#allocation23_spill] sm:$0xff] %v8060_v32  ;;  %v3261_v6 = vpack.i.b16 %v8060_v32, %v8060_v32 }
 0x20e   : > { %v6458_v0 = vpop.eup %6457  ;;  %9583 = vst [vmem:[#allocation26_spill] sm:$0xff] %v8085_v62 }
 0x20f   : > { %6469 = vtanh.f32 %v2490_v47 }
 0x210   : > { %6471 = vtanh.f32 %v2489_v52 }
 0x211   : > { %6118 = vrot.lane.b32.xlu1 %v7891_v29, %s6519_s28  ;;  %6108 = vrot.lane.b32.xlu0 %v7891_v29, %s6516_s26 }
 0x212   : > { %v6460_v23 = vpop.eup %6459 }
 0x213   : > { %v6462_v34 = vpop.eup %6461  ;;  %v6302_v3 = vpack.i.bf16 %v6460_v23, %v6458_v0  ;;  %v7935_v7 = vpack.c.bf16 %v6460_v23, %v6458_v0  ;;  %v2974_v0 = vrot.slane %v2960_v11, %v6741_v46 }
 0x214   : > { %v6464_v35 = vpop.eup %6463 }
 0x215   : > { %6133 = vrot.lane.b32.xlu1 %v7907_v24, %s6516_s26  ;;  %6123 = vrot.lane.b32.xlu0 %v7907_v24, %s6514_s24  ;;  %v7927_v31 = vpack.i.bf16 %v6464_v35, %v6462_v34  ;;  %v7933_v20 = vpack.c.bf16 %v6464_v35, %v6462_v34  ;;  %9575 = vst [vmem:[#allocation18_spill] sm:$0xff] %v7935_v7 }
 0x216   : > { %v6466_v30 = vpop.eup %6465  ;;  %v2985_v11 = vpack.i.b16 %v2974_v0, %v2974_v0 }
 0x217   : > { %9574 = vst [vmem:[#allocation17_spill] sm:$0xff] %v7933_v20 }
 0x218   : > { %v6468_v5 = vpop.eup %6467 }
 0x219   : > { %6128 = vrot.lane.b32.xlu0 %v7907_v24, %s6515_s25  ;;  %6148 = vrot.lane.b32.xlu1 %v7905_v19, %s6514_s24 }
 0x21c   : > { %v6470_v25 = vpop.eup %6469 }
 0x21d   : > { %v6472_v60 = vpop.eup %6471  ;;  %6138 = vrot.lane.b32.xlu0 %v7907_v24, %s6518_s27  ;;  %6153 = vrot.lane.b32.xlu1 %v7905_v19, %s6515_s25  ;;  %v7945_v53 = vpack.i.bf16 %v6470_v25, %v6468_v5  ;;  %v7947_v28 = vpack.c.bf16 %v6470_v25, %v6468_v5 }
 0x21e   : > { %v7949_v9 = vpack.c.bf16 %v6472_v60, %v6466_v30  ;;  %v6212_v50 = vpack.i.bf16 %v6472_v60, %v6466_v30  ;;  %v3918_v60 = vpack.i.b16 %v8085_v62, %v8085_v62 }
 0x21f   : > { %9576 = vst [vmem:[#allocation19_spill] sm:$0xff] %v7947_v28 }
 0x220   : > { %9577 = vst [vmem:[#allocation20_spill] sm:$0xff] %v7949_v9 }
 0x221   : > { %6143 = vrot.lane.b32.xlu0 %v7907_v24, %s6519_s28  ;;  %6163 = vrot.lane.b32.xlu1 %v7905_v19, %s6518_s27 }
 0x225   : > { %6158 = vrot.lane.b32.xlu0 %v7905_v19, %s6516_s26  ;;  %6168 = vrot.lane.b32.xlu1 %v7905_v19, %s6519_s28 }
 0x229   : > { %6178 = vrot.lane.b32.xlu0 %v6302_v3, %s6514_s24  ;;  %6173 = vrot.lane.b32.xlu1 %v6302_v3, %s6516_s26 }
 0x22d   : > { %6183 = vrot.lane.b32.xlu0 %v6302_v3, %s6515_s25  ;;  %6188 = vrot.lane.b32.xlu1 %v7927_v31, %s6514_s24 }
 0x231   : > { %6193 = vrot.lane.b32.xlu0 %v7927_v31, %s6515_s25  ;;  %6198 = vrot.lane.b32.xlu1 %v7927_v31, %s6518_s27 }
 0x235   : > { %6213 = vrot.lane.b32.xlu0 %v6212_v50, %s6514_s24  ;;  %6203 = vrot.lane.b32.xlu1 %v7927_v31, %s6519_s28 }
 0x239   : > { %6218 = vrot.lane.b32.xlu0 %v6212_v50, %s6515_s25  ;;  %6208 = vrot.lane.b32.xlu1 %v6212_v50, %s6516_s26 }
 0x23d   : > { %6223 = vrot.lane.b32.xlu0 %v7945_v53, %s6514_s24  ;;  %6233 = vrot.lane.b32.xlu1 %v7905_v19, %s6520_s29 }
 0x241   : > { %6228 = vrot.lane.b32.xlu0 %v6212_v50, %s6518_s27  ;;  %6248 = vrot.lane.b32.xlu1 %v7907_v24, %s6520_s29 }
 0x245   : > { %6238 = vrot.lane.b32.xlu0 %v7945_v53, %s6515_s25  ;;  %6258 = vrot.lane.b32.xlu1 %v7891_v29, %s6520_s29 }
 0x249   : > { %6243 = vrot.lane.b32.xlu0 %v6212_v50, %s6520_s29  ;;  %6268 = vrot.lane.b32.xlu1 %v7883_v13, %s6520_s29 }
 0x24d   : > { %6253 = vrot.lane.b32.xlu0 %v6302_v3, %s6518_s27  ;;  %6278 = vrot.lane.b32.xlu1 %v7945_v53, %s6518_s27 }
 0x251   : > { %6263 = vrot.lane.b32.xlu0 %v6302_v3, %s6520_s29  ;;  %6283 = vrot.lane.b32.xlu1 %v7905_v19, %s6521_s30 }
 0x255   : > { %6273 = vrot.lane.b32.xlu0 %v6212_v50, %s6519_s28  ;;  %6293 = vrot.lane.b32.xlu1 %v7945_v53, %s6519_s28 }
 0x259   : > { %6288 = vrot.lane.b32.xlu0 %v6212_v50, %s6521_s30  ;;  %6298 = vrot.lane.b32.xlu1 %v7907_v24, %s6521_s30 }
 0x25d   : > { %6303 = vrot.lane.b32.xlu0 %v6302_v3, %s6519_s28  ;;  %6308 = vrot.lane.b32.xlu1 %v7891_v29, %s6521_s30 }
 0x261   : > { %6313 = vrot.lane.b32.xlu0 %v6302_v3, %s6521_s30  ;;  %6318 = vrot.lane.b32.xlu1 %v7883_v13, %s6521_s30 }
 0x265   : > { %6323 = vrot.lane.b32.xlu0 %v7905_v19, %s6523_s6  ;;  %6328 = vrot.lane.b32.xlu1 %v6212_v50, %s6523_s6  ;;  %v3900_v19 = vcombine.high %v5553_v1, %v5553_v1  ;;  %v8131_v50 = vrot.slane %v3261_v6, %v6768_v57 }
 0x267   : > { %9586 = vst [vmem:[#allocation29_spill] sm:$0xff] %v8131_v50  ;;  %v8138_v1 = vrot.slane %v3900_v19, %v6741_v46  ;;  %v2967_v19 = vrot.slane %v5493_v48, %v6741_v46  ;;  %v5543_v48 = vld.sshfl [vmem:[%s9347_s1 + $0x1c] sm:$0x33 pattern:$0x75316420] }
 0x268   : > { %v3734_v39 = vcombine.high %v5543_v48, %v5543_v48 }
 0x269   : > { %6338 = vrot.lane.b32.xlu0 %v7891_v29, %s6523_s6  ;;  %6333 = vrot.lane.b32.xlu1 %v7907_v24, %s6523_s6  ;;  %v5483_v29 = vld.sshfl [vmem:[%s9347_s1 + $0x4] sm:$0x33 pattern:$0x75316420]  ;;  %9587 = vst [vmem:[#allocation30_spill] sm:$0xff] %v8138_v1  ;;  %v2978_v33 = vpack.i.b16 %v2967_v19, %v2967_v19 }
 0x26a   : > { %v2794_v59 = vcombine.high %v5483_v29, %v5483_v29  ;;  %v2801_v4 = vrot.slane %v5483_v29, %v6741_v46 }
 0x26c   : > { %v8098_v23 = vrot.slane %v2794_v59, %v6741_v46  ;;  %v2809_v29 = vcombine.high %v2801_v4, %v2801_v4  ;;  %v2812_v14 = vpack.i.b16 %v2801_v4, %v2801_v4 }
 0x26d   : > { %6348 = vrot.lane.b32.xlu0 %v7945_v53, %s6520_s29  ;;  %6343 = vrot.lane.b32.xlu1 %v6302_v3, %s6523_s6  ;;  %v8117_v3 = vrot.slane %v2628_v27, %v6741_v46 }
 0x26e   : > { %v2819_v27 = vpack.i.b16 %v8098_v23, %v8098_v23  ;;  %v2826_v16 = vpack.i.b16 %v2809_v29, %v2809_v29 }
 0x271   : > { %6353 = vrot.lane.b32.xlu0 %v7927_v31, %s6520_s29  ;;  %6358 = vrot.lane.b32.xlu1 %v7883_v13, %s6523_s6  ;;  %v5503_v13 = vld.sshfl [vmem:[%s9347_s1 + $0xc] sm:$0x33 pattern:$0x75316420] }
 0x272   : > { %v3126_v2 = vcombine.high %v5503_v13, %v5503_v13  ;;  %v8094_v24 = vrot.slane %v5503_v13, %v6741_v46 }
 0x273   : > { %v8019_v56 = vpop.permute.xlu0 %6078  ;;  %v8021_v40 = vpop.permute.xlu1 %6073 }
 0x274   : > { %v3140_v12 = vrot.slane %v3126_v2, %v6741_v46  ;;  %v3141_v59 = vcombine.high %v8094_v24, %v8094_v24  ;;  %v9451_v50 = vunpack.i.h.bf16 %v8019_v56  ;;  %v9455_v15 = vunpack.i.h.bf16 %v8021_v40 }
 0x275   : > { %6363 = vrot.lane.b32.xlu0 %v7945_v53, %s6521_s30  ;;  %6368 = vrot.lane.b32.xlu1 %v7927_v31, %s6521_s30 }
 0x276   : > { %v3151_v25 = vpack.i.b16 %v3140_v12, %v3140_v12  ;;  %v3158_v43 = vpack.i.b16 %v3141_v59, %v3141_v59  ;;  %v2976_v59 = vcombine.high %v2974_v0, %v2974_v0  ;;  %v3144_v0 = vpack.i.b16 %v8094_v24, %v8094_v24 }
 0x277   : > { %v8030_v58 = vpop.permute.xlu0 %6088  ;;  %v8032_v45 = vpop.permute.xlu1 %6083 }
 0x278   : > { %9578 = vst [vmem:[#allocation21_spill] sm:$0xff] %v8032_v45  ;;  %v9417_v17 = vunpack.i.h.bf16 %v8030_v58  ;;  %v9414_v36 = vunpack.i.l.bf16 %v8030_v58  ;;  %v8213_v20 = vrot.slane %v3158_v43, %v6768_v57  ;;  %v2999_v32 = vpack.i.b16 %v2976_v59, %v2976_v59 }
 0x279   : > { %6373 = vrot.lane.b32.xlu0 %v7945_v53, %s6523_s6  ;;  %6378 = vrot.lane.b32.xlu1 %v7927_v31, %s6523_s6  ;;  %v8244_v4 = vrot.slane %v3144_v0, %v6768_v57 }
 0x27a   : > { %v8263_v59 = vrot.slane %v2999_v32, %v6768_v57 }
 0x27b   : > { %v8050_v54 = vpop.permute.xlu0 %6093  ;;  %v8052_v8 = vpop.permute.xlu1 %6103 }
 0x27c   : > { %v9416_v41 = vunpack.i.h.bf16 %v8050_v54  ;;  %v9419_v44 = vunpack.i.l.bf16 %v8050_v54  ;;  %9594 = vst [vmem:[#allocation36_spill] sm:$0xff] %v8263_v59 }
 0x27d   : > { %6383 = vrot.lane.b32.xlu0 %v7945_v53, %s6516_s26  ;;  %6388 = vrot.lane.b32.xlu1 %v7927_v31, %s6516_s26  ;;  %v8120_v31 = vrot.slane %v3254_v42, %v6768_v57  ;;  %v3142_v53 = vcombine.high %v3140_v12, %v3140_v12 }
 0x27f   : > { %v8079_v22 = vpop.permute.xlu1 %6113  ;;  %v8081_v21 = vpop.permute.xlu0 %6098  ;;  %9584 = vst [vmem:[#allocation27_spill] sm:$0xff] %v8120_v31 }
 0x280   : > { %9582 = vst [vmem:[#allocation25_spill] sm:$0xff] %v8079_v22  ;;  %v9413_v52 = vunpack.i.h.bf16 %v8079_v22  ;;  %v9412_v47 = vunpack.i.l.bf16 %v8079_v22  ;;  %v9606_v62 = vunpack.i.h.bf16 %v8081_v21  ;;  %v9635_v22 = vunpack.i.h.bf16 %v8081_v21 }
 0x282   : > { %v8106_v34 = vsel %vm515_vm3, %v9417_v17, %v9413_v52  ;;  %v8114_v35 = vsel %vm515_vm3, %v9414_v36, %v9412_v47  ;;  %v2653_v47 = vpack.i.b16 %v8117_v3, %v8117_v3  ;;  %v8173_v17 = vrot.slane %v3918_v60, %v6768_v57 }
 0x283   : > { %v8122_v30 = vpop.permute.xlu1 %6118  ;;  %v8124_v5 = vpop.permute.xlu0 %6108  ;;  %v2975_v60 = vcombine.high %v2967_v19, %v2967_v19 }
 0x284   : > { %9585 = vst [vmem:[#allocation28_spill] sm:$0xff] %v8122_v30  ;;  %v9415_v13 = vunpack.i.h.bf16 %v8122_v30  ;;  %v9418_v2 = vunpack.i.l.bf16 %v8122_v30  ;;  %v8189_v55 = vrot.slane %v2653_v47, %v6768_v57  ;;  %v9608_v30 = vunpack.i.l.bf16 %v8021_v40 }
 0x285   : > { %v2992_v28 = vpack.i.b16 %v2975_v60, %v2975_v60  ;;  %v2644_v60 = vcombine.high %v8117_v3, %v8117_v3 }
 0x286   : > { %v8150_v42 = vsel %vm348_vm5, %v9416_v41, %v9415_v13  ;;  %v8158_v6 = vsel %vm348_vm5, %v9419_v44, %v9418_v2  ;;  %v8170_v41 = vrot.slane %v3151_v25, %v6768_v57  ;;  %v3925_v44 = vpack.i.b16 %v8138_v1, %v8138_v1 }
 0x287   : > { %v8163_v52 = vpop.permute.xlu1 %6133  ;;  %v8165_v36 = vpop.permute.xlu0 %6123  ;;  %v8183_v13 = vrot.slane %v2985_v11, %v6768_v57  ;;  %v8186_v25 = vrot.slane %v2819_v27, %v6768_v57  ;;  %v2635_v11 = vrot.slane %v8057_v51, %v6741_v46  ;;  %v5533_v27 = vld.sshfl [vmem:[%s9347_s1 + $0x18] sm:$0x33 pattern:$0x75316420]  ;;  %v3165_v51 = vpack.i.b16 %v3142_v53, %v3142_v53 }
 0x288   : > { %9588 = vst [vmem:[#allocation31_spill] sm:$0xff] %v8163_v52  ;;  %v9441_v47 = vunpack.i.h.bf16 %v8165_v36  ;;  %v8208_v7 = vrot.slane %v3925_v44, %v6768_v57  ;;  %v9589_v9 = vunpack.i.l.bf16 %v8165_v36  ;;  %v3568_v24 = vcombine.high %v5533_v27, %v5533_v27 }
 0x289   : > { %v2646_v31 = vpack.i.b16 %v2635_v11, %v2635_v11  ;;  %v8266_v29 = vrot.slane %v2992_v28, %v6768_v57 }
 0x28a   : > { %v8250_v19 = vrot.slane %v3568_v24, %v6741_v46 }
 0x28b   : > { %v8194_v2 = vpop.permute.xlu0 %6128  ;;  %v8196_v12 = vpop.permute.xlu1 %6148  ;;  %v8275_v0 = vrot.slane %v2646_v31, %v6768_v57 }
 0x28c   : > { %v9440_v18 = vunpack.i.h.bf16 %v8196_v12  ;;  %v9443_v38 = vunpack.i.l.bf16 %v8196_v12  ;;  %9591 = vst [vmem:[#allocation33_spill] sm:$0xff] %v8250_v19 }
 0x28d   : > { %9597 = vst [vmem:[#allocation39_spill] sm:$0xff] %v8275_v0 }
 0x28e   : > { %v3104_v37 = vsel %vm851_vm0, %v9441_v47, %v9440_v18  ;;  %v3103_v44 = vsel %vm851_vm0, %v9589_v9, %v9443_v38  ;;  %v3748_v18 = vrot.slane %v3734_v39, %v6741_v46  ;;  %v8233_v47 = vrot.slane %v5543_v48, %v6741_v46 }
 0x28f   : > { %v8227_v53 = vpop.permute.xlu0 %6138  ;;  %v8229_v43 = vpop.permute.xlu1 %6153  ;;  %v3114_v10 = vpack.c.bf16 %v3104_v37, %v3103_v44  ;;  %v2810_v9 = vcombine.high %v8098_v23, %v8098_v23  ;;  %v2643_v38 = vcombine.high %v2635_v11, %v2635_v11  ;;  %v5523_v37 = vld.sshfl [vmem:[%s9347_s1 + $0x14] sm:$0x33 pattern:$0x75316420]  ;;  %v8247_v39 = vrot.slane %v3165_v51, %v6768_v57 }
 0x290   : > { %9590 = vst [vmem:[#allocation32_spill] sm:$0xff] %v8227_v53  ;;  %v8260_v48 = vrot.slane %v2978_v33, %v6768_v57  ;;  %v8269_v11 = vrot.slane %v2812_v14, %v6768_v57  ;;  %v3402_v33 = vcombine.high %v5523_v37, %v5523_v37  ;;  %v2667_v44 = vpack.i.b16 %v2644_v60, %v2644_v60 }
 0x291   : > { %v3176_v26 = vmul.bf16 %v8170_v41, %v3114_v10  ;;  %v8253_v10 = vrot.slane %v5533_v27, %v6741_v46  ;;  %v8272_v27 = vrot.slane %v2826_v16, %v6768_v57  ;;  %v2833_v51 = vpack.i.b16 %v2810_v9, %v2810_v9 }
 0x292   : > { %9595 = vst [vmem:[#allocation37_spill] sm:$0xff] %v8269_v11  ;;  %v3759_v32 = vpack.i.b16 %v3748_v18, %v3748_v18  ;;  %v2660_v24 = vpack.i.b16 %v2643_v38, %v2643_v38  ;;  %v3593_v14 = vpack.i.b16 %v8250_v19, %v8250_v19  ;;  %v8296_v1 = vrot.slane %v3402_v33, %v6741_v46 }
 0x293   : > { %9592 = vst [vmem:[#allocation34_spill] sm:$0xff] %v8253_v10  ;;  %v8255_v23 = vpop.permute.xlu0 %6143  ;;  %v8257_v3 = vpop.permute.xlu1 %6163  ;;  %4477 = vmatprep.subr.bf16.mxu1 %v3176_v26  ;;  %9596 = vst [vmem:[#allocation38_spill] sm:$0xff] %v8272_v27  ;;  %v3752_v26 = vpack.i.b16 %v8233_v47, %v8233_v47  ;;  %v3586_v16 = vpack.i.b16 %v8253_v10, %v8253_v10  ;;  %v8299_v10 = vrot.slane %v5523_v37, %v6741_v46 }
 0x294   : > { %9593 = vst [vmem:[#allocation35_spill] sm:$0xff] %v8255_v23  ;;  %9599 = vst [vmem:[#allocation41_spill] sm:$0xff] %v8296_v1  ;;  %v9601_v19 = vunpack.i.h.bf16 %v8052_v8  ;;  %v9602_v33 = vunpack.i.l.bf16 %v8052_v8  ;;  %v9603_v46 = vunpack.i.l.bf16 %v8019_v56  ;;  %v8322_v9 = vrot.slane %v3759_v32, %v6768_v57 }
 0x295   : > { %9600 = vst [vmem:[#allocation42_spill] sm:$0xff] %v8299_v10  ;;  %v8325_v31 = vrot.slane %v3752_v26, %v6768_v57  ;;  %v9609_v32 = vunpack.i.h.bf16 %v8124_v5  ;;  %v9610_v26 = vunpack.i.h.bf16 %v8032_v45  ;;  %v8367_v27 = vrot.slane %v2667_v44, %v6768_v57 }
 0x296   : > { %v8311_v28 = vsel %vm683_vm1, %v9451_v50, %v9601_v19  ;;  %v8319_v37 = vsel %vm683_vm1, %v9603_v46, %v9602_v33  ;;  %9604 = vst [vmem:[#allocation43_spill] sm:$0xff] %v8322_v9  ;;  %v8333_v19 = vsel %vm851_vm0, %v9455_v15, %v9606_v62  ;;  %v9607_v50 = vunpack.i.l.bf16 %v8081_v21 }
 0x297   : > { %v8289_v60 = vpop.permute.xlu0 %6158  ;;  %v8291_v38 = vpop.permute.xlu1 %6168  ;;  %9605 = vst [vmem:[#allocation44_spill] sm:$0xff] %v8325_v31  ;;  %v8349_v46 = vsel %vm1634_vm2, %v9610_v26, %v9609_v32  ;;  %v9611_v31 = vunpack.i.l.bf16 %v8124_v5  ;;  %v9612_v62 = vunpack.i.l.bf16 %v8032_v45  ;;  %9615 = vst [vmem:[#allocation47_spill] sm:$0xff] %v8367_v27  ;;  %v8370_v32 = vrot.slane %v2660_v24, %v6768_v57 }
 0x298   : > { %9598 = vst [vmem:[#allocation40_spill] sm:$0xff] %v8291_v38  ;;  %v8341_v33 = vsel %vm851_vm0, %v9608_v30, %v9607_v50  ;;  %v8364_v50 = vrot.slane %v2833_v51, %v6768_v57  ;;  %v8373_v26 = vrot.slane %v3593_v14, %v6768_v57  ;;  %v8376_v45 = vrot.slane %v3586_v16, %v6768_v57 }
 0x299   : > { %v8357_v15 = vsel %vm1634_vm2, %v9612_v62, %v9611_v31  ;;  %9616 = vst [vmem:[#allocation48_spill] sm:$0xff] %v8370_v32  ;;  %v8382_v51 = vcombine.high %v3748_v18, %v3748_v18  ;;  %v3110_v24 = vpack.c.bf16 %v8333_v19, %v8341_v33  ;;  %v2944_v14 = vpack.c.bf16 %v8311_v28, %v8319_v37 }
 0x29a   : > { %9614 = vst [vmem:[#allocation46_spill] sm:$0xff] %v8364_v50  ;;  %9617 = vst [vmem:[#allocation49_spill] sm:$0xff] %v8373_v26  ;;  %v3883_v44 = vpack.c.bf16 %v8349_v46, %v8357_v15  ;;  %v8392_v16 = vcombine.high %v8233_v47, %v8233_v47  ;;  %v6161_v33 = vunpack.i.h.bf16 %v8289_v60  ;;  %v9620_v62 = vunpack.i.h.bf16 %v8229_v43 }
 0x29b   : > { %v8359_v9 = vpop.permute.xlu0 %6178  ;;  %v8361_v30 = vpop.permute.xlu1 %6173  ;;  %9618 = vst [vmem:[#allocation50_spill] sm:$0xff] %v8376_v45  ;;  %v9622_v28 = vunpack.i.l.bf16 %v8229_v43  ;;  %v9623_v37 = vunpack.i.l.bf16 %v8194_v2  ;;  %v9624_v46 = vunpack.i.h.bf16 %v8257_v3  ;;  %v9625_v47 = vunpack.i.h.bf16 %v8227_v53 }
 0x29c   : > { %9613 = vst [vmem:[#allocation45_spill] sm:$0xff] %v8361_v30  ;;  %9619 = vst [vmem:[#allocation51_spill] sm:$0xff] %v8392_v16  ;;  %v6181_v45 = vunpack.i.h.bf16 %v8359_v9  ;;  %v6180_v31 = vunpack.i.l.bf16 %v8359_v9  ;;  %v9621_v9 = vunpack.i.h.bf16 %v8194_v2  ;;  %v9626_v57 = vunpack.i.l.bf16 %v8257_v3 }
 0x29d   : > { %v2937_v10 = vsel %vm683_vm1, %v9623_v37, %v9622_v28  ;;  %v2772_v1 = vsel %vm515_vm3, %v9625_v47, %v9624_v46  ;;  %v9627_v32 = vunpack.i.l.bf16 %v8227_v53  ;;  %v9629_v28 = vunpack.i.l.bf16 %v8289_v60 }
 0x29e   : > { %v2938_v19 = vsel %vm683_vm1, %v9621_v9, %v9620_v62  ;;  %v9628_v9 = vunpack.i.h.bf16 %v8163_v52  ;;  %v9630_v37 = vunpack.i.l.bf16 %v8163_v52  ;;  %v9631_v47 = vunpack.i.h.bf16 %v8291_v38 }
 0x29f   : > { %v8398_v26 = vpop.permute.xlu0 %6183  ;;  %v8400_v15 = vpop.permute.xlu1 %6188  ;;  %v2771_v62 = vsel %vm515_vm3, %v9627_v32, %v9626_v57  ;;  %v9632_v46 = vunpack.i.h.bf16 %v8255_v23  ;;  %v9633_v57 = vunpack.i.l.bf16 %v8291_v38  ;;  %v9634_v32 = vunpack.i.l.bf16 %v8255_v23 }
 0x2a0   : > { %v3878_v27 = vsel %vm1634_vm2, %v9628_v9, %v6161_v33  ;;  %v3877_v0 = vsel %vm1634_vm2, %v9630_v37, %v9629_v28  ;;  %v3098_v52 = vsel %vm851_vm0, %v9635_v22, %v6181_v45  ;;  %v9636_v28 = vunpack.i.l.bf16 %v8081_v21 }
 0x2a1   : > { %v2606_v50 = vsel %vm348_vm5, %v9632_v46, %v9631_v47  ;;  %v2605_v9 = vsel %vm348_vm5, %v9634_v32, %v9633_v57  ;;  %v9637_v11 = vunpack.i.h.bf16 %v8361_v30  ;;  %v9638_v47 = vunpack.i.h.bf16 %v8124_v5 }
 0x2a2   : > { %v3097_v37 = vsel %vm851_vm0, %v9636_v28, %v6180_v31  ;;  %v9639_v38 = vunpack.i.l.bf16 %v8361_v30  ;;  %v9640_v57 = vunpack.i.l.bf16 %v8124_v5  ;;  %v6186_v22 = vunpack.i.h.bf16 %v8398_v26 }
 0x2a3   : > { %v8418_v16 = vpop.permute.xlu0 %6193  ;;  %v8420_v18 = vpop.permute.xlu1 %6198  ;;  %v3872_v46 = vsel %vm1634_vm2, %v9638_v47, %v9637_v11  ;;  %v2948_v63 = vpack.c.bf16 %v2938_v19, %v2937_v10  ;;  %v2782_v53 = vpack.c.bf16 %v2772_v1, %v2771_v62  ;;  %v3887_v61 = vpack.c.bf16 %v3878_v27, %v3877_v0 }
 0x2a4   : > { %v3871_v32 = vsel %vm1634_vm2, %v9640_v57, %v9639_v38  ;;  %v6191_v59 = vunpack.i.h.bf16 %v8400_v15  ;;  %v6190_v11 = vunpack.i.l.bf16 %v8400_v15  ;;  %v3773_v5 = vpack.i.b16 %v8382_v51, %v8382_v51 }
 0x2a5   : > { %v3111_v47 = vpack.c.bf16 %v3098_v52, %v3097_v37  ;;  %v3884_v30 = vpack.c.bf16 %v3872_v46, %v3871_v32  ;;  %v8497_v38 = vmul.bf16 %v8183_v13, %v2944_v14  ;;  %v2616_v57 = vpack.c.bf16 %v2606_v50, %v2605_v9 }
 0x2a6   : > { %v8500_v21 = vmul.bf16 %v8170_v41, %v3110_v24  ;;  %v8503_v10 = vmul.bf16 %v8173_v17, %v3883_v44  ;;  %v9641_v1 = vpack.c.bf16 %v8106_v34, %v8114_v35  ;;  %v9642_v52 = vpack.c.bf16 %v8150_v42, %v8158_v6 }
 0x2a7   : > { %v6214_v23 = vpop.permute.xlu0 %6213  ;;  %v8490_v28 = vpop.permute.xlu1 %6203  ;;  %v9643_v41 = vunpack.i.h.bf16 %v8052_v8  ;;  %v9644_v44 = vunpack.i.l.bf16 %v8398_v26  ;;  %v9645_v34 = vunpack.i.l.bf16 %v8052_v8  ;;  %v8534_v6 = vmul.bf16 %v8183_v13, %v2948_v63 }
 0x2a8   : > { %v8509_v27 = vmul.bf16 %v8186_v25, %v9641_v1  ;;  %v8515_v0 = vmul.bf16 %v8189_v55, %v9642_v52  ;;  %v8537_v14 = vmul.bf16 %v8186_v25, %v2782_v53  ;;  %v9646_v15 = vunpack.i.h.bf16 %v8021_v40 }
 0x2a9   : > { %v2932_v50 = vsel %vm683_vm1, %v9643_v41, %v6186_v22  ;;  %v2931_v35 = vsel %vm683_vm1, %v9645_v34, %v9644_v44  ;;  %v9647_v8 = vunpack.i.l.bf16 %v8021_v40  ;;  %v3949_v37 = vmul.bf16 %v8173_v17, %v3887_v61 }
 0x2aa   : > { %v3106_v19 = vsel %vm851_vm0, %v6191_v59, %v9646_v15  ;;  %v3946_v13 = vmul.bf16 %v8208_v7, %v3884_v30  ;;  %v8552_v25 = vmul.bf16 %v8213_v20, %v3111_v47  ;;  %v8555_v53 = vmul.bf16 %v8189_v55, %v2616_v57 }
 0x2ab   : > { %v8529_v24 = vpop.permute.xlu0 %6218  ;;  %v8531_v42 = vpop.permute.xlu1 %6208  ;;  %v3105_v62 = vsel %vm851_vm0, %v6190_v11, %v9647_v8  ;;  %v2945_v46 = vpack.c.bf16 %v2932_v50, %v2931_v35  ;;  %v8559_v40 = vsel %vm851_vm0, %v6181_v45, %v6191_v59  ;;  %v8563_v32 = vsel %vm851_vm0, %v6180_v31, %v6190_v11 }
 0x2ac   : > { %v9488_v9 = vunpack.i.h.bf16 %v8531_v42  ;;  %v9489_v63 = vunpack.i.l.bf16 %v8531_v42  ;;  %v3109_v17 = vpack.c.bf16 %v3106_v19, %v3105_v62  ;;  %v6196_v30 = vunpack.i.h.bf16 %v8418_v16 }
 0x2ad   : > { %v6195_v55 = vunpack.i.l.bf16 %v8418_v16  ;;  %v9648_v47 = vunpack.i.l.bf16 %v8289_v60  ;;  %v6216_v11 = vunpack.i.h.bf16 %v6214_v23  ;;  %v6215_v57 = vunpack.i.l.bf16 %v6214_v23 }
 0x2ae   : > { %v3874_v61 = vsel %vm1634_vm2, %v6161_v33, %v9488_v9  ;;  %v6201_v33 = vunpack.i.h.bf16 %v8420_v18  ;;  %v6200_v41 = vunpack.i.l.bf16 %v8420_v18  ;;  %v3112_v16 = vpack.c.bf16 %v8559_v40, %v8563_v32  ;;  %v9673_v9 = vld [vmem:[#allocation25_spill] sm:$0xff] }
 0x2af   : > { %v3873_v45 = vsel %vm1634_vm2, %v9648_v47, %v9489_v63  ;;  %v6224_v59 = vpop.permute.xlu0 %6223  ;;  %v8577_v31 = vpop.permute.xlu1 %6233  ;;  %v9649_v60 = vunpack.i.h.bf16 %v8165_v36  ;;  %v9650_v35 = vunpack.i.l.bf16 %v8165_v36  ;;  %v9651_v19 = vunpack.i.h.bf16 %v8019_v56 }
 0x2b0   : > { %v6226_v1 = vunpack.i.h.bf16 %v6224_v59  ;;  %v6225_v52 = vunpack.i.l.bf16 %v6224_v59  ;;  %v3888_v50 = vpack.c.bf16 %v3874_v61, %v3873_v45  ;;  %v9652_v62 = vunpack.i.l.bf16 %v8019_v56 }
 0x2b1   : > { %v8599_v8 = vsel %vm683_vm1, %v6196_v30, %v9651_v19  ;;  %v9653_v45 = vunpack.i.l.bf16 %v8196_v12  ;;  %v3171_v19 = vmul.bf16 %v8244_v4, %v3109_v17  ;;  %v8672_v17 = vld [vmem:[%s9348_s2 + $0x8] ss:$12 sps:$4 sm:$0xff]   ;;  %v9674_v63 = vunpack.i.h.bf16 %v9673_v9 }
 0x2b2   : > { %v3108_v44 = vsel %vm851_vm0, %v6226_v1, %v9649_v60  ;;  %v3095_v34 = vsel %vm851_vm0, %v6215_v57, %v6225_v52  ;;  %v3096_v23 = vsel %vm851_vm0, %v6216_v11, %v6226_v1  ;;  %v3107_v15 = vsel %vm851_vm0, %v6225_v52, %v9650_v35 }
 0x2b3   : > { %v8605_v40 = vsel %vm683_vm1, %v6195_v55, %v9652_v62  ;;  %v3113_v32 = vpack.c.bf16 %v3108_v44, %v3107_v15  ;;  %v8607_v61 = vpop.permute.xlu0 %6228  ;;  %v8609_v47 = vpop.permute.xlu1 %6248  ;;  %v3950_v36 = vmul.bf16 %v8208_v7, %v3888_v50  ;;  %v3099_v59 = vsel %vm851_vm0, %v9653_v45, %v6215_v57 }
 0x2b4   : > { %v9654_v1 = vunpack.i.h.bf16 %v8196_v12  ;;  %v6221_v52 = vunpack.i.h.bf16 %v8529_v24  ;;  %v6220_v60 = vunpack.i.l.bf16 %v8529_v24  ;;  %v9655_v44 = vunpack.i.l.bf16 %v8398_v26 }
 0x2b5   : > { %4542 = vmatprep.subr.bf16.mxu0 %v3950_v36  ;;  %v3175_v7 = vmul.bf16 %v8244_v4, %v3113_v32  ;;  %v3116_v50 = vpack.c.bf16 %v3096_v23, %v3095_v34  ;;  %v8628_v57 = vmul.bf16 %v8266_v29, %v2945_v46  ;;  %v2928_v12 = vsel %vm683_vm1, %v6186_v22, %v6196_v30 }
 0x2b6   : > { %v3100_v56 = vsel %vm851_vm0, %v9654_v1, %v6216_v11  ;;  %v2927_v35 = vsel %vm683_vm1, %v9655_v44, %v6195_v55  ;;  %v2943_v24 = vpack.c.bf16 %v8599_v8, %v8605_v40  ;;  %v9656_v11 = vunpack.i.h.bf16 %v8030_v58  ;;  %4543 = vmatpush1.bf16.msra.mxu0 %v3949_v37 }
 0x2b7   : > { %v9657_v34 = vunpack.i.l.bf16 %v8030_v58  ;;  %v3115_v22 = vpack.c.bf16 %v3100_v56, %v3099_v59  ;;  %v6206_v46 = vunpack.i.h.bf16 %v8490_v28  ;;  %v6205_v30 = vunpack.i.l.bf16 %v8490_v28  ;;  %4544 = vmatprep.subr.bf16.mxu0 %v3946_v13  ;;  %v6239_v23 = vpop.permute.xlu0 %6238  ;;  %v8654_v15 = vpop.permute.xlu1 %6258  ;;  %4478 = vmatpush1.bf16.msra.mxu1 %v3175_v7 }
 0x2b8   : > { %v8642_v55 = vsel %vm515_vm3, %v6201_v33, %v9656_v11  ;;  %v9658_v58 = vunpack.i.l.bf16 %v8229_v43  ;;  %v9659_v62 = vunpack.i.h.bf16 %v8229_v43  ;;  %v6241_v40 = vunpack.i.h.bf16 %v6239_v23  ;;  %4479 = vmatprep.subr.bf16.mxu1 %v8500_v21 }
 0x2b9   : > { %v8650_v26 = vsel %vm515_vm3, %v6200_v41, %v9657_v34  ;;  %v6240_v32 = vunpack.i.l.bf16 %v6239_v23  ;;  %v6231_v13 = vunpack.i.h.bf16 %v8607_v61  ;;  %v6230_v36 = vunpack.i.l.bf16 %v8607_v61 }
 0x2ba   : > { %v2933_v8 = vsel %vm683_vm1, %v9658_v58, %v6220_v60  ;;  %v2934_v37 = vsel %vm683_vm1, %v9659_v62, %v6221_v52  ;;  %v3178_v4 = vmul.bf16 %v8247_v39, %v3116_v50  ;;  %v2946_v45 = vpack.c.bf16 %v2928_v12, %v2927_v35  ;;  %4545 = vmatpush1.bf16.msra.mxu0 %v8503_v10 }
 0x2bb   : > { %v9660_v43 = vunpack.i.h.bf16 %v8194_v2  ;;  %v2929_v21 = vsel %vm683_vm1, %v6220_v60, %v6240_v32  ;;  %v2930_v1 = vsel %vm683_vm1, %v6221_v52, %v6241_v40  ;;  %v9661_v61 = vunpack.i.l.bf16 %v8194_v2  ;;  %v8689_v50 = vpop.permute.xlu0 %6243  ;;  %v8691_v12 = vpop.permute.xlu1 %6268  ;;  %4480 = vmatpush1.bf16.msra.mxu1 %v3171_v19 }
 0x2bc   : > { %v2777_v44 = vpack.c.bf16 %v8642_v55, %v8650_v26  ;;  %v2949_v35 = vpack.c.bf16 %v2934_v37, %v2933_v8  ;;  %4583 = vmatprep.subr.bf16.mxu0 %v3178_v4  ;;  %v9662_v52 = vunpack.i.h.bf16 %v8050_v54  ;;  %v9663_v10 = vunpack.i.l.bf16 %v8050_v54  ;;  %4481 = vmatprep.subr.bf16.mxu1 %v8534_v6  ;;  %v9682_v26 = vld [vmem:[#allocation43_spill] sm:$0xff] }
 0x2bd   : > { %v2942_v59 = vsel %vm683_vm1, %v6241_v40, %v9660_v43  ;;  %v2941_v56 = vsel %vm683_vm1, %v6240_v32, %v9661_v61  ;;  %v3177_v11 = vmul.bf16 %v8213_v20, %v3115_v22  ;;  %v3174_v34 = vmul.bf16 %v8247_v39, %v3112_v16  ;;  %5640 = vmatmul.mubr.msk.bf16.vlgmr.msra.gmra.mxu0 %vm2240_vm4, %v8672_v17  ;;  %v9666_v16 = vld [vmem:[#allocation36_spill] sm:$0xff] }
 0x2be   : > { %v2947_v7 = vpack.c.bf16 %v2942_v59, %v2941_v56  ;;  %v8699_v2 = vsel %vm348_vm5, %v6206_v46, %v9662_v52  ;;  %v8707_v60 = vsel %vm348_vm5, %v6205_v30, %v9663_v10  ;;  %v6251_v23 = vunpack.i.h.bf16 %v8609_v47 }
 0x2bf   : > { %v6250_v19 = vunpack.i.l.bf16 %v8609_v47  ;;  %v2950_v58 = vpack.c.bf16 %v2930_v1, %v2929_v21  ;;  %v9664_v8 = vunpack.i.l.bf16 %v8257_v3  ;;  %v9665_v20 = vunpack.i.h.bf16 %v8257_v3  ;;  %4584 = vmatpush1.bf16.msra.mxu0 %v3177_v11  ;;  %v6254_v4 = vpop.permute.xlu0 %6253  ;;  %v6279_v43 = vpop.permute.xlu1 %6278 }
 0x2c0   : > { %v3009_v54 = vmul.bf16 %v8260_v48, %v2947_v7  ;;  %v3005_v6 = vmul.bf16 %v8260_v48, %v2943_v24  ;;  %v3008_v22 = vmul.bf16 %v9666_v16, %v2946_v45  ;;  %v2611_v37 = vpack.c.bf16 %v8699_v2, %v8707_v60  ;;  %4585 = vmatprep.subr.bf16.mxu0 %v3174_v34  ;;  %v9668_v34 = vld [vmem:[#allocation32_spill] sm:$0xff] }
 0x2c1   : > { %v8721_v62 = vsel %vm515_vm3, %v9664_v8, %v6230_v36  ;;  %v8727_v39 = vsel %vm515_vm3, %v9665_v20, %v6231_v13  ;;  %v6236_v40 = vunpack.i.h.bf16 %v8577_v31  ;;  %v6235_v32 = vunpack.i.l.bf16 %v8577_v31  ;;  %v9684_v60 = vld [vmem:[#allocation40_spill] sm:$0xff] }
 0x2c2   : > { %4482 = vmatpush1.bf16.msra.mxu1 %v3009_v54  ;;  %v3011_v3 = vmul.bf16 %v8266_v29, %v2949_v35  ;;  %v6246_v59 = vunpack.i.h.bf16 %v8689_v50  ;;  %v6245_v21 = vunpack.i.l.bf16 %v8689_v50  ;;  %v6281_v48 = vunpack.i.h.bf16 %v6279_v43 }
 0x2c3   : > { %v6280_v24 = vunpack.i.l.bf16 %v6279_v43  ;;  %4483 = vmatprep.subr.bf16.mxu1 %v8497_v38  ;;  %v9667_v45 = vmov 0   ;;  %v2783_v1 = vpack.c.bf16 %v8727_v39, %v8721_v62  ;;  %v8746_v31 = vsel %vm1466_vm6, %v6250_v19, %v6235_v32  ;;  %v8758_v38 = vld [vmem:[%s9348_s2 + $0x20] ss:$12 sps:$4 sm:$0xff]   ;;  %4586 = vmatpush1.bf16.msra.mxu0 %v8552_v25  ;;  %v8772_v20 = vpop.permute.xlu0 %6263 }
 0x2c4   : > { %4572 = vmatprep.mubr.bf16.mxu0 %v9667_v45  ;;  %v8752_v29 = vsel %vm1466_vm6, %v6251_v23, %v6236_v40  ;;  %v3012_v61 = vmul.bf16 %v9666_v16, %v2950_v58  ;;  %v6261_v56 = vunpack.i.h.bf16 %v8654_v15  ;;  %v6271_v35 = vunpack.i.h.bf16 %v8691_v12  ;;  %v8774_v16 = vpop.permute.xlu1 %6283 }
 0x2c5   : > { %v6270_v7 = vunpack.i.l.bf16 %v8691_v12  ;;  %v6256_v52 = vunpack.i.h.bf16 %v6254_v4  ;;  %v6255_v10 = vunpack.i.l.bf16 %v6254_v4  ;;  %v2764_v11 = vsel %vm515_vm3, %v6231_v13, %v6281_v48  ;;  %5641 = vmatmul.mubr.msk.bf16.gmra.mxu0 %vm2240_vm4, %v8758_v38 }
 0x2c6   : > { %v9669_v54 = vunpack.i.h.bf16 %v9668_v34  ;;  %v2763_v8 = vsel %vm515_vm3, %v6230_v36, %v6280_v24  ;;  %4587 = vmatprep.subr.bf16.mxu0 %v3012_v61  ;;  %v6260_v43 = vunpack.i.l.bf16 %v8654_v15  ;;  %v3707_v25 = vsel %vm1466_vm6, %v6235_v32, %v6245_v21  ;;  %4484 = vmatpush1.bf16.msra.mxu1 %v3005_v6 }
 0x2c7   : > { %v3708_v13 = vsel %vm1466_vm6, %v6236_v40, %v6246_v59  ;;  %v9670_v4 = vunpack.i.l.bf16 %v9668_v34  ;;  %v6266_v61 = vunpack.i.h.bf16 %v8772_v20  ;;  %4485 = vmatprep.subr.bf16.mxu1 %v8537_v14  ;;  %v8806_v6 = vsel %vm1466_vm6, %v6271_v35, %v6261_v56  ;;  %4588 = vmatpush1.bf16.msra.mxu0 %v3011_v3 }
 0x2c8   : > { %v2776_v58 = vsel %vm515_vm3, %v6281_v48, %v9669_v54  ;;  %v3721_v48 = vpack.c.bf16 %v8752_v29, %v8746_v31  ;;  %v6265_v54 = vunpack.i.l.bf16 %v8772_v20  ;;  %v8800_v40 = vsel %vm1466_vm6, %v6270_v7, %v6260_v43  ;;  %4589 = vmatprep.subr.bf16.mxu0 %v3008_v22  ;;  %v6274_v29 = vpop.permute.xlu0 %6273  ;;  %v6294_v34 = vpop.permute.xlu1 %6293 }
 0x2c9   : > { %v2775_v36 = vsel %vm515_vm3, %v6280_v24, %v9670_v4  ;;  %v2784_v32 = vpack.c.bf16 %v2764_v11, %v2763_v8  ;;  %v9671_v24 = vld [vmem:[#allocation24_spill] sm:$0xff]  ;;  %v2761_v14 = vsel %vm515_vm3, %v6255_v10, %v6200_v41  ;;  %v2762_v31 = vsel %vm515_vm3, %v6256_v52, %v6201_v33 }
 0x2ca   : > { %v2781_v15 = vpack.c.bf16 %v2776_v58, %v2775_v36  ;;  %4615 = vmatprep.mubr.bf16.mxu0 %v9671_v24  ;;  %v9672_v58 = vld [vmem:[#allocation37_spill] sm:$0xff]  ;;  %v3722_v36 = vpack.c.bf16 %v3708_v13, %v3707_v25  ;;  %v6276_v3 = vunpack.i.h.bf16 %v6274_v29  ;;  %v6275_v11 = vunpack.i.l.bf16 %v6274_v29 }
 0x2cb   : > { %v6296_v8 = vunpack.i.h.bf16 %v6294_v34  ;;  %v6295_v24 = vunpack.i.l.bf16 %v6294_v34  ;;  %v2766_v41 = vsel %vm515_vm3, %v9674_v63, %v6256_v52  ;;  %v9675_v18 = vunpack.i.l.bf16 %v9673_v9  ;;  %v9676_v63 = vld [vmem:[#allocation35_spill] sm:$0xff]  ;;  %4590 = vmatpush1.bf16.msra.mxu0 %v8628_v57  ;;  %v9681_v57 = vld [vmem:[#allocation38_spill] sm:$0xff] }
 0x2cc   : > { %v2843_v4 = vmul.bf16 %v9672_v58, %v2781_v15  ;;  %v3705_v22 = vsel %vm1466_vm6, %v6260_v43, %v6265_v54  ;;  %v3706_v25 = vsel %vm1466_vm6, %v6261_v56, %v6266_v61  ;;  %v9677_v52 = vunpack.i.h.bf16 %v9676_v63 }
 0x2cd   : > { %v2765_v33 = vsel %vm515_vm3, %v9675_v18, %v6255_v10  ;;  %v2598_v13 = vsel %vm348_vm5, %v6276_v3, %v6296_v8  ;;  %v9678_v10 = vld [vmem:[#allocation46_spill] sm:$0xff]  ;;  %v2780_v29 = vpack.c.bf16 %v2762_v31, %v2761_v14  ;;  %v2597_v43 = vsel %vm348_vm5, %v6275_v11, %v6295_v24  ;;  %v8851_v18 = vpop.permute.xlu1 %6298 }
 0x2ce   : > { %4486 = vmatpush1.bf16.msra.mxu1 %v2843_v4  ;;  %v2610_v9 = vsel %vm348_vm5, %v6296_v8, %v9677_v52  ;;  %v2846_v15 = vmul.bf16 %v9678_v10, %v2784_v32  ;;  %v9679_v34 = vunpack.i.l.bf16 %v9676_v63  ;;  %v8849_v4 = vpop.permute.xlu0 %6288  ;;  %v9680_v32 = vld [vmem:[#allocation39_spill] sm:$0xff]  ;;  %v2779_v31 = vpack.c.bf16 %v2766_v41, %v2765_v33 }
 0x2cf   : > { %4487 = vmatprep.subr.bf16.mxu1 %v8509_v27  ;;  %v2839_v27 = vmul.bf16 %v9672_v58, %v2777_v44  ;;  %v2673_v14 = vmul.bf16 %v9680_v32, %v2611_v37  ;;  %v3718_v63 = vpack.c.bf16 %v3706_v25, %v3705_v22  ;;  %v3717_v52 = vpack.c.bf16 %v8806_v6, %v8800_v40  ;;  %v9683_v58 = vld [vmem:[#allocation44_spill] sm:$0xff] }
 0x2d0   : > { %v2609_v56 = vsel %vm348_vm5, %v6295_v24, %v9679_v34  ;;  %4591 = vmatprep.subr.bf16.mxu0 %v2846_v15  ;;  %v2845_v24 = vmul.bf16 %v9681_v57, %v2783_v1  ;;  %v2618_v55 = vpack.c.bf16 %v2598_v13, %v2597_v43  ;;  %v3784_v44 = vmul.bf16 %v9682_v26, %v3722_v36 }
 0x2d1   : > { %v2615_v8 = vpack.c.bf16 %v2610_v9, %v2609_v56  ;;  %v3783_v2 = vmul.bf16 %v9683_v58, %v3721_v48  ;;  %v9685_v37 = vunpack.i.l.bf16 %v9684_v60  ;;  %v9686_v33 = vunpack.i.h.bf16 %v9684_v60  ;;  %v6309_v13 = vpop.permute.xlu1 %6308  ;;  %v9688_v56 = vld [vmem:[#allocation28_spill] sm:$0xff] }
 0x2d2   : > { %4488 = vmatpush1.bf16.msra.mxu1 %v2839_v27  ;;  %v2842_v39 = vmul.bf16 %v9678_v10, %v2780_v29  ;;  %v6286_v36 = vunpack.i.h.bf16 %v8774_v16  ;;  %v6285_v48 = vunpack.i.l.bf16 %v8774_v16  ;;  %v6291_v22 = vunpack.i.h.bf16 %v8849_v4  ;;  %4592 = vmatpush1.bf16.msra.mxu0 %v2845_v24  ;;  %v9687_v16 = vld [vmem:[#allocation47_spill] sm:$0xff] }
 0x2d3   : > { %v2601_v41 = vsel %vm348_vm5, %v9685_v37, %v6275_v11  ;;  %v2602_v62 = vsel %vm348_vm5, %v9686_v33, %v6276_v3  ;;  %4489 = vmatprep.subr.bf16.mxu1 %v8555_v53  ;;  %v2677_v1 = vmul.bf16 %v9680_v32, %v2615_v8  ;;  %v6290_v25 = vunpack.i.l.bf16 %v8849_v4  ;;  %v6304_v11 = vpop.permute.xlu0 %6303 }
 0x2d4   : > { %4593 = vmatprep.subr.bf16.mxu0 %v2842_v39  ;;  %v6306_v9 = vunpack.i.h.bf16 %v6304_v11  ;;  %v6305_v3 = vunpack.i.l.bf16 %v6304_v11  ;;  %v2841_v53 = vmul.bf16 %v9681_v57, %v2779_v31  ;;  %v3780_v10 = vmul.bf16 %v9682_v26, %v3718_v63  ;;  %v9691_v39 = vld [vmem:[#allocation48_spill] sm:$0xff] }
 0x2d5   : > { %v2617_v15 = vpack.c.bf16 %v2602_v62, %v2601_v41  ;;  %v9494_v29 = vunpack.i.h.bf16 %v8851_v18  ;;  %v6300_v43 = vunpack.i.l.bf16 %v8851_v18  ;;  %v2680_v34 = vmul.bf16 %v9687_v16, %v2618_v55  ;;  %v8916_v55 = vpop.permute.xlu1 %6318 }
 0x2d6   : > { %4490 = vmatpush1.bf16.msra.mxu1 %v2677_v1  ;;  %v9689_v27 = vunpack.i.h.bf16 %v9688_v56  ;;  %v2595_v31 = vsel %vm348_vm5, %v6305_v3, %v6205_v30  ;;  %v2596_v8 = vsel %vm348_vm5, %v6306_v9, %v6206_v46  ;;  %v9690_v57 = vunpack.i.l.bf16 %v9688_v56  ;;  %4594 = vmatpush1.bf16.msra.mxu0 %v2841_v53 }
 0x2d7   : > { %4491 = vmatprep.subr.bf16.mxu1 %v8515_v0  ;;  %v3541_v63 = vsel %vm1298_vm7, %v6285_v48, %v6290_v25  ;;  %v3542_v28 = vsel %vm1298_vm7, %v6286_v36, %v6291_v22  ;;  %v8914_v46 = vpop.permute.xlu0 %6313  ;;  %v2614_v26 = vpack.c.bf16 %v2596_v8, %v2595_v31  ;;  %4595 = vmatprep.subr.bf16.mxu0 %v2680_v34  ;;  %v9492_v37 = vunpack.i.h.bf16 %v8916_v55  ;;  %v9692_v31 = vld [vmem:[#allocation6_spill] sm:$0xff]  ;;  %v9693_v8 = vld [vmem:[#allocation41_spill] sm:$0xff] }
 0x2d8   : > { %v2600_v32 = vsel %vm348_vm5, %v9689_v27, %v6306_v9  ;;  %v2599_v24 = vsel %vm348_vm5, %v9690_v57, %v6305_v3  ;;  %v6316_v0 = vunpack.i.h.bf16 %v8914_v46  ;;  %v6315_v60 = vunpack.i.l.bf16 %v8914_v46 }
 0x2d9   : > { %v2613_v30 = vpack.c.bf16 %v2600_v32, %v2599_v24  ;;  %v9493_v41 = vunpack.i.l.bf16 %v8916_v55  ;;  %v6311_v33 = vunpack.i.h.bf16 %v6309_v13  ;;  %v6310_v62 = vunpack.i.l.bf16 %v6309_v13 }
 0x2da   : > { %4492 = vmatpush1.bf16.msra.mxu1 %v2673_v14  ;;  %v2679_v1 = vmul.bf16 %v9691_v39, %v2617_v15  ;;  %v2676_v11 = vmul.bf16 %v9687_v16, %v2614_v26  ;;  %v3545_v9 = vsel %vm1298_vm7, %v6300_v43, %v6285_v48  ;;  %v3546_v3 = vsel %vm1298_vm7, %v9494_v29, %v6286_v36  ;;  %v8949_v15 = vpop.permute.xlu1 %6328 }
 0x2db   : > { %4493 = vmatprep.subr.bf16.mxu1 %v3784_v44  ;;  %v2675_v53 = vmul.bf16 %v9691_v39, %v2613_v30  ;;  %v3556_v34 = vpack.c.bf16 %v3542_v28, %v3541_v63  ;;  %v3539_v14 = vsel %vm1298_vm7, %v6310_v62, %v6315_v60  ;;  %v3540_v13 = vsel %vm1298_vm7, %v6311_v33, %v6316_v0  ;;  %v6324_v36 = vpop.permute.xlu0 %6323  ;;  %v9695_v63 = vld [vmem:[#allocation51_spill] sm:$0xff]  ;;  %v9696_v30 = vld [vmem:[#allocation33_spill] sm:$0xff] }
 0x2dc   : > { %v3543_v48 = vsel %vm1298_vm7, %v9493_v41, %v6310_v62  ;;  %v3544_v44 = vsel %vm1298_vm7, %v9492_v37, %v6311_v33  ;;  %4596 = vmatpush1.bf16.msra.mxu0 %v2679_v1  ;;  %v6326_v16 = vunpack.i.h.bf16 %v6324_v36  ;;  %v6325_v56 = vunpack.i.l.bf16 %v6324_v36  ;;  %v9697_v33 = vld [vmem:[#allocation34_spill] sm:$0xff]  ;;  %v9700_v41 = vld [vmem:[#allocation49_spill] sm:$0xff] }
 0x2dd   : > { %v9490_v27 = vunpack.i.h.bf16 %v8949_v15  ;;  %v9491_v32 = vunpack.i.l.bf16 %v8949_v15  ;;  %4597 = vmatprep.subr.bf16.mxu0 %v2676_v11  ;;  %v9694_v57 = vpack.i.b16 %v9693_v8, %v9693_v8  ;;  %v3766_v28 = vpack.i.b16 %v9695_v63, %v9695_v63  ;;  %v9698_v1 = vld [vmem:[#allocation42_spill] sm:$0xff] }
 0x2de   : > { %4494 = vmatpush2.bf16.msra.mxu1 %v3783_v2  ;;  %v8963_v26 = vcombine.high %v9696_v30, %v9696_v30  ;;  %v8967_v62 = vcombine.high %v9697_v33, %v9697_v33  ;;  %v9699_v11 = vpack.i.b16 %v9698_v1, %v9698_v1  ;;  %v3555_v63 = vpack.c.bf16 %v3546_v3, %v3545_v9 }
 0x2df   : > { %v8957_v24 = vrot.slane %v9694_v57, %v9692_v31  ;;  %v3376_v2 = vsel %vm1130_vm8, %v6326_v16, %v9490_v27  ;;  %v3375_v39 = vsel %vm1130_vm8, %v6325_v56, %v9491_v32  ;;  %4495 = vmatprep.subr.bf16.mxu1 %v3780_v10  ;;  %v8985_v57 = vcombine.high %v9693_v8, %v9693_v8  ;;  %v6339_v33 = vpop.permute.xlu0 %6338  ;;  %v8987_v27 = vpop.permute.xlu1 %6333 }
 0x2e0   : > { %v8981_v36 = vrot.slane %v9699_v11, %v9692_v31  ;;  %v3551_v30 = vpack.c.bf16 %v3544_v44, %v3543_v48  ;;  %4598 = vmatpush1.bf16.msra.mxu0 %v2675_v53  ;;  %v3779_v10 = vmul.bf16 %v9683_v58, %v3717_v52  ;;  %v3552_v32 = vpack.c.bf16 %v3540_v13, %v3539_v14  ;;  %v9701_v58 = vld [vmem:[#allocation30_spill] sm:$0xff] }
 0x2e1   : > { %v9495_v37 = vunpack.i.h.bf16 %v8987_v27  ;;  %v6335_v11 = vunpack.i.l.bf16 %v8987_v27  ;;  %v3618_v29 = vmul.bf16 %v9700_v41, %v3556_v34  ;;  %v9000_v9 = vrot.slane %v3773_v5, %v9692_v31  ;;  %v9702_v48 = vld [vmem:[#allocation50_spill] sm:$0xff] }
 0x2e2   : > { %4496 = vmatpush2.bf16.msra.mxu1 %v3779_v10  ;;  %v3390_v3 = vpack.c.bf16 %v3376_v2, %v3375_v39  ;;  %v9003_v53 = vrot.slane %v3766_v28, %v9692_v31  ;;  %v3607_v40 = vpack.i.b16 %v8963_v26, %v8963_v26  ;;  %v3600_v6 = vpack.i.b16 %v8967_v62, %v8967_v62 }
 0x2e3   : > { %v3380_v52 = vsel %vm1130_vm8, %v9495_v37, %v6326_v16  ;;  %v3379_v51 = vsel %vm1130_vm8, %v6335_v11, %v6325_v56  ;;  %4497 = vmatprep.subr.bf16.mxu1 %v3618_v29  ;;  %v3441_v5 = vpack.i.b16 %v8985_v57, %v8985_v57  ;;  %v9021_v34 = vcombine.high %v9701_v58, %v9701_v58  ;;  %v6349_v14 = vpop.permute.xlu0 %6348  ;;  %v9023_v13 = vpop.permute.xlu1 %6343 }
 0x2e4   : > { %v3617_v44 = vmul.bf16 %v9702_v48, %v3555_v63  ;;  %v3614_v16 = vmul.bf16 %v9700_v41, %v3552_v32  ;;  %v3613_v8 = vmul.bf16 %v9702_v48, %v3551_v30  ;;  %v9030_v56 = vcombine.high %v9698_v1, %v9698_v1 }
 0x2e5   : > { %v6351_v29 = vunpack.i.h.bf16 %v6349_v14  ;;  %v6350_v28 = vunpack.i.l.bf16 %v6349_v14  ;;  %v6346_v2 = vunpack.i.h.bf16 %v9023_v13  ;;  %v6345_v39 = vunpack.i.l.bf16 %v9023_v13 }
 0x2e6   : > { %v6341_v10 = vunpack.i.h.bf16 %v6339_v33  ;;  %v6340_v58 = vunpack.i.l.bf16 %v6339_v33  ;;  %v3389_v37 = vpack.c.bf16 %v3380_v52, %v3379_v51  ;;  %4498 = vmatpush2.bf16.msra.mxu1 %v3617_v44  ;;  %v3452_v63 = vmul.bf16 %v8957_v24, %v3390_v3 }
 0x2e7   : > { %v3703_v41 = vsel %vm1466_vm6, %v6245_v21, %v6350_v28  ;;  %v3704_v32 = vsel %vm1466_vm6, %v6246_v59, %v6351_v29  ;;  %v3715_v1 = vsel %vm1466_vm6, %v6350_v28, %v6250_v19  ;;  %v3716_v30 = vsel %vm1466_vm6, %v6351_v29, %v6251_v23  ;;  %4499 = vmatprep.subr.bf16.mxu1 %v3614_v16  ;;  %v6354_v21 = vpop.permute.xlu0 %6353  ;;  %v9059_v3 = vpop.permute.xlu1 %6358  ;;  %v9703_v16 = vld [vmem:[#allocation26_spill] sm:$0xff] }
 0x2e8   : > { %v3723_v33 = vpack.c.bf16 %v3704_v32, %v3703_v41  ;;  %v3374_v50 = vsel %vm1130_vm8, %v6341_v10, %v6346_v2  ;;  %v3373_v59 = vsel %vm1130_vm8, %v6340_v58, %v6345_v39  ;;  %v3724_v19 = vpack.c.bf16 %v3716_v30, %v3715_v1 }
 0x2e9   : > { %v6356_v47 = vunpack.i.h.bf16 %v6354_v21  ;;  %v6355_v52 = vunpack.i.l.bf16 %v6354_v21  ;;  %v6361_v23 = vunpack.i.h.bf16 %v9059_v3  ;;  %v6360_v51 = vunpack.i.l.bf16 %v9059_v3 }
 0x2ea   : > { %4500 = vmatpush2.bf16.msra.mxu1 %v3613_v8  ;;  %v3786_v14 = vmul.bf16 %v9000_v9, %v3724_v19  ;;  %v3386_v48 = vpack.c.bf16 %v3374_v50, %v3373_v59  ;;  %v3785_v44 = vmul.bf16 %v9003_v53, %v3723_v33  ;;  %v3915_v29 = vcombine.high %v9703_v16, %v9703_v16 }
 0x2eb   : > { %v3701_v28 = vsel %vm1466_vm6, %v6265_v54, %v6355_v52  ;;  %v3702_v41 = vsel %vm1466_vm6, %v6266_v61, %v6356_v47  ;;  %v3713_v8 = vsel %vm1466_vm6, %v6355_v52, %v6270_v7  ;;  %v3714_v32 = vsel %vm1466_vm6, %v6356_v47, %v6271_v35  ;;  %4501 = vmatprep.subr.bf16.mxu1 %v3452_v63  ;;  %v6364_v61 = vpop.permute.xlu0 %6363  ;;  %v6369_v1 = vpop.permute.xlu1 %6368  ;;  %v9706_v47 = vld [vmem:[#allocation16_spill] sm:$0xff]  ;;  %v9707_v52 = vld [vmem:[#allocation27_spill] sm:$0xff] }
 0x2ec   : > { %v3378_v54 = vsel %vm1130_vm8, %v6361_v23, %v6341_v10  ;;  %v3377_v20 = vsel %vm1130_vm8, %v6360_v51, %v6340_v58  ;;  %v3451_v7 = vmul.bf16 %v8981_v36, %v3389_v37  ;;  %4599 = vmatprep.subr.bf16.mxu0 %v3786_v14  ;;  %v3448_v12 = vmul.bf16 %v8957_v24, %v3386_v48  ;;  %v9704_v58 = vld [vmem:[#allocation15_spill] sm:$0xff]  ;;  %v9705_v24 = vld [vmem:[#allocation29_spill] sm:$0xff] }
 0x2ed   : > { %v6366_v30 = vunpack.i.h.bf16 %v6364_v61  ;;  %v6365_v35 = vunpack.i.l.bf16 %v6364_v61  ;;  %v6371_v63 = vunpack.i.h.bf16 %v6369_v1  ;;  %4600 = vmatpush2.bf16.msra.mxu0 %v3785_v44  ;;  %v3939_v33 = vpack.i.b16 %v9021_v34, %v9021_v34 }
 0x2ee   : > { %v3719_v10 = vpack.c.bf16 %v3702_v41, %v3701_v28  ;;  %v3385_v50 = vpack.c.bf16 %v3378_v54, %v3377_v20  ;;  %v6370_v59 = vunpack.i.l.bf16 %v6369_v1  ;;  %4502 = vmatpush2.bf16.msra.mxu1 %v3451_v7  ;;  %v3720_v21 = vpack.c.bf16 %v3714_v32, %v3713_v8  ;;  %v9711_v1 = vld [vmem:[#allocation5_spill] sm:$0xff] }
 0x2ef   : > { %4503 = vmatprep.subr.bf16.mxu1 %v3448_v12  ;;  %v3612_v37 = vrot.slane %v3607_v40, %v9692_v31  ;;  %v3282_v19 = vmul.bf16 %v9705_v24, %v9704_v58  ;;  %v3281_v14 = vmul.bf16 %v9707_v52, %v9706_v47  ;;  %v3932_v48 = vpack.i.b16 %v3915_v29, %v3915_v29  ;;  %v6374_v16 = vpop.permute.xlu0 %6373  ;;  %v9111_v26 = vpop.permute.xlu1 %6378 }
 0x2f0   : > { %v3537_v34 = vsel %vm1298_vm7, %v6290_v25, %v6365_v35  ;;  %v3538_v44 = vsel %vm1298_vm7, %v6291_v22, %v6366_v30  ;;  %v9117_v40 = vrot.slane %v3600_v6, %v9692_v31  ;;  %v9123_v29 = vrot.slane %v3441_v5, %v9692_v31 }
 0x2f1   : > { %v9129_v4 = vsel %vm1298_vm7, %v6316_v0, %v6371_v63  ;;  %v9135_v22 = vsel %vm1298_vm7, %v6315_v60, %v6370_v59  ;;  %v9138_v25 = vrot.slane %v3939_v33, %v9692_v31  ;;  %v3434_v62 = vpack.i.b16 %v9030_v56, %v9030_v56 }
 0x2f2   : > { %v6375_v57 = vunpack.i.l.bf16 %v6374_v16  ;;  %v3447_v6 = vmul.bf16 %v8981_v36, %v3385_v50  ;;  %v3782_v5 = vmul.bf16 %v9000_v9, %v3720_v21  ;;  %v3781_v0 = vmul.bf16 %v9003_v53, %v3719_v10  ;;  %v9713_v10 = vld [vmem:[#allocation31_spill] sm:$0xff] }
 0x2f3   : > { %v3549_v46 = vsel %vm1298_vm7, %v6365_v35, %v6300_v43  ;;  %v9708_v60 = vunpack.i.h.bf16 %v8851_v18  ;;  %v3557_v41 = vpack.c.bf16 %v3538_v44, %v3537_v34  ;;  %v9154_v56 = vrot.slane %v3932_v48, %v9692_v31  ;;  %v6384_v32 = vpop.permute.xlu0 %6383  ;;  %v6389_v54 = vpop.permute.xlu1 %6388 }
 0x2f4   : > { %v9709_v36 = vunpack.i.l.bf16 %v8916_v55  ;;  %v9710_v53 = vunpack.i.h.bf16 %v8916_v55  ;;  %v3553_v18 = vpack.c.bf16 %v9129_v4, %v9135_v22  ;;  %v6376_v43 = vunpack.i.h.bf16 %v6374_v16  ;;  %4504 = vmatpush2.bf16.msra.mxu1 %v3447_v6  ;;  %4601 = vmatprep.subr.bf16.mxu0 %v3782_v5  ;;  %v9719_v22 = vld [vmem:[#allocation21_spill] sm:$0xff] }
 0x2f5   : > { %v3550_v28 = vsel %vm1298_vm7, %v6366_v30, %v9708_v60  ;;  %v6381_v20 = vunpack.i.h.bf16 %v9111_v26  ;;  %v6380_v61 = vunpack.i.l.bf16 %v9111_v26  ;;  %v9712_v7 = vmul.bf16 %v9705_v24, %v9711_v1  ;;  %4602 = vmatpush2.bf16.msra.mxu0 %v3781_v0 }
 0x2f6   : > { %v3547_v9 = vsel %vm1298_vm7, %v6370_v59, %v9709_v36  ;;  %v3548_v8 = vsel %vm1298_vm7, %v6371_v63, %v9710_v53  ;;  %v6386_v55 = vunpack.i.h.bf16 %v6384_v32  ;;  %v6385_v12 = vunpack.i.l.bf16 %v6384_v32 }
 0x2f7   : > { %4505 = vmatprep.subr.bf16.mxu1 %v9712_v7  ;;  %v3383_v30 = vsel %vm1130_vm8, %v6375_v57, %v6335_v11  ;;  %v6391_v35 = vunpack.i.h.bf16 %v6389_v54  ;;  %v6390_v63 = vunpack.i.l.bf16 %v6389_v54  ;;  %v3558_v33 = vpack.c.bf16 %v3550_v28, %v3549_v46 }
 0x2f8   : > { %v9714_v50 = vunpack.i.h.bf16 %v9713_v10  ;;  %v9715_v21 = vunpack.i.l.bf16 %v8531_v42  ;;  %v9716_v48 = vunpack.i.h.bf16 %v8531_v42  ;;  %v9717_v11 = vunpack.i.l.bf16 %v9713_v10  ;;  %v9721_v42 = vld [vmem:[#allocation7_spill] sm:$0xff] }
 0x2f9   : > { %v9718_v16 = vunpack.i.h.bf16 %v8987_v27  ;;  %v9720_v6 = vunpack.i.h.bf16 %v9719_v22  ;;  %v9722_v0 = vmul.bf16 %v9707_v52, %v9721_v42  ;;  %v3619_v46 = vmul.bf16 %v9117_v40, %v3557_v41 }
 0x2fa   : > { %v3882_v59 = vsel %vm1634_vm2, %v6386_v55, %v9714_v50  ;;  %v3869_v24 = vsel %vm1634_vm2, %v9715_v21, %v6385_v12  ;;  %v3870_v34 = vsel %vm1634_vm2, %v9716_v48, %v6386_v55  ;;  %v3881_v44 = vsel %vm1634_vm2, %v6385_v12, %v9717_v11  ;;  %v9726_v55 = vld [vmem:[#allocation45_spill] sm:$0xff]  ;;  %v9729_v50 = vld [vmem:[#allocation23_spill] sm:$0xff]  ;;  %v9731_v11 = vld [vmem:[#allocation8_spill] sm:$0xff] }
 0x2fb   : > { %v3384_v26 = vsel %vm1130_vm8, %v6376_v43, %v9718_v16  ;;  %v3889_v4 = vpack.c.bf16 %v3870_v34, %v3869_v24  ;;  %v3880_v5 = vsel %vm1634_vm2, %v6391_v35, %v9720_v6  ;;  %4506 = vmatpush2.bf16.msra.mxu1 %v9722_v0  ;;  %v9723_v60 = vunpack.i.l.bf16 %v8949_v15  ;;  %v9732_v16 = vld [vmem:[#allocation19_spill] sm:$0xff] }
 0x2fc   : > { %v9724_v28 = vunpack.i.l.bf16 %v9719_v22  ;;  %v3620_v53 = vmul.bf16 %v3612_v37, %v3558_v33  ;;  %4507 = vmatprep.subr.bf16.mxu1 %v3282_v19  ;;  %v3554_v32 = vpack.c.bf16 %v3548_v8, %v3547_v9  ;;  %v9725_v54 = vunpack.i.h.bf16 %v8949_v15  ;;  %v6402_v9 = vld [vmem:[%s9348_s2] ss:$12 sps:$4 sm:$0xff]  }
 0x2fd   : > { %v3371_v27 = vsel %vm1130_vm8, %v9723_v60, %v6375_v57  ;;  %v3381_v41 = vsel %vm1130_vm8, %v6380_v61, %v6360_v51  ;;  %v9727_v57 = vunpack.i.l.bf16 %v9726_v55  ;;  %v3890_v10 = vpack.c.bf16 %v3882_v59, %v3881_v44  ;;  %v9734_v22 = vld [vmem:[#allocation17_spill] sm:$0xff]  ;;  %v9737_v60 = vld [vmem:[#allocation12_spill] sm:$0xff] }
 0x2fe   : > { %v3879_v36 = vsel %vm1634_vm2, %v6390_v63, %v9724_v28  ;;  %v3372_v7 = vsel %vm1130_vm8, %v9725_v54, %v6376_v43  ;;  %v9728_v33 = vunpack.i.h.bf16 %v9726_v55  ;;  %4603 = vmatprep.subr.bf16.mxu0 %v3620_v53  ;;  %v3616_v15 = vmul.bf16 %v3612_v37, %v3554_v32  ;;  %v9740_v28 = vld [vmem:[#allocation11_spill] sm:$0xff]  ;;  %v9289_v53 = vld [vmem:[%s9349_s3] sm:$0x3] }
 0x2ff   : > { %v3867_v12 = vsel %vm1634_vm2, %v9727_v57, %v6390_v63  ;;  %v3392_v8 = vpack.c.bf16 %v3384_v26, %v3383_v30  ;;  %v3886_v43 = vpack.c.bf16 %v3880_v5, %v3879_v36  ;;  %v3382_v51 = vsel %vm1130_vm8, %v6381_v20, %v6361_v23  ;;  %4604 = vmatpush2.bf16.msra.mxu0 %v3619_v46  ;;  %v9735_v5 = vld [vmem:[#allocation18_spill] sm:$0xff]  ;;  %v9736_v46 = vld [vmem:[#allocation9_spill] sm:$0xff] }
 0x300   : > { %v3868_v19 = vsel %vm1634_vm2, %v9728_v33, %v6391_v35  ;;  %4508 = vmatpush2.bf16.msra.mxu1 %v3281_v14  ;;  %v3952_v35 = vmul.bf16 %v9138_v25, %v3890_v10  ;;  %v3951_v37 = vmul.bf16 %v9154_v56, %v3889_v4  ;;  %4605 = vmatprep.subr.bf16.mxu0 %v3616_v15  ;;  %v6406_v14 = vld [vmem:[%s9348_s2 + $0x1c] ss:$12 sps:$4 sm:$0xff]   ;;  %v9741_v36 = vld [vmem:[#allocation14_spill] sm:$0xff] }
 0x301   : > { %v3439_v63 = vrot.slane %v3434_v62, %v9692_v31  ;;  %v3252_v30 = vcombine.high %v9729_v50, %v9729_v50  ;;  %v3391_v59 = vpack.c.bf16 %v3372_v7, %v3371_v27  ;;  %v3369_v3 = vsel %vm1130_vm8, %v6345_v39, %v6380_v61  ;;  %v9730_v39 = vld [vmem:[#allocation22_spill] sm:$0xff]  ;;  %v9739_v27 = vld [vmem:[#allocation13_spill] sm:$0xff] }
 0x302   : > { %v3885_v23 = vpack.c.bf16 %v3868_v19, %v3867_v12  ;;  %v3615_v52 = vmul.bf16 %v9117_v40, %v3553_v18  ;;  %4648 = vmatprep.subr.bf16.mxu1 %v3952_v35  ;;  %v3370_v62 = vsel %vm1130_vm8, %v6346_v2, %v6381_v20  ;;  %v3454_v21 = vmul.bf16 %v9123_v29, %v3392_v8  ;;  %v6408_v2 = vld [vmem:[%s9348_s2 + $0x18] ss:$12 sps:$4 sm:$0xff]   ;;  %v4694_v10 = vld [vmem:[%s6568_s23 + $0x28] sm:$0xff] }
 0x303   : > { %4510 = vmatmul.mubr.bf16.vlgmr.msra.gmra.mxu1 %v6402_v9  ;;  %v3388_v24 = vpack.c.bf16 %v3382_v51, %v3381_v41  ;;  %v3948_v48 = vmul.bf16 %v9138_v25, %v3886_v43  ;;  %v3251_v40 = vcombine.high %v9730_v39, %v9730_v39  ;;  %v3275_v18 = vpack.i.b16 %v3252_v30, %v3252_v30  ;;  %v4698_v15 = vld [vmem:[%s6568_s23 + $0x48] sm:$0xff]  ;;  %v4701_v35 = vld [vmem:[%s6568_s23 + $0x60] sm:$0xff] }
 0x304   : > { %4606 = vmatpush2.bf16.msra.mxu0 %v3615_v52  ;;  %4649 = vmatpush1.bf16.msra.mxu1 %v3951_v37  ;;  %v3387_v61 = vpack.c.bf16 %v3370_v62, %v3369_v3  ;;  %v3453_v34 = vmul.bf16 %v3439_v63, %v3391_v59  ;;  %v3947_v13 = vmul.bf16 %v9154_v56, %v3885_v23  ;;  %v4690_v59 = vld [vmem:[%s6568_s23 + $0x8] sm:$0xff]  ;;  %v4693_v62 = vld [vmem:[%s6568_s23 + $0x20] sm:$0xff] }
 0x305   : > { %4607 = vmatprep.subr.bf16.mxu0 %v3454_v21  ;;  %4650 = vmatprep.subr.bf16.mxu1 %v3948_v48  ;;  %v3450_v49 = vmul.bf16 %v9123_v29, %v3388_v24  ;;  %v3268_v25 = vpack.i.b16 %v3251_v40, %v3251_v40  ;;  %v3280_v20 = vrot.slane %v3275_v18, %v9692_v31  ;;  %v9733_v29 = vld [vmem:[#allocation20_spill] sm:$0xff] }
 0x306   : > { %4519 = vmatprep.mubr.bf16.mxu1 %v6406_v14  ;;  %v3449_v44 = vmul.bf16 %v3439_v63, %v3387_v61  ;;  %v4697_v63 = vld [vmem:[%s6568_s23 + $0x40] sm:$0xff] }
 0x307   : > { %v3288_v26 = vmul.bf16 %v3280_v20, %v9732_v16  ;;  %v3273_v56 = vrot.slane %v3268_v25, %v9692_v31  ;;  %v3284_v6 = vmul.bf16 %v3280_v20, %v9734_v22  ;;  %v9738_v31 = vld [vmem:[#allocation10_spill] sm:$0xff]  ;;  %v4689_v18 = vld [vmem:[%s6568_s23] sm:$0xff] }
 0x308   : > { %4608 = vmatpush2.bf16.msra.mxu0 %v3453_v34  ;;  %4651 = vmatpush1.bf16.msra.mxu1 %v3947_v13 }
 0x309   : > { %4609 = vmatprep.subr.bf16.mxu0 %v3450_v49  ;;  %4959 = vmatprep.subr.bf16.mxu1 %v9731_v11  ;;  %v3287_v4 = vmul.bf16 %v3273_v56, %v9733_v29  ;;  %v3283_v0 = vmul.bf16 %v3273_v56, %v9735_v5 }
 0x30b   : > { %4520 = vmatmul.mubr.bf16.gmra.mxu1 %v6408_v2 }
 0x30c   : > { %4610 = vmatpush2.bf16.msra.mxu0 %v3449_v44  ;;  %4668 = vmatprep.mubr.bf16.mxu1 %v9667_v45 }
 0x30d   : > { %4611 = vmatprep.subr.bf16.mxu0 %v3288_v26 }
 0x310   : > { %4612 = vmatpush2.bf16.msra.mxu0 %v3287_v4 }
 0x311   : > { %4613 = vmatprep.subr.bf16.mxu0 %v3284_v6 }
 0x313   : > { %5642 = vmatmul.mubr.msk.bf16.vlgmr.msra.gmra.mxu1 %vm2240_vm4, %v8672_v17  ;;  %v9742_v17 = vld [vmem:[#allocation4_spill] sm:$0xff] }
 0x314   : > { %4614 = vmatpush2.bf16.msra.mxu0 %v3283_v0  ;;  %4960 = vmatpush1.bf16.msra.mxu1 %v9736_v46  ;;  %v4696_v0 = vld [vmem:[%s6568_s23 + $0x38] sm:$0xff] }
 0x315   : > { %5000 = vmatprep.subr.bf16.mxu0 %v9737_v60  ;;  %4961 = vmatprep.subr.bf16.mxu1 %v9738_v31  ;;  %v4700_v31 = vld [vmem:[%s6568_s23 + $0x58] sm:$0xff] }
 0x316   : > { %4678 = vmatprep.mubr.bf16.mxu1 %v9667_v45 }
 0x317   : > { %4616 = vmatmul.mubr.bf16.vlgmr.msra.gmra.mxu0 %v6402_v9 }
 0x318   : > { %5001 = vmatpush1.bf16.msra.mxu0 %v9739_v27  ;;  %4962 = vmatpush1.bf16.msra.mxu1 %v9740_v28 }
 0x319   : > { %5002 = vmatprep.subr.bf16.mxu0 %v9741_v36  ;;  %5041 = vmatprep.subr.bf16.mxu1 %v9711_v1 }
 0x31a   : > { %4625 = vmatprep.mubr.bf16.mxu0 %v6406_v14  ;;  %v4702_v14 = vld [vmem:[%s6568_s23 + $0x68] sm:$0xff] }
 0x31b   : > { %5643 = vmatmul.mubr.msk.bf16.gmra.mxu1 %vm2240_vm4, %v8758_v38  ;;  %v4818_v38 = vld [vmem:[%s9350_s4] sm:$0xf] }
 0x31c   : > { %5003 = vmatpush1.bf16.msra.mxu0 %v9742_v17  ;;  %4979 = vmatprep.mubr.bf16.mxu1 %v9667_v45 }
 0x31d   : > { %5082 = vmatprep.subr.bf16.mxu0 %v9732_v16  ;;  %4821 = vperm.xlu0 %6392, %v4818_v38  }
 0x31f   : > { %4626 = vmatmul.mubr.bf16.gmra.mxu0 %v6408_v2 }
 0x320   : > { %5020 = vmatprep.mubr.bf16.mxu0 %v9667_v45 }
 0x323   : > { %5676 = vmatmul.mubr.msk.bf16.vlgmr.msra.gmra.mxu1 %vm2240_vm4, %v9289_v53 }
 0x324   : > { %5042 = vmatpush1.bf16.msra.mxu1 %v9721_v42  ;;  %5061 = vmatprep.mubr.bf16.mxu1 %v9667_v45 }
 0x325   : > { %5043 = vmatprep.subr.bf16.mxu1 %v9704_v58 }
 0x327   : > { %5677 = vmatmul.mubr.msk.bf16.vlgmr.msra.gmra.mxu0 %vm2240_vm4, %v9289_v53 }
 0x328   : > { %5083 = vmatpush1.bf16.msra.mxu0 %v9733_v29  ;;  %5044 = vmatpush1.bf16.msra.mxu1 %v9706_v47 }
 0x329   : > { %5084 = vmatprep.subr.bf16.mxu0 %v9734_v22  ;;  %5102 = vmatprep.mubr.bf16.mxu0 %v9667_v45 }
 0x32b   : > { %5678 = vmatmul.mubr.msk.bf16.vlgmr.msra.gmra.mxu1 %vm2240_vm4, %v9289_v53 }
 0x32c   : > { %5085 = vmatpush1.bf16.msra.mxu0 %v9735_v5  ;;  %5143 = vmatprep.mubr.bf16.mxu1 %v9667_v45 }
 0x32f   : > { %5679 = vmatmul.mubr.msk.bf16.vlgmr.msra.gmra.mxu0 %vm2240_vm4, %v9289_v53 }
 0x330   : > { %5184 = vmatprep.mubr.bf16.mxu0 %v9667_v45 }
 0x37d   : > { %v4564_v58 = vpop.f32.mrf.mxu0 }
 0x37f   : > { %v4566_v47 = vpop.f32.mrf.mxu0 }
 0x381   : > { %v4568_v1 = vpop.f32.mrf.mxu0 }
 0x383   : > { %v4570_v42 = vpop.f32.mrf.mxu0 }
 0x385   : > { %v4574_v7 = vpop.f32.mrf.mxu0 }
 0x387   : > { %v4576_v55 = vpop.f32.mrf.mxu0 }
 0x389   : > { %v4578_v33 = vpop.f32.mrf.mxu0 }
 0x38b   : > { %v4580_v23 = vpop.f32.mrf.mxu0 }
 0x3c3   : > { %v4511_v32 = vpop.f32.mrf.mxu1 }
 0x3c4   : > { %v4565_v48 = vadd.f32 %v4564_v58, %v4511_v32 }
 0x3c5   : > { %v4513_v54 = vpop.f32.mrf.mxu1 }
 0x3c6   : > { %v4567_v37 = vadd.f32 %v4566_v47, %v4513_v54  ;;  %v4705_v2 = vadd.f32 %v4689_v18, %v4565_v48 }
 0x3c7   : > { %v4515_v41 = vpop.f32.mrf.mxu1 }
 0x3c8   : > { %v4569_v3 = vadd.f32 %v4568_v1, %v4515_v41  ;;  %v4706_v61 = vadd.f32 %v4690_v59, %v4567_v37  ;;  %v4703_v1 = vld [vmem:[%s6568_s23 + $0x70] sm:$0xff] }
 0x3c9   : > { %v4517_v57 = vpop.f32.mrf.mxu1 }
 0x3ca   : > { %v4571_v45 = vadd.f32 %v4570_v42, %v4517_v57  ;;  %v4709_v13 = vadd.f32 %v4693_v62, %v4569_v3 }
 0x3cb   : > { %v4521_v12 = vpop.f32.mrf.mxu1 }
 0x3cc   : > { %v4710_v8 = vadd.f32 %v4694_v10, %v4571_v45  ;;  %v4575_v43 = vadd.f32 %v4574_v7, %v4521_v12  ;;  %v4699_v7 = vld [vmem:[%s6568_s23 + $0x50] sm:$0xff]  ;;  %v4692_v12 = vld [vmem:[%s6568_s23 + $0x18] sm:$0xff] }
 0x3cd   : > { %v4523_v19 = vpop.f32.mrf.mxu1 }
 0x3ce   : > { %v4577_v9 = vadd.f32 %v4576_v55, %v4523_v19  ;;  %6473 = vtanh.f32 %v4710_v8  ;;  %v4713_v39 = vadd.f32 %v4697_v63, %v4575_v43  ;;  %v4704_v19 = vld [vmem:[%s6568_s23 + $0x78] sm:$0xff]  ;;  %v4695_v43 = vld [vmem:[%s6568_s23 + $0x30] sm:$0xff] }
 0x3cf   : > { %v4525_v51 = vpop.f32.mrf.mxu1 }
 0x3d0   : > { %v4714_v50 = vadd.f32 %v4698_v15, %v4577_v9  ;;  %v4579_v30 = vadd.f32 %v4578_v33, %v4525_v51 }
 0x3d1   : > { %v4527_v52 = vpop.f32.mrf.mxu1 }
 0x3d2   : > { %v4717_v21 = vadd.f32 %v4701_v35, %v4579_v30  ;;  %v4581_v24 = vadd.f32 %v4580_v23, %v4527_v52  ;;  %6475 = vtanh.f32 %v4714_v50  ;;  %v4691_v23 = vld [vmem:[%s6568_s23 + $0x10] sm:$0xff]  ;;  %s5733_s23 = smul.u32 48, %s9744_s19 }
 0x3d3   : > { %v4670_v40 = vpop.f32.mrf.mxu1 }
 0x3d4   : > { %v4718_v34 = vadd.f32 %v4702_v14, %v4581_v24  ;;  %6477 = vtanh.f32 %v4717_v21  ;;  %s224_s26 = scalar_lea.vmem %s9351_s5, %s5733_s23 }
 0x3d5   : > { %v4672_v49 = vpop.f32.mrf.mxu1 }
 0x3d6   : > { %6479 = vtanh.f32 %v4718_v34 }
 0x3d7   : > { %6481 = vtanh.f32 %v4713_v39  ;;  %v4617_v25 = vpop.f32.mrf.mxu0  ;;  %v4674_v20 = vpop.f32.mrf.mxu1 }
 0x3d8   : > { %6483 = vtanh.f32 %v4706_v61  ;;  %v4671_v63 = vadd.f32 %v4670_v40, %v4617_v25 }
 0x3d9   : > { %6485 = vtanh.f32 %v4709_v13  ;;  %v4619_v11 = vpop.f32.mrf.mxu0  ;;  %v4676_v44 = vpop.f32.mrf.mxu1 }
 0x3da   : > { %6487 = vtanh.f32 %v4705_v2  ;;  %v4673_v54 = vadd.f32 %v4672_v49, %v4619_v11  ;;  %v4707_v39 = vadd.f32 %v4691_v23, %v4671_v63 }
 0x3db   : > { %v4621_v16 = vpop.f32.mrf.mxu0  ;;  %v4680_v26 = vpop.f32.mrf.mxu1 }
 0x3dc   : > { %v6474_v5 = vpop.eup %6473  ;;  %v4675_v10 = vadd.f32 %v4674_v20, %v4621_v16  ;;  %v4708_v52 = vadd.f32 %v4692_v12, %v4673_v54 }
 0x3dd   : > { %v4623_v56 = vpop.f32.mrf.mxu0  ;;  %v4682_v29 = vpop.f32.mrf.mxu1 }
 0x3de   : > { %v4677_v4 = vadd.f32 %v4676_v44, %v4623_v56  ;;  %v4711_v62 = vadd.f32 %v4695_v43, %v4675_v10 }
 0x3df   : > { %v4627_v22 = vpop.f32.mrf.mxu0  ;;  %v4684_v6 = vpop.f32.mrf.mxu1 }
 0x3e0   : > { %v6476_v46 = vpop.eup %6475  ;;  %v4712_v38 = vadd.f32 %v4696_v0, %v4677_v4  ;;  %v4681_v58 = vadd.f32 %v4680_v26, %v4627_v22 }
 0x3e1   : > { %v4629_v60 = vpop.f32.mrf.mxu0  ;;  %v4686_v27 = vpop.f32.mrf.mxu1 }
 0x3e2   : > { %v6478_v28 = vpop.eup %6477  ;;  %v4683_v36 = vadd.f32 %v4682_v29, %v4629_v60  ;;  %6489 = vtanh.f32 %v4712_v38  ;;  %v4715_v50 = vadd.f32 %v4699_v7, %v4681_v58 }
 0x3e3   : > { %v6480_v17 = vpop.eup %6479  ;;  %v4631_v47 = vpop.f32.mrf.mxu0 }
 0x3e4   : > { %v9324_v42 = vpop.f32.mrf.mxu1  ;;  %v6482_v32 = vpop.eup %6481  ;;  %v4716_v41 = vadd.f32 %v4700_v31, %v4683_v36  ;;  %v4685_v55 = vadd.f32 %v4684_v6, %v4631_v47  ;;  %v5730_v57 = vpack.c.bf16 %v6480_v17, %v6476_v46 }
 0x3e5   : > { %v6484_v45 = vpop.eup %6483  ;;  %v4633_v33 = vpop.f32.mrf.mxu0  ;;  %v5729_v15 = vpack.c.bf16 %v6478_v28, %v6482_v32 }
 0x3e6   : > { %v9329_v9 = vpop.f32.mrf.mxu1  ;;  %v6486_v8 = vpop.eup %6485  ;;  %v4719_v51 = vadd.f32 %v4703_v1, %v4685_v55  ;;  %v4687_v35 = vadd.f32 %v4686_v27, %v4633_v33  ;;  %5123 = vmatprep.subr.bf16.mxu1 %v5730_v57  ;;  %v5718_v37 = vpack.c.bf16 %v6474_v5, %v6484_v45  ;;  %6491 = vtanh.f32 %v4716_v41 }
 0x3e7   : > { %5124 = vmatpush1.bf16.msra.mxu1 %v5729_v15  ;;  %v5022_v30 = vpop.f32.mrf.mxu0  ;;  %v6488_v3 = vpop.eup %6487 }
 0x3e8   : > { %v4985_v59 = vpop.f32.mrf.mxu1  ;;  %v4720_v14 = vadd.f32 %v4704_v19, %v4687_v35  ;;  %5125 = vmatprep.subr.bf16.mxu1 %v5718_v37  ;;  %6493 = vtanh.f32 %v4719_v51  ;;  %v5717_v21 = vpack.c.bf16 %v6486_v8, %v6488_v3  ;;  %v4822_v31 = vpop.permute.xlu0 %4821 }
 0x3e9   : > { %v5024_v24 = vpop.f32.mrf.mxu0  ;;  %v4982_v36 = vadd.f32 %v9324_v42, %v4822_v31  ;;  %v4984_v17 = vadd.f32 %v9329_v9, %v4822_v31  ;;  %v5023_v38 = vadd.f32 %v5022_v30, %v4822_v31 }
 0x3ea   : > { %v4986_v48 = vpop.f32.mrf.mxu1  ;;  %6495 = vtanh.f32 %v4720_v14  ;;  %v5025_v58 = vadd.f32 %v5024_v24, %v4822_v31 }
 0x3eb   : > { %6497 = vtanh.f32 %v4715_v50  ;;  %5126 = vmatpush1.bf16.msra.mxu1 %v5717_v21  ;;  %v5026_v40 = vpop.f32.mrf.mxu0  ;;  %v5205_v32 = vcombine.low %v4982_v36, %v4984_v17 }
 0x3ec   : > { %v5063_v18 = vpop.f32.mrf.mxu1  ;;  %6499 = vtanh.f32 %v4708_v52  ;;  %v5206_v54 = vcombine.low %v5023_v38, %v5025_v58 }
 0x3ed   : > { %6501 = vtanh.f32 %v4711_v62  ;;  %v5027_v61 = vpop.f32.mrf.mxu0  ;;  %v5064_v27 = vadd.f32 %v5063_v18, %v4822_v31  ;;  %5217 = vst [vmem:[%s224_s26] sm:$0xff] %v5205_v32 }
 0x3ee   : > { %v5065_v34 = vpop.f32.mrf.mxu1  ;;  %5680 = vmatmul.mubr.msk.bf16.vlgmr.msra.gmra.mxu1 %vm2240_vm4, %v9289_v53  ;;  %6503 = vtanh.f32 %v4707_v39  ;;  %5218 = vst [vmem:[%s224_s26 + $0x8] sm:$0xff] %v5206_v54 }
 0x3ef   : > { %v5104_v13 = vpop.f32.mrf.mxu0  ;;  %v6490_v11 = vpop.eup %6489  ;;  %v5066_v47 = vadd.f32 %v5065_v34, %v4822_v31 }
 0x3f0   : > { %v5067_v49 = vpop.f32.mrf.mxu1  ;;  %v5105_v28 = vadd.f32 %v5104_v13, %v4822_v31 }
 0x3f1   : > { %v5106_v2 = vpop.f32.mrf.mxu0  ;;  %v5207_v7 = vcombine.low %v5064_v27, %v5066_v47 }
 0x3f2   : > { %v5068_v25 = vpop.f32.mrf.mxu1  ;;  %v5107_v1 = vadd.f32 %v5106_v2, %v4822_v31 }
 0x3f3   : > { %v5108_v20 = vpop.f32.mrf.mxu0  ;;  %v6492_v44 = vpop.eup %6491  ;;  %5219 = vst [vmem:[%s224_s26 + $0x10] sm:$0xff] %v5207_v7 }
 0x3f4   : > { %v5208_v41 = vcombine.low %v5105_v28, %v5107_v1 }
 0x3f5   : > { %v5109_v16 = vpop.f32.mrf.mxu0  ;;  %v6494_v26 = vpop.eup %6493 }
 0x3f6   : > { %5220 = vst [vmem:[%s224_s26 + $0x18] sm:$0xff] %v5208_v41 }
 0x3f7   : > { %v6496_v56 = vpop.eup %6495 }
 0x3f8   : > { %v6498_v29 = vpop.eup %6497  ;;  %v5732_v4 = vpack.c.bf16 %v6496_v56, %v6492_v44 }
 0x3f9   : > { %v6500_v22 = vpop.eup %6499  ;;  %v5731_v6 = vpack.c.bf16 %v6494_v26, %v6498_v29 }
 0x3fa   : > { %v6502_v5 = vpop.eup %6501  ;;  %5164 = vmatprep.subr.bf16.mxu0 %v5732_v4  ;;  %v5720_v0 = vpack.c.bf16 %v6490_v11, %v6500_v22 }
 0x3fb   : > { %5165 = vmatpush1.bf16.msra.mxu0 %v5731_v6  ;;  %v6504_v46 = vpop.eup %6503 }
 0x3fc   : > { %5166 = vmatprep.subr.bf16.mxu0 %v5720_v0  ;;  %v5719_v60 = vpack.c.bf16 %v6502_v5, %v6504_v46 }
 0x3ff   : > { %5167 = vmatpush1.bf16.msra.mxu0 %v5719_v60 }
 0x402   : > { %5681 = vmatmul.mubr.msk.bf16.vlgmr.msra.gmra.mxu0 %vm2240_vm4, %v9289_v53 }
 0x4ae   : > { %v5145_v42 = vpop.f32.mrf.mxu1 }
 0x4af   : > { %v5146_v55 = vadd.f32 %v5145_v42, %v4822_v31 }
 0x4b0   : > { %v5147_v57 = vpop.f32.mrf.mxu1 }
 0x4b1   : > { %v5148_v45 = vadd.f32 %v5147_v57, %v4822_v31 }
 0x4b2   : > { %v5149_v12 = vpop.f32.mrf.mxu1 }
 0x4b3   : > { %v5209_v10 = vcombine.low %v5146_v55, %v5148_v45 }
 0x4b4   : > { %v5150_v33 = vpop.f32.mrf.mxu1 }
 0x4b5   : > { %5221 = vst [vmem:[%s224_s26 + $0x20] sm:$0xff] %v5209_v10 }
 0x4c2   : > { %v5186_v19 = vpop.f32.mrf.mxu0 }
 0x4c3   : > { %v5187_v9 = vadd.f32 %v5186_v19, %v4822_v31 }
 0x4c4   : > { %v5188_v15 = vpop.f32.mrf.mxu0 }
 0x4c5   : > { %v5189_v8 = vadd.f32 %v5188_v15, %v4822_v31 }
 0x4c6   : > { %v5190_v53 = vpop.f32.mrf.mxu0 }
 0x4c7   : > { %v5210_v43 = vcombine.low %v5187_v9, %v5189_v8 }
 0x4c8   : > { %v5191_v51 = vpop.f32.mrf.mxu0 }
 0x4c9   : > { %5222 = vst [vmem:[%s224_s26 + $0x28] sm:$0xff] %v5210_v43 }
 0x4ca PF: > { %s15_s18 = sadd.s32 1, %s6512_s18  }
 0x4cb   : > { %p12_p4 = scmp.ge.s32.totalorder %s15_s18, 4  }
 0x4cd   :  { %14 = sbr.rel (!%p12_p4) target bundleno = 1 (0x1), region = 78 }

</bundles_post_ra>
